<compile_context>
chip_gen: v5e
topology: v5e:2x2
jax: 0.10.0
libtpu: 0.0.40
codegen_flags: <defaults>
</compile_context>

<pallas_src>
import functools

import jax
import jax.numpy as jnp
import numpy as np
from jax import lax
from jax.experimental import pallas as pl
from jax.experimental.pallas import tpu as pltpu


# ------------------------------ Pallas kernel ------------------------------ #

def _channel_gcn_kernel(x_ref, w1_ref, b1_ref, w2_ref, b2_ref, sc_ref,
                        w4_ref, b4_ref, w5_ref, b5_ref, out_ref,
                        zeta_scr, kappa_scr, m_scr, r_scr,
                        *, bchunk, HW, N, K):
    f32 = jnp.float32
    bf16 = jnp.bfloat16

    # conv3 is a 1->1 channel 1x1 conv => a scalar affine; scalars live in SMEM.
    w3 = sc_ref[0]
    b3 = sc_ref[1]

    x_blk = x_ref[...]                                          # (Cin, bchunk*HW) bf16

    # Batched conv1 / conv2 over the whole chunk: one fat lane-dense MXU matmul
    # each (weight pushes amortized over bchunk images, biases folded in once).
    zeta_scr[...] = (
        jnp.dot(w1_ref[...], x_blk, preferred_element_type=f32) + b1_ref[...]
    ).astype(bf16)                                              # (C, bchunk*HW)
    kappa_scr[...] = (
        jnp.dot(w2_ref[...], x_blk, preferred_element_type=f32) + b2_ref[...]
    ).astype(bf16)                                              # (N, bchunk*HW)

    w4 = w4_ref[...]                                            # (N, N) f32
    b4 = b4_ref[...]                                            # (N, 1) f32

    # Small per-image core (affinity + softmax + conv3/conv4 + view shuffle).
    # bchunk is kept small by the VMEM-budget chunker and every live value in
    # the body is tiny ((C,N)/(N,C)/(HW,N)), so a static unroll with static,
    # aligned slice offsets is cheap and keeps lowering simple.
    for i in range(bchunk):
        lo = i * HW
        zeta_i = zeta_scr[:, lo:lo + HW]                        # (C, HW) bf16
        kappa_i = kappa_scr[:, lo:lo + HW]                      # (N, HW) bf16

        # F_c[c, n] = sum_s zeta[c, s] * kappa[n, s]
        f_c = lax.dot_general(zeta_i, kappa_i, (((1,), (1,)), ((), ())),
                              preferred_element_type=f32)       # (C, N)

        # softmax over the flattened (C*N) entries (kept in f32).
        mx = jnp.max(jnp.max(f_c, axis=1, keepdims=True), axis=0, keepdims=True)
        e = jnp.exp(f_c - mx)
        den = jnp.sum(jnp.sum(e, axis=1, keepdims=True), axis=0, keepdims=True)
        sm = e * pl.reciprocal(den, approx=True)                # divide -> EUP

        # F_c = relu(F_c + conv3(F_c))   (scalar affine)
        a = jnp.maximum((1.0 + w3) * sm + b3, 0.0)              # (C, N)

        # conv4 on the permuted tensor: g[no, c] = sum_ni W4[no, ni]*a[c, ni]+b4
        g = lax.dot_general(w4, a, (((1,), (1,)), ((), ())),
                            preferred_element_type=f32) + b4    # (N, C)

        # M[s, r] = sum_c zeta[c, s] * g[r, c]   -> (HW, N), no (HW,HW) blow-up.
        m_scr[...] = lax.dot_general(zeta_i, g.astype(bf16),
                                     (((0,), (1,)), ((), ())),
                                     preferred_element_type=f32)

        # PyTorch `.view(B, N, H, W)`: y[n', t] = M[n'*K + t//N, t%N].
        # Gather the strided row set {q, q+K, ...} of M into the conv5 RHS R so
        # R[n', i*HW + q*N + r] = M[n'*K + q, r]  (K small copies per image,
        # no K-fold MXU flop inflation, no DMA'd mask).
        for q in range(K):
            r_scr[:, lo + q * N: lo + (q + 1) * N] = \
                m_scr[pl.ds(q, N, stride=K), :]

    # conv5 + bias + residual for the whole chunk: one lane-dense matmul and a
    # single wide (multiple-of-128 lanes) output store.
    out_ref[...] = (
        jnp.dot(w5_ref[...], r_scr[...].astype(bf16), preferred_element_type=f32)
        + b5_ref[...] + x_blk.astype(f32)
    )


# --------------------------------- Wrapper --------------------------------- #

def _vmem_bytes_estimate(bchunk, Cin, C, N, HW):
    """Rough per-grid-step VMEM residency (double-buffered I/O + scratch)."""
    LW = bchunk * HW
    x_blk = Cin * LW * 2 * 2          # bf16 input block, double-buffered
    out_blk = Cin * LW * 4 * 2        # f32 output block, double-buffered
    scratch = C * LW * 2 + N * LW * 2 + HW * N * 4 + N * LW * 4
    weights = 2 * ((C * Cin + N * Cin + Cin * N) * 2 + N * N * 4
                   + (C + N + N + Cin) * 4)
    return x_blk + out_blk + scratch + weights


def _pick_bchunk(B, Cin, C, N, HW, budget_bytes):
    """Largest batch chunk that fits the VMEM budget, keeps the output block
    lane-dense (multiple of 128 lanes), and keeps >= 2 grid steps when possible
    so the parallel axis can be split across v7x's two TensorCores."""
    ok = []
    for d in range(1, B + 1):
        if B % d:
            continue
        if (d * HW) % 128 != 0 and d != B:
            continue
        if d > 1 and _vmem_bytes_estimate(d, Cin, C, N, HW) > budget_bytes:
            continue
        ok.append(d)
    if not ok:
        return 1
    multi = [d for d in ok if B // d >= 2]
    return max(multi) if multi else max(ok)


def channel_gcn_forward(x, params, *, vmem_budget_bytes=48 * 1024 * 1024):
    (w1, b1, w2, b2, w3, b3, w4, b4, w5, b5) = params
    B, Cin, H, W = x.shape
    HW = H * W
    C = Cin // 2
    N = Cin // 4

    assert HW % N == 0, "fused kernel requires H*W % (Cin//4) == 0"
    # TODO(synk): add a two-stage fallback for HW % (Cin//4) != 0 (the PyTorch
    # .view then crosses rows of the (HW, N) matmul result).
    K = HW // N

    f32, bf16 = jnp.float32, jnp.bfloat16

    # Lane-dense, batch-folded layout: (B, Cin, H, W) -> (Cin, B*HW), bf16.
    xw = (x.reshape(B, Cin, HW).transpose(1, 0, 2)
           .reshape(Cin, B * HW).astype(bf16))

    bchunk = _pick_bchunk(B, Cin, C, N, HW, vmem_budget_bytes)
    LW = bchunk * HW
    grid = (B // bchunk,)
    est = _vmem_bytes_estimate(bchunk, Cin, C, N, HW)
    vmem_limit = int(min(max(4 * est, 32 * 1024 * 1024), 100 * 1024 * 1024))

    b1c = b1.reshape(C, 1).astype(f32)
    b2c = b2.reshape(N, 1).astype(f32)
    b4c = b4.reshape(N, 1).astype(f32)
    b5c = b5.reshape(Cin, 1).astype(f32)
    scal = jnp.stack([jnp.asarray(w3), jnp.asarray(b3)]).reshape(2).astype(f32)

    kernel = functools.partial(_channel_gcn_kernel,
                               bchunk=bchunk, HW=HW, N=N, K=K)

    # All grid-invariant operands below are small (<= Cin x Cin); default
    # double-buffering is harmless now that the (HW,HW) constants are gone.
    outk = pl.pallas_call(
        kernel,
        out_shape=jax.ShapeDtypeStruct((Cin, B * HW), f32),
        grid=grid,
        in_specs=[
            pl.BlockSpec((Cin, LW), lambda b: (0, b)),            # x (bf16)
            pl.BlockSpec((C, Cin), lambda b: (0, 0)),             # W1 (bf16)
            pl.BlockSpec((C, 1), lambda b: (0, 0)),               # b1
            pl.BlockSpec((N, Cin), lambda b: (0, 0)),             # W2 (bf16)
            pl.BlockSpec((N, 1), lambda b: (0, 0)),               # b2
            pl.BlockSpec(memory_space=pltpu.MemorySpace.SMEM),    # (w3, b3)
            pl.BlockSpec((N, N), lambda b: (0, 0)),               # W4 (f32)
            pl.BlockSpec((N, 1), lambda b: (0, 0)),               # b4
            pl.BlockSpec((Cin, N), lambda b: (0, 0)),             # W5 (bf16)
            pl.BlockSpec((Cin, 1), lambda b: (0, 0)),             # b5
        ],
        out_specs=pl.BlockSpec((Cin, LW), lambda b: (0, b)),
        scratch_shapes=[
            pltpu.VMEM((C, LW), bf16),    # zeta for the whole chunk
            pltpu.VMEM((N, LW), bf16),    # kappa for the whole chunk
            pltpu.VMEM((HW, N), f32),     # per-image M (reused)
            pltpu.VMEM((N, LW), f32),     # R: conv5 RHS in output lane order
        ],
        compiler_params=pltpu.CompilerParams(
            dimension_semantics=("parallel",),
            vmem_limit_bytes=vmem_limit),
    )(xw, w1.astype(bf16), b1c, w2.astype(bf16), b2c, scal,
      w4.astype(f32), b4c, w5.astype(bf16), b5c)

    return (outk.reshape(Cin, B, HW).transpose(1, 0, 2)
                .reshape(B, Cin, H, W))


# --------------------------- pure-JAX reference ---------------------------- #

def channel_gcn_reference(x, params):
    (w1, b1, w2, b2, w3, b3, w4, b4, w5, b5) = params
    B, Cin, H, W = x.shape
    HW = H * W
    C = Cin // 2
    N = Cin // 4
    xr = x.reshape(B, Cin, HW)
    zeta = jnp.einsum('oc,bcs->bos', w1, xr) + b1[None, :, None]
    kappa = jnp.einsum('oc,bcs->bos', w2, xr) + b2[None, :, None]
    f_c = jnp.einsum('bcs,bns->bcn', zeta, kappa)
    sm = jax.nn.softmax(f_c.reshape(B, C * N), axis=-1).reshape(B, C, N)
    a = jax.nn.relu((1.0 + w3) * sm + b3)
    g = jnp.einsum('on,bcn->boc', w4, a) + b4[None, :, None]
    m = jnp.einsum('bcs,bnc->bsn', zeta, g)
    y = m.reshape(B, N, HW)
    out = jnp.einsum('on,bns->bos', w5, y) + b5[None, :, None] + xr
    return out.reshape(B, Cin, H, W)


# ----------------------------------- main ---------------------------------- #

if __name__ == "__main__":
    B, Cin, H, W = 4, 64, 16, 16      # in_channels=64 -> C=32, N=16, HW=256, K=16
    C = Cin // 2
    N = Cin // 4

    key = jax.random.PRNGKey(0)
    keys = jax.random.split(key, 11)
    s = 0.03
    x = jax.random.normal(keys[0], (B, Cin, H, W), jnp.float32)
    w1 = jax.random.normal(keys[1], (C, Cin), jnp.float32) * s
    b1 = jax.random.normal(keys[2], (C,), jnp.float32) * s
    w2 = jax.random.normal(keys[3], (N, Cin), jnp.float32) * s
    b2 = jax.random.normal(keys[4], (N,), jnp.float32) * s
    w3 = jax.random.normal(keys[5], (), jnp.float32) * s      # conv3 weight (1,1,1,1)
    b3 = jax.random.normal(keys[6], (), jnp.float32) * s      # conv3 bias (1,)
    w4 = jax.random.normal(keys[7], (N, N), jnp.float32) * s
    b4 = jax.random.normal(keys[8], (N,), jnp.float32) * s
    w5 = jax.random.normal(keys[9], (Cin, N), jnp.float32) * s
    b5 = jax.random.normal(keys[10], (Cin,), jnp.float32) * s
    params = (w1, b1, w2, b2, w3, b3, w4, b4, w5, b5)

    out = channel_gcn_forward(x, params)
    out = jax.block_until_ready(out)

    ref = channel_gcn_reference(x, params)
    assert out.shape == (B, Cin, H, W)
    # bf16 MXU operands (f32 accumulation) => tolerance relaxed vs the pure-f32 run.
    np.testing.assert_allclose(np.asarray(out), np.asarray(ref),
                               rtol=2e-2, atol=2e-2)
    print("KERNEL_OK")
</pallas_src>

<mosaic_0001>
module attributes {stable_mosaic.version = 11 : i64} {
  func.func @_channel_gcn_kernel(%arg0: i32, %arg1: memref<64x512xbf16, #tpu.memory_space<vmem>>, %arg2: memref<32x64xbf16, #tpu.memory_space<vmem>>, %arg3: memref<32x1xf32, #tpu.memory_space<vmem>>, %arg4: memref<16x64xbf16, #tpu.memory_space<vmem>>, %arg5: memref<16x1xf32, #tpu.memory_space<vmem>>, %arg6: memref<2xf32, #tpu.memory_space<smem>>, %arg7: memref<16x16xf32, #tpu.memory_space<vmem>>, %arg8: memref<16x1xf32, #tpu.memory_space<vmem>>, %arg9: memref<64x16xbf16, #tpu.memory_space<vmem>>, %arg10: memref<64x1xf32, #tpu.memory_space<vmem>>, %arg11: memref<64x512xf32, #tpu.memory_space<vmem>>, %arg12: memref<32x512xbf16, #tpu.memory_space<vmem>>, %arg13: memref<16x512xbf16, #tpu.memory_space<vmem>>, %arg14: memref<256x16xf32, #tpu.memory_space<vmem>>, %arg15: memref<16x512xf32, #tpu.memory_space<vmem>>) attributes {dimension_semantics = [#tpu.dimension_semantics<parallel>], iteration_bounds = array<i64: 2>, scalar_prefetch = 0 : i64, scratch_operands = 4 : i64, tpu.core_type = #tpu.core_type<tc>, window_params = [{transform_indices = @transform_0, window_bounds = array<i64: 64, 512>}, {pipeline_mode = #tpu.pipeline_mode<synchronous>, transform_indices = @transform_1, window_bounds = array<i64: 32, 64>}, {pipeline_mode = #tpu.pipeline_mode<synchronous>, transform_indices = @transform_2, window_bounds = array<i64: 32, 1>}, {pipeline_mode = #tpu.pipeline_mode<synchronous>, transform_indices = @transform_3, window_bounds = array<i64: 16, 64>}, {pipeline_mode = #tpu.pipeline_mode<synchronous>, transform_indices = @transform_4, window_bounds = array<i64: 16, 1>}, {transform_indices = @transform_5, window_bounds = array<i64: 2>}, {pipeline_mode = #tpu.pipeline_mode<synchronous>, transform_indices = @transform_6, window_bounds = array<i64: 16, 16>}, {pipeline_mode = #tpu.pipeline_mode<synchronous>, transform_indices = @transform_7, window_bounds = array<i64: 16, 1>}, {pipeline_mode = #tpu.pipeline_mode<synchronous>, transform_indices = @transform_8, window_bounds = array<i64: 64, 16>}, {pipeline_mode = #tpu.pipeline_mode<synchronous>, transform_indices = @transform_9, window_bounds = array<i64: 64, 1>}, {transform_indices = @transform_10, window_bounds = array<i64: 64, 512>}]} {
    %c0 = arith.constant 0 : index
    %0 = memref.load %arg6[%c0] : memref<2xf32, #tpu.memory_space<smem>>
    %c1 = arith.constant 1 : index
    %1 = memref.load %arg6[%c1] : memref<2xf32, #tpu.memory_space<smem>>
    %c0_0 = arith.constant 0 : index
    %c0_1 = arith.constant 0 : index
    %2 = vector.load %arg1[%c0_0, %c0_1] : memref<64x512xbf16, #tpu.memory_space<vmem>>, vector<64x512xbf16>
    %c0_2 = arith.constant 0 : index
    %c0_3 = arith.constant 0 : index
    %3 = vector.load %arg2[%c0_2, %c0_3] : memref<32x64xbf16, #tpu.memory_space<vmem>>, vector<32x64xbf16>
    %cst = arith.constant dense<0.000000e+00> : vector<32x512xf32>
    %4 = tpu.matmul %3, %2, %cst {dimension_numbers = #tpu.dot_dimension_numbers<[1], [0], [0], [1], [0, 0, 1, 1], [], []>} : vector<32x64xbf16>, vector<64x512xbf16>, vector<32x512xf32> -> vector<32x512xf32>
    %c0_4 = arith.constant 0 : index
    %c0_5 = arith.constant 0 : index
    %5 = vector.load %arg3[%c0_4, %c0_5] : memref<32x1xf32, #tpu.memory_space<vmem>>, vector<32x1xf32>
    %6 = vector.broadcast %5 : vector<32x1xf32> to vector<32x512xf32>
    %7 = arith.addf %4, %6 : vector<32x512xf32>
    %8 = arith.truncf %7 : vector<32x512xf32> to vector<32x512xbf16>
    %c0_6 = arith.constant 0 : index
    %c0_7 = arith.constant 0 : index
    %9 = vector.load %arg12[%c0_6, %c0_7] : memref<32x512xbf16, #tpu.memory_space<vmem>>, vector<32x512xbf16>
    tpu.vector_store %arg12[%c0_6, %c0_7], %8 {strides = array<i32>} : memref<32x512xbf16, #tpu.memory_space<vmem>>, vector<32x512xbf16>,
    %c0_8 = arith.constant 0 : index
    %c0_9 = arith.constant 0 : index
    %10 = vector.load %arg4[%c0_8, %c0_9] : memref<16x64xbf16, #tpu.memory_space<vmem>>, vector<16x64xbf16>
    %cst_10 = arith.constant dense<0.000000e+00> : vector<16x512xf32>
    %11 = tpu.matmul %10, %2, %cst_10 {dimension_numbers = #tpu.dot_dimension_numbers<[1], [0], [0], [1], [0, 0, 1, 1], [], []>} : vector<16x64xbf16>, vector<64x512xbf16>, vector<16x512xf32> -> vector<16x512xf32>
    %c0_11 = arith.constant 0 : index
    %c0_12 = arith.constant 0 : index
    %12 = vector.load %arg5[%c0_11, %c0_12] : memref<16x1xf32, #tpu.memory_space<vmem>>, vector<16x1xf32>
    %13 = vector.broadcast %12 : vector<16x1xf32> to vector<16x512xf32>
    %14 = arith.addf %11, %13 : vector<16x512xf32>
    %15 = arith.truncf %14 : vector<16x512xf32> to vector<16x512xbf16>
    %c0_13 = arith.constant 0 : index
    %c0_14 = arith.constant 0 : index
    %16 = vector.load %arg13[%c0_13, %c0_14] : memref<16x512xbf16, #tpu.memory_space<vmem>>, vector<16x512xbf16>
    tpu.vector_store %arg13[%c0_13, %c0_14], %15 {strides = array<i32>} : memref<16x512xbf16, #tpu.memory_space<vmem>>, vector<16x512xbf16>,
    %c0_15 = arith.constant 0 : index
    %c0_16 = arith.constant 0 : index
    %17 = vector.load %arg7[%c0_15, %c0_16] : memref<16x16xf32, #tpu.memory_space<vmem>>, vector<16x16xf32>
    %c0_17 = arith.constant 0 : index
    %c0_18 = arith.constant 0 : index
    %18 = vector.load %arg8[%c0_17, %c0_18] : memref<16x1xf32, #tpu.memory_space<vmem>>, vector<16x1xf32>
    %c0_19 = arith.constant 0 : index
    %c0_20 = arith.constant 0 : index
    %19 = vector.load %arg12[%c0_19, %c0_20] : memref<32x512xbf16, #tpu.memory_space<vmem>>, vector<32x256xbf16>
    %c0_21 = arith.constant 0 : index
    %c0_22 = arith.constant 0 : index
    %20 = vector.load %arg13[%c0_21, %c0_22] : memref<16x512xbf16, #tpu.memory_space<vmem>>, vector<16x256xbf16>
    %cst_23 = arith.constant dense<0.000000e+00> : vector<32x16xf32>
    %21 = tpu.matmul %19, %20, %cst_23 {dimension_numbers = #tpu.dot_dimension_numbers<[1], [1], [0], [0], [0, 0, 1, 0], [], []>} : vector<32x256xbf16>, vector<16x256xbf16>, vector<32x16xf32> -> vector<32x16xf32>
    %cst_24 = arith.constant dense<0xFF800000> : vector<32xf32>
    %22 = vector.multi_reduction <maximumf>, %21, %cst_24 [1] : vector<32x16xf32> to vector<32xf32>
    %23 = vector.shape_cast %22 : vector<32xf32> to vector<32x1xf32>
    %cst_25 = arith.constant dense<0xFF800000> : vector<1xf32>
    %24 = vector.multi_reduction <maximumf>, %23, %cst_25 [0] : vector<32x1xf32> to vector<1xf32>
    %25 = vector.shape_cast %24 : vector<1xf32> to vector<1x1xf32>
    %26 = vector.broadcast %25 : vector<1x1xf32> to vector<32x16xf32>
    %27 = arith.subf %21, %26 : vector<32x16xf32>
    %28 = math.exp %27 : vector<32x16xf32>
    %cst_26 = arith.constant dense<0.000000e+00> : vector<32xf32>
    %29 = vector.multi_reduction <add>, %28, %cst_26 [1] : vector<32x16xf32> to vector<32xf32>
    %30 = vector.shape_cast %29 : vector<32xf32> to vector<32x1xf32>
    %cst_27 = arith.constant dense<0.000000e+00> : vector<1xf32>
    %31 = vector.multi_reduction <add>, %30, %cst_27 [0] : vector<32x1xf32> to vector<1xf32>
    %32 = vector.shape_cast %31 : vector<1xf32> to vector<1x1xf32>
    %33 = tpu.reciprocal %32 {approx = true} : vector<1x1xf32> -> vector<1x1xf32>
    %34 = vector.broadcast %33 : vector<1x1xf32> to vector<32x16xf32>
    %35 = arith.mulf %28, %34 : vector<32x16xf32>
    %cst_28 = arith.constant 1.000000e+00 : f32
    %36 = arith.addf %cst_28, %0 : f32
    %37 = vector.broadcast %36 : f32 to vector<32x16xf32>
    %38 = arith.mulf %37, %35 : vector<32x16xf32>
    %39 = vector.broadcast %1 : f32 to vector<32x16xf32>
    %40 = arith.addf %38, %39 : vector<32x16xf32>
    %cst_29 = arith.constant 0.000000e+00 : f32
    %41 = vector.broadcast %cst_29 : f32 to vector<32x16xf32>
    %42 = arith.maximumf %40, %41 : vector<32x16xf32>
    %cst_30 = arith.constant dense<0.000000e+00> : vector<16x32xf32>
    %43 = tpu.matmul %17, %42, %cst_30 {dimension_numbers = #tpu.dot_dimension_numbers<[1], [1], [0], [0], [0, 0, 1, 0], [], []>} : vector<16x16xf32>, vector<32x16xf32>, vector<16x32xf32> -> vector<16x32xf32>
    %44 = vector.broadcast %18 : vector<16x1xf32> to vector<16x32xf32>
    %45 = arith.addf %43, %44 : vector<16x32xf32>
    %46 = arith.truncf %45 : vector<16x32xf32> to vector<16x32xbf16>
    %cst_31 = arith.constant dense<0.000000e+00> : vector<256x16xf32>
    %47 = tpu.matmul %19, %46, %cst_31 {dimension_numbers = #tpu.dot_dimension_numbers<[0], [1], [1], [0], [0, 1, 1, 0], [], []>} : vector<32x256xbf16>, vector<16x32xbf16>, vector<256x16xf32> -> vector<256x16xf32>
    %c0_32 = arith.constant 0 : index
    %c0_33 = arith.constant 0 : index
    %48 = vector.load %arg14[%c0_32, %c0_33] : memref<256x16xf32, #tpu.memory_space<vmem>>, vector<256x16xf32>
    tpu.vector_store %arg14[%c0_32, %c0_33], %47 {strides = array<i32>} : memref<256x16xf32, #tpu.memory_space<vmem>>, vector<256x16xf32>,
    %c0_34 = arith.constant 0 : index
    %c0_35 = arith.constant 0 : index
    %49 = tpu.strided_load %arg14[%c0_34, %c0_35] {strides = array<i32: 16, 1>} : memref<256x16xf32, #tpu.memory_space<vmem>>, vector<16x16xf32>
    %c0_36 = arith.constant 0 : index
    %c0_37 = arith.constant 0 : index
    %50 = vector.load %arg15[%c0_36, %c0_37] : memref<16x512xf32, #tpu.memory_space<vmem>>, vector<16x16xf32>
    tpu.vector_store %arg15[%c0_36, %c0_37], %49 {strides = array<i32>} : memref<16x512xf32, #tpu.memory_space<vmem>>, vector<16x16xf32>,
    %c1_38 = arith.constant 1 : index
    %c0_39 = arith.constant 0 : index
    %51 = tpu.strided_load %arg14[%c1_38, %c0_39] {strides = array<i32: 16, 1>} : memref<256x16xf32, #tpu.memory_space<vmem>>, vector<16x16xf32>
    %c0_40 = arith.constant 0 : index
    %c16 = arith.constant 16 : index
    %52 = vector.load %arg15[%c0_40, %c16] : memref<16x512xf32, #tpu.memory_space<vmem>>, vector<16x16xf32>
    tpu.vector_store %arg15[%c0_40, %c16], %51 {strides = array<i32>} : memref<16x512xf32, #tpu.memory_space<vmem>>, vector<16x16xf32>,
    %c2 = arith.constant 2 : index
    %c0_41 = arith.constant 0 : index
    %53 = tpu.strided_load %arg14[%c2, %c0_41] {strides = array<i32: 16, 1>} : memref<256x16xf32, #tpu.memory_space<vmem>>, vector<16x16xf32>
    %c0_42 = arith.constant 0 : index
    %c32 = arith.constant 32 : index
    %54 = vector.load %arg15[%c0_42, %c32] : memref<16x512xf32, #tpu.memory_space<vmem>>, vector<16x16xf32>
    tpu.vector_store %arg15[%c0_42, %c32], %53 {strides = array<i32>} : memref<16x512xf32, #tpu.memory_space<vmem>>, vector<16x16xf32>,
    %c3 = arith.constant 3 : index
    %c0_43 = arith.constant 0 : index
    %55 = tpu.strided_load %arg14[%c3, %c0_43] {strides = array<i32: 16, 1>} : memref<256x16xf32, #tpu.memory_space<vmem>>, vector<16x16xf32>
    %c0_44 = arith.constant 0 : index
    %c48 = arith.constant 48 : index
    %56 = vector.load %arg15[%c0_44, %c48] : memref<16x512xf32, #tpu.memory_space<vmem>>, vector<16x16xf32>
    tpu.vector_store %arg15[%c0_44, %c48], %55 {strides = array<i32>} : memref<16x512xf32, #tpu.memory_space<vmem>>, vector<16x16xf32>,
    %c4 = arith.constant 4 : index
    %c0_45 = arith.constant 0 : index
    %57 = tpu.strided_load %arg14[%c4, %c0_45] {strides = array<i32: 16, 1>} : memref<256x16xf32, #tpu.memory_space<vmem>>, vector<16x16xf32>
    %c0_46 = arith.constant 0 : index
    %c64 = arith.constant 64 : index
    %58 = vector.load %arg15[%c0_46, %c64] : memref<16x512xf32, #tpu.memory_space<vmem>>, vector<16x16xf32>
    tpu.vector_store %arg15[%c0_46, %c64], %57 {strides = array<i32>} : memref<16x512xf32, #tpu.memory_space<vmem>>, vector<16x16xf32>,
    %c5 = arith.constant 5 : index
    %c0_47 = arith.constant 0 : index
    %59 = tpu.strided_load %arg14[%c5, %c0_47] {strides = array<i32: 16, 1>} : memref<256x16xf32, #tpu.memory_space<vmem>>, vector<16x16xf32>
    %c0_48 = arith.constant 0 : index
    %c80 = arith.constant 80 : index
    %60 = vector.load %arg15[%c0_48, %c80] : memref<16x512xf32, #tpu.memory_space<vmem>>, vector<16x16xf32>
    tpu.vector_store %arg15[%c0_48, %c80], %59 {strides = array<i32>} : memref<16x512xf32, #tpu.memory_space<vmem>>, vector<16x16xf32>,
    %c6 = arith.constant 6 : index
    %c0_49 = arith.constant 0 : index
    %61 = tpu.strided_load %arg14[%c6, %c0_49] {strides = array<i32: 16, 1>} : memref<256x16xf32, #tpu.memory_space<vmem>>, vector<16x16xf32>
    %c0_50 = arith.constant 0 : index
    %c96 = arith.constant 96 : index
    %62 = vector.load %arg15[%c0_50, %c96] : memref<16x512xf32, #tpu.memory_space<vmem>>, vector<16x16xf32>
    tpu.vector_store %arg15[%c0_50, %c96], %61 {strides = array<i32>} : memref<16x512xf32, #tpu.memory_space<vmem>>, vector<16x16xf32>,
    %c7 = arith.constant 7 : index
    %c0_51 = arith.constant 0 : index
    %63 = tpu.strided_load %arg14[%c7, %c0_51] {strides = array<i32: 16, 1>} : memref<256x16xf32, #tpu.memory_space<vmem>>, vector<16x16xf32>
    %c0_52 = arith.constant 0 : index
    %c112 = arith.constant 112 : index
    %64 = vector.load %arg15[%c0_52, %c112] : memref<16x512xf32, #tpu.memory_space<vmem>>, vector<16x16xf32>
    tpu.vector_store %arg15[%c0_52, %c112], %63 {strides = array<i32>} : memref<16x512xf32, #tpu.memory_space<vmem>>, vector<16x16xf32>,
    %c8 = arith.constant 8 : index
    %c0_53 = arith.constant 0 : index
    %65 = tpu.strided_load %arg14[%c8, %c0_53] {strides = array<i32: 16, 1>} : memref<256x16xf32, #tpu.memory_space<vmem>>, vector<16x16xf32>
    %c0_54 = arith.constant 0 : index
    %c128 = arith.constant 128 : index
    %66 = vector.load %arg15[%c0_54, %c128] : memref<16x512xf32, #tpu.memory_space<vmem>>, vector<16x16xf32>
    tpu.vector_store %arg15[%c0_54, %c128], %65 {strides = array<i32>} : memref<16x512xf32, #tpu.memory_space<vmem>>, vector<16x16xf32>,
    %c9 = arith.constant 9 : index
    %c0_55 = arith.constant 0 : index
    %67 = tpu.strided_load %arg14[%c9, %c0_55] {strides = array<i32: 16, 1>} : memref<256x16xf32, #tpu.memory_space<vmem>>, vector<16x16xf32>
    %c0_56 = arith.constant 0 : index
    %c144 = arith.constant 144 : index
    %68 = vector.load %arg15[%c0_56, %c144] : memref<16x512xf32, #tpu.memory_space<vmem>>, vector<16x16xf32>
    tpu.vector_store %arg15[%c0_56, %c144], %67 {strides = array<i32>} : memref<16x512xf32, #tpu.memory_space<vmem>>, vector<16x16xf32>,
    %c10 = arith.constant 10 : index
    %c0_57 = arith.constant 0 : index
    %69 = tpu.strided_load %arg14[%c10, %c0_57] {strides = array<i32: 16, 1>} : memref<256x16xf32, #tpu.memory_space<vmem>>, vector<16x16xf32>
    %c0_58 = arith.constant 0 : index
    %c160 = arith.constant 160 : index
    %70 = vector.load %arg15[%c0_58, %c160] : memref<16x512xf32, #tpu.memory_space<vmem>>, vector<16x16xf32>
    tpu.vector_store %arg15[%c0_58, %c160], %69 {strides = array<i32>} : memref<16x512xf32, #tpu.memory_space<vmem>>, vector<16x16xf32>,
    %c11 = arith.constant 11 : index
    %c0_59 = arith.constant 0 : index
    %71 = tpu.strided_load %arg14[%c11, %c0_59] {strides = array<i32: 16, 1>} : memref<256x16xf32, #tpu.memory_space<vmem>>, vector<16x16xf32>
    %c0_60 = arith.constant 0 : index
    %c176 = arith.constant 176 : index
    %72 = vector.load %arg15[%c0_60, %c176] : memref<16x512xf32, #tpu.memory_space<vmem>>, vector<16x16xf32>
    tpu.vector_store %arg15[%c0_60, %c176], %71 {strides = array<i32>} : memref<16x512xf32, #tpu.memory_space<vmem>>, vector<16x16xf32>,
    %c12 = arith.constant 12 : index
    %c0_61 = arith.constant 0 : index
    %73 = tpu.strided_load %arg14[%c12, %c0_61] {strides = array<i32: 16, 1>} : memref<256x16xf32, #tpu.memory_space<vmem>>, vector<16x16xf32>
    %c0_62 = arith.constant 0 : index
    %c192 = arith.constant 192 : index
    %74 = vector.load %arg15[%c0_62, %c192] : memref<16x512xf32, #tpu.memory_space<vmem>>, vector<16x16xf32>
    tpu.vector_store %arg15[%c0_62, %c192], %73 {strides = array<i32>} : memref<16x512xf32, #tpu.memory_space<vmem>>, vector<16x16xf32>,
    %c13 = arith.constant 13 : index
    %c0_63 = arith.constant 0 : index
    %75 = tpu.strided_load %arg14[%c13, %c0_63] {strides = array<i32: 16, 1>} : memref<256x16xf32, #tpu.memory_space<vmem>>, vector<16x16xf32>
    %c0_64 = arith.constant 0 : index
    %c208 = arith.constant 208 : index
    %76 = vector.load %arg15[%c0_64, %c208] : memref<16x512xf32, #tpu.memory_space<vmem>>, vector<16x16xf32>
    tpu.vector_store %arg15[%c0_64, %c208], %75 {strides = array<i32>} : memref<16x512xf32, #tpu.memory_space<vmem>>, vector<16x16xf32>,
    %c14 = arith.constant 14 : index
    %c0_65 = arith.constant 0 : index
    %77 = tpu.strided_load %arg14[%c14, %c0_65] {strides = array<i32: 16, 1>} : memref<256x16xf32, #tpu.memory_space<vmem>>, vector<16x16xf32>
    %c0_66 = arith.constant 0 : index
    %c224 = arith.constant 224 : index
    %78 = vector.load %arg15[%c0_66, %c224] : memref<16x512xf32, #tpu.memory_space<vmem>>, vector<16x16xf32>
    tpu.vector_store %arg15[%c0_66, %c224], %77 {strides = array<i32>} : memref<16x512xf32, #tpu.memory_space<vmem>>, vector<16x16xf32>,
    %c15 = arith.constant 15 : index
    %c0_67 = arith.constant 0 : index
    %79 = tpu.strided_load %arg14[%c15, %c0_67] {strides = array<i32: 16, 1>} : memref<256x16xf32, #tpu.memory_space<vmem>>, vector<16x16xf32>
    %c0_68 = arith.constant 0 : index
    %c240 = arith.constant 240 : index
    %80 = vector.load %arg15[%c0_68, %c240] : memref<16x512xf32, #tpu.memory_space<vmem>>, vector<16x16xf32>
    tpu.vector_store %arg15[%c0_68, %c240], %79 {strides = array<i32>} : memref<16x512xf32, #tpu.memory_space<vmem>>, vector<16x16xf32>,
    %c0_69 = arith.constant 0 : index
    %c256 = arith.constant 256 : index
    %81 = vector.load %arg12[%c0_69, %c256] : memref<32x512xbf16, #tpu.memory_space<vmem>>, vector<32x256xbf16>
    %c0_70 = arith.constant 0 : index
    %c256_71 = arith.constant 256 : index
    %82 = vector.load %arg13[%c0_70, %c256_71] : memref<16x512xbf16, #tpu.memory_space<vmem>>, vector<16x256xbf16>
    %cst_72 = arith.constant dense<0.000000e+00> : vector<32x16xf32>
    %83 = tpu.matmul %81, %82, %cst_72 {dimension_numbers = #tpu.dot_dimension_numbers<[1], [1], [0], [0], [0, 0, 1, 0], [], []>} : vector<32x256xbf16>, vector<16x256xbf16>, vector<32x16xf32> -> vector<32x16xf32>
    %cst_73 = arith.constant dense<0xFF800000> : vector<32xf32>
    %84 = vector.multi_reduction <maximumf>, %83, %cst_73 [1] : vector<32x16xf32> to vector<32xf32>
    %85 = vector.shape_cast %84 : vector<32xf32> to vector<32x1xf32>
    %cst_74 = arith.constant dense<0xFF800000> : vector<1xf32>
    %86 = vector.multi_reduction <maximumf>, %85, %cst_74 [0] : vector<32x1xf32> to vector<1xf32>
    %87 = vector.shape_cast %86 : vector<1xf32> to vector<1x1xf32>
    %88 = vector.broadcast %87 : vector<1x1xf32> to vector<32x16xf32>
    %89 = arith.subf %83, %88 : vector<32x16xf32>
    %90 = math.exp %89 : vector<32x16xf32>
    %cst_75 = arith.constant dense<0.000000e+00> : vector<32xf32>
    %91 = vector.multi_reduction <add>, %90, %cst_75 [1] : vector<32x16xf32> to vector<32xf32>
    %92 = vector.shape_cast %91 : vector<32xf32> to vector<32x1xf32>
    %cst_76 = arith.constant dense<0.000000e+00> : vector<1xf32>
    %93 = vector.multi_reduction <add>, %92, %cst_76 [0] : vector<32x1xf32> to vector<1xf32>
    %94 = vector.shape_cast %93 : vector<1xf32> to vector<1x1xf32>
    %95 = tpu.reciprocal %94 {approx = true} : vector<1x1xf32> -> vector<1x1xf32>
    %96 = vector.broadcast %95 : vector<1x1xf32> to vector<32x16xf32>
    %97 = arith.mulf %90, %96 : vector<32x16xf32>
    %cst_77 = arith.constant 1.000000e+00 : f32
    %98 = arith.addf %cst_77, %0 : f32
    %99 = vector.broadcast %98 : f32 to vector<32x16xf32>
    %100 = arith.mulf %99, %97 : vector<32x16xf32>
    %101 = vector.broadcast %1 : f32 to vector<32x16xf32>
    %102 = arith.addf %100, %101 : vector<32x16xf32>
    %cst_78 = arith.constant 0.000000e+00 : f32
    %103 = vector.broadcast %cst_78 : f32 to vector<32x16xf32>
    %104 = arith.maximumf %102, %103 : vector<32x16xf32>
    %cst_79 = arith.constant dense<0.000000e+00> : vector<16x32xf32>
    %105 = tpu.matmul %17, %104, %cst_79 {dimension_numbers = #tpu.dot_dimension_numbers<[1], [1], [0], [0], [0, 0, 1, 0], [], []>} : vector<16x16xf32>, vector<32x16xf32>, vector<16x32xf32> -> vector<16x32xf32>
    %106 = vector.broadcast %18 : vector<16x1xf32> to vector<16x32xf32>
    %107 = arith.addf %105, %106 : vector<16x32xf32>
    %108 = arith.truncf %107 : vector<16x32xf32> to vector<16x32xbf16>
    %cst_80 = arith.constant dense<0.000000e+00> : vector<256x16xf32>
    %109 = tpu.matmul %81, %108, %cst_80 {dimension_numbers = #tpu.dot_dimension_numbers<[0], [1], [1], [0], [0, 1, 1, 0], [], []>} : vector<32x256xbf16>, vector<16x32xbf16>, vector<256x16xf32> -> vector<256x16xf32>
    %c0_81 = arith.constant 0 : index
    %c0_82 = arith.constant 0 : index
    %110 = vector.load %arg14[%c0_81, %c0_82] : memref<256x16xf32, #tpu.memory_space<vmem>>, vector<256x16xf32>
    tpu.vector_store %arg14[%c0_81, %c0_82], %109 {strides = array<i32>} : memref<256x16xf32, #tpu.memory_space<vmem>>, vector<256x16xf32>,
    %c0_83 = arith.constant 0 : index
    %c0_84 = arith.constant 0 : index
    %111 = tpu.strided_load %arg14[%c0_83, %c0_84] {strides = array<i32: 16, 1>} : memref<256x16xf32, #tpu.memory_space<vmem>>, vector<16x16xf32>
    %c0_85 = arith.constant 0 : index
    %c256_86 = arith.constant 256 : index
    %112 = vector.load %arg15[%c0_85, %c256_86] : memref<16x512xf32, #tpu.memory_space<vmem>>, vector<16x16xf32>
    tpu.vector_store %arg15[%c0_85, %c256_86], %111 {strides = array<i32>} : memref<16x512xf32, #tpu.memory_space<vmem>>, vector<16x16xf32>,
    %c1_87 = arith.constant 1 : index
    %c0_88 = arith.constant 0 : index
    %113 = tpu.strided_load %arg14[%c1_87, %c0_88] {strides = array<i32: 16, 1>} : memref<256x16xf32, #tpu.memory_space<vmem>>, vector<16x16xf32>
    %c0_89 = arith.constant 0 : index
    %c272 = arith.constant 272 : index
    %114 = vector.load %arg15[%c0_89, %c272] : memref<16x512xf32, #tpu.memory_space<vmem>>, vector<16x16xf32>
    tpu.vector_store %arg15[%c0_89, %c272], %113 {strides = array<i32>} : memref<16x512xf32, #tpu.memory_space<vmem>>, vector<16x16xf32>,
    %c2_90 = arith.constant 2 : index
    %c0_91 = arith.constant 0 : index
    %115 = tpu.strided_load %arg14[%c2_90, %c0_91] {strides = array<i32: 16, 1>} : memref<256x16xf32, #tpu.memory_space<vmem>>, vector<16x16xf32>
    %c0_92 = arith.constant 0 : index
    %c288 = arith.constant 288 : index
    %116 = vector.load %arg15[%c0_92, %c288] : memref<16x512xf32, #tpu.memory_space<vmem>>, vector<16x16xf32>
    tpu.vector_store %arg15[%c0_92, %c288], %115 {strides = array<i32>} : memref<16x512xf32, #tpu.memory_space<vmem>>, vector<16x16xf32>,
    %c3_93 = arith.constant 3 : index
    %c0_94 = arith.constant 0 : index
    %117 = tpu.strided_load %arg14[%c3_93, %c0_94] {strides = array<i32: 16, 1>} : memref<256x16xf32, #tpu.memory_space<vmem>>, vector<16x16xf32>
    %c0_95 = arith.constant 0 : index
    %c304 = arith.constant 304 : index
    %118 = vector.load %arg15[%c0_95, %c304] : memref<16x512xf32, #tpu.memory_space<vmem>>, vector<16x16xf32>
    tpu.vector_store %arg15[%c0_95, %c304], %117 {strides = array<i32>} : memref<16x512xf32, #tpu.memory_space<vmem>>, vector<16x16xf32>,
    %c4_96 = arith.constant 4 : index
    %c0_97 = arith.constant 0 : index
    %119 = tpu.strided_load %arg14[%c4_96, %c0_97] {strides = array<i32: 16, 1>} : memref<256x16xf32, #tpu.memory_space<vmem>>, vector<16x16xf32>
    %c0_98 = arith.constant 0 : index
    %c320 = arith.constant 320 : index
    %120 = vector.load %arg15[%c0_98, %c320] : memref<16x512xf32, #tpu.memory_space<vmem>>, vector<16x16xf32>
    tpu.vector_store %arg15[%c0_98, %c320], %119 {strides = array<i32>} : memref<16x512xf32, #tpu.memory_space<vmem>>, vector<16x16xf32>,
    %c5_99 = arith.constant 5 : index
    %c0_100 = arith.constant 0 : index
    %121 = tpu.strided_load %arg14[%c5_99, %c0_100] {strides = array<i32: 16, 1>} : memref<256x16xf32, #tpu.memory_space<vmem>>, vector<16x16xf32>
    %c0_101 = arith.constant 0 : index
    %c336 = arith.constant 336 : index
    %122 = vector.load %arg15[%c0_101, %c336] : memref<16x512xf32, #tpu.memory_space<vmem>>, vector<16x16xf32>
    tpu.vector_store %arg15[%c0_101, %c336], %121 {strides = array<i32>} : memref<16x512xf32, #tpu.memory_space<vmem>>, vector<16x16xf32>,
    %c6_102 = arith.constant 6 : index
    %c0_103 = arith.constant 0 : index
    %123 = tpu.strided_load %arg14[%c6_102, %c0_103] {strides = array<i32: 16, 1>} : memref<256x16xf32, #tpu.memory_space<vmem>>, vector<16x16xf32>
    %c0_104 = arith.constant 0 : index
    %c352 = arith.constant 352 : index
    %124 = vector.load %arg15[%c0_104, %c352] : memref<16x512xf32, #tpu.memory_space<vmem>>, vector<16x16xf32>
    tpu.vector_store %arg15[%c0_104, %c352], %123 {strides = array<i32>} : memref<16x512xf32, #tpu.memory_space<vmem>>, vector<16x16xf32>,
    %c7_105 = arith.constant 7 : index
    %c0_106 = arith.constant 0 : index
    %125 = tpu.strided_load %arg14[%c7_105, %c0_106] {strides = array<i32: 16, 1>} : memref<256x16xf32, #tpu.memory_space<vmem>>, vector<16x16xf32>
    %c0_107 = arith.constant 0 : index
    %c368 = arith.constant 368 : index
    %126 = vector.load %arg15[%c0_107, %c368] : memref<16x512xf32, #tpu.memory_space<vmem>>, vector<16x16xf32>
    tpu.vector_store %arg15[%c0_107, %c368], %125 {strides = array<i32>} : memref<16x512xf32, #tpu.memory_space<vmem>>, vector<16x16xf32>,
    %c8_108 = arith.constant 8 : index
    %c0_109 = arith.constant 0 : index
    %127 = tpu.strided_load %arg14[%c8_108, %c0_109] {strides = array<i32: 16, 1>} : memref<256x16xf32, #tpu.memory_space<vmem>>, vector<16x16xf32>
    %c0_110 = arith.constant 0 : index
    %c384 = arith.constant 384 : index
    %128 = vector.load %arg15[%c0_110, %c384] : memref<16x512xf32, #tpu.memory_space<vmem>>, vector<16x16xf32>
    tpu.vector_store %arg15[%c0_110, %c384], %127 {strides = array<i32>} : memref<16x512xf32, #tpu.memory_space<vmem>>, vector<16x16xf32>,
    %c9_111 = arith.constant 9 : index
    %c0_112 = arith.constant 0 : index
    %129 = tpu.strided_load %arg14[%c9_111, %c0_112] {strides = array<i32: 16, 1>} : memref<256x16xf32, #tpu.memory_space<vmem>>, vector<16x16xf32>
    %c0_113 = arith.constant 0 : index
    %c400 = arith.constant 400 : index
    %130 = vector.load %arg15[%c0_113, %c400] : memref<16x512xf32, #tpu.memory_space<vmem>>, vector<16x16xf32>
    tpu.vector_store %arg15[%c0_113, %c400], %129 {strides = array<i32>} : memref<16x512xf32, #tpu.memory_space<vmem>>, vector<16x16xf32>,
    %c10_114 = arith.constant 10 : index
    %c0_115 = arith.constant 0 : index
    %131 = tpu.strided_load %arg14[%c10_114, %c0_115] {strides = array<i32: 16, 1>} : memref<256x16xf32, #tpu.memory_space<vmem>>, vector<16x16xf32>
    %c0_116 = arith.constant 0 : index
    %c416 = arith.constant 416 : index
    %132 = vector.load %arg15[%c0_116, %c416] : memref<16x512xf32, #tpu.memory_space<vmem>>, vector<16x16xf32>
    tpu.vector_store %arg15[%c0_116, %c416], %131 {strides = array<i32>} : memref<16x512xf32, #tpu.memory_space<vmem>>, vector<16x16xf32>,
    %c11_117 = arith.constant 11 : index
    %c0_118 = arith.constant 0 : index
    %133 = tpu.strided_load %arg14[%c11_117, %c0_118] {strides = array<i32: 16, 1>} : memref<256x16xf32, #tpu.memory_space<vmem>>, vector<16x16xf32>
    %c0_119 = arith.constant 0 : index
    %c432 = arith.constant 432 : index
    %134 = vector.load %arg15[%c0_119, %c432] : memref<16x512xf32, #tpu.memory_space<vmem>>, vector<16x16xf32>
    tpu.vector_store %arg15[%c0_119, %c432], %133 {strides = array<i32>} : memref<16x512xf32, #tpu.memory_space<vmem>>, vector<16x16xf32>,
    %c12_120 = arith.constant 12 : index
    %c0_121 = arith.constant 0 : index
    %135 = tpu.strided_load %arg14[%c12_120, %c0_121] {strides = array<i32: 16, 1>} : memref<256x16xf32, #tpu.memory_space<vmem>>, vector<16x16xf32>
    %c0_122 = arith.constant 0 : index
    %c448 = arith.constant 448 : index
    %136 = vector.load %arg15[%c0_122, %c448] : memref<16x512xf32, #tpu.memory_space<vmem>>, vector<16x16xf32>
    tpu.vector_store %arg15[%c0_122, %c448], %135 {strides = array<i32>} : memref<16x512xf32, #tpu.memory_space<vmem>>, vector<16x16xf32>,
    %c13_123 = arith.constant 13 : index
    %c0_124 = arith.constant 0 : index
    %137 = tpu.strided_load %arg14[%c13_123, %c0_124] {strides = array<i32: 16, 1>} : memref<256x16xf32, #tpu.memory_space<vmem>>, vector<16x16xf32>
    %c0_125 = arith.constant 0 : index
    %c464 = arith.constant 464 : index
    %138 = vector.load %arg15[%c0_125, %c464] : memref<16x512xf32, #tpu.memory_space<vmem>>, vector<16x16xf32>
    tpu.vector_store %arg15[%c0_125, %c464], %137 {strides = array<i32>} : memref<16x512xf32, #tpu.memory_space<vmem>>, vector<16x16xf32>,
    %c14_126 = arith.constant 14 : index
    %c0_127 = arith.constant 0 : index
    %139 = tpu.strided_load %arg14[%c14_126, %c0_127] {strides = array<i32: 16, 1>} : memref<256x16xf32, #tpu.memory_space<vmem>>, vector<16x16xf32>
    %c0_128 = arith.constant 0 : index
    %c480 = arith.constant 480 : index
    %140 = vector.load %arg15[%c0_128, %c480] : memref<16x512xf32, #tpu.memory_space<vmem>>, vector<16x16xf32>
    tpu.vector_store %arg15[%c0_128, %c480], %139 {strides = array<i32>} : memref<16x512xf32, #tpu.memory_space<vmem>>, vector<16x16xf32>,
    %c15_129 = arith.constant 15 : index
    %c0_130 = arith.constant 0 : index
    %141 = tpu.strided_load %arg14[%c15_129, %c0_130] {strides = array<i32: 16, 1>} : memref<256x16xf32, #tpu.memory_space<vmem>>, vector<16x16xf32>
    %c0_131 = arith.constant 0 : index
    %c496 = arith.constant 496 : index
    %142 = vector.load %arg15[%c0_131, %c496] : memref<16x512xf32, #tpu.memory_space<vmem>>, vector<16x16xf32>
    tpu.vector_store %arg15[%c0_131, %c496], %141 {strides = array<i32>} : memref<16x512xf32, #tpu.memory_space<vmem>>, vector<16x16xf32>,
    %c0_132 = arith.constant 0 : index
    %c0_133 = arith.constant 0 : index
    %143 = vector.load %arg9[%c0_132, %c0_133] : memref<64x16xbf16, #tpu.memory_space<vmem>>, vector<64x16xbf16>
    %c0_134 = arith.constant 0 : index
    %c0_135 = arith.constant 0 : index
    %144 = vector.load %arg15[%c0_134, %c0_135] : memref<16x512xf32, #tpu.memory_space<vmem>>, vector<16x512xf32>
    %145 = arith.truncf %144 : vector<16x512xf32> to vector<16x512xbf16>
    %cst_136 = arith.constant dense<0.000000e+00> : vector<64x512xf32>
    %146 = tpu.matmul %143, %145, %cst_136 {dimension_numbers = #tpu.dot_dimension_numbers<[1], [0], [0], [1], [0, 0, 1, 1], [], []>} : vector<64x16xbf16>, vector<16x512xbf16>, vector<64x512xf32> -> vector<64x512xf32>
    %c0_137 = arith.constant 0 : index
    %c0_138 = arith.constant 0 : index
    %147 = vector.load %arg10[%c0_137, %c0_138] : memref<64x1xf32, #tpu.memory_space<vmem>>, vector<64x1xf32>
    %148 = vector.broadcast %147 : vector<64x1xf32> to vector<64x512xf32>
    %149 = arith.addf %146, %148 : vector<64x512xf32>
    %150 = arith.extf %2 : vector<64x512xbf16> to vector<64x512xf32>
    %151 = arith.addf %149, %150 : vector<64x512xf32>
    %c0_139 = arith.constant 0 : index
    %c0_140 = arith.constant 0 : index
    %152 = vector.load %arg11[%c0_139, %c0_140] : memref<64x512xf32, #tpu.memory_space<vmem>>, vector<64x512xf32>
    tpu.vector_store %arg11[%c0_139, %c0_140], %151 {strides = array<i32>} : memref<64x512xf32, #tpu.memory_space<vmem>>, vector<64x512xf32>,
    return
  }
  func.func @transform_0(%arg0: i32) -> (i32, i32) {
    %c0_i32 = arith.constant 0 : i32
    %c0_i32_0 = arith.constant 0 : i32
    return %c0_i32, %arg0 : i32, i32
  }
  func.func @transform_1(%arg0: i32) -> (i32, i32) {
    %c0_i32 = arith.constant 0 : i32
    %c0_i32_0 = arith.constant 0 : i32
    %c0_i32_1 = arith.constant 0 : i32
    return %c0_i32, %c0_i32_0 : i32, i32
  }
  func.func @transform_2(%arg0: i32) -> (i32, i32) {
    %c0_i32 = arith.constant 0 : i32
    %c0_i32_0 = arith.constant 0 : i32
    %c0_i32_1 = arith.constant 0 : i32
    return %c0_i32, %c0_i32_0 : i32, i32
  }
  func.func @transform_3(%arg0: i32) -> (i32, i32) {
    %c0_i32 = arith.constant 0 : i32
    %c0_i32_0 = arith.constant 0 : i32
    %c0_i32_1 = arith.constant 0 : i32
    return %c0_i32, %c0_i32_0 : i32, i32
  }
  func.func @transform_4(%arg0: i32) -> (i32, i32) {
    %c0_i32 = arith.constant 0 : i32
    %c0_i32_0 = arith.constant 0 : i32
    %c0_i32_1 = arith.constant 0 : i32
    return %c0_i32, %c0_i32_0 : i32, i32
  }
  func.func @transform_5(%arg0: i32) -> i32 {
    %c0_i32 = arith.constant 0 : i32
    %c0_i32_0 = arith.constant 0 : i32
    return %c0_i32 : i32
  }
  func.func @transform_6(%arg0: i32) -> (i32, i32) {
    %c0_i32 = arith.constant 0 : i32
    %c0_i32_0 = arith.constant 0 : i32
    %c0_i32_1 = arith.constant 0 : i32
    return %c0_i32, %c0_i32_0 : i32, i32
  }
  func.func @transform_7(%arg0: i32) -> (i32, i32) {
    %c0_i32 = arith.constant 0 : i32
    %c0_i32_0 = arith.constant 0 : i32
    %c0_i32_1 = arith.constant 0 : i32
    return %c0_i32, %c0_i32_0 : i32, i32
  }
  func.func @transform_8(%arg0: i32) -> (i32, i32) {
    %c0_i32 = arith.constant 0 : i32
    %c0_i32_0 = arith.constant 0 : i32
    %c0_i32_1 = arith.constant 0 : i32
    return %c0_i32, %c0_i32_0 : i32, i32
  }
  func.func @transform_9(%arg0: i32) -> (i32, i32) {
    %c0_i32 = arith.constant 0 : i32
    %c0_i32_0 = arith.constant 0 : i32
    %c0_i32_1 = arith.constant 0 : i32
    return %c0_i32, %c0_i32_0 : i32, i32
  }
  func.func @transform_10(%arg0: i32) -> (i32, i32) {
    %c0_i32 = arith.constant 0 : i32
    %c0_i32_0 = arith.constant 0 : i32
    return %c0_i32, %arg0 : i32, i32
  }
}

</mosaic_0001>

<bundles_post_ra>
// kernel: tpu_custom_call.1
= control target key start
LH: loop header
LB: loop body
LE: loop exit
PB: predicated region body
PF: predicated region fallthrough
CT: control target
= control target key end

     0   :  { %s4292_s0 = inlined_call_operand.hbm [shape: bf16[64,1024], index: 0, kind: input, shape index: {}]   ;;  %s4293_s1 = inlined_call_operand.vmem [shape: bf16[32,64], index: 1, kind: input, shape index: {}]   ;;  %s4294_s2 = inlined_call_operand.vmem [shape: f32[32,1], index: 2, kind: input, shape index: {}]   ;;  %s4295_s3 = inlined_call_operand.vmem [shape: bf16[16,64], index: 3, kind: input, shape index: {}]   ;;  %s4296_s4 = inlined_call_operand.vmem [shape: f32[16,1], index: 4, kind: input, shape index: {}]   ;;  %s4297_s5 = inlined_call_operand.vmem [shape: f32[2], index: 5, kind: input, shape index: {}]   ;;  %s4298_s6 = inlined_call_operand.vmem [shape: f32[16,16], index: 6, kind: input, shape index: {}]   ;;  %s4299_s7 = inlined_call_operand.vmem [shape: f32[16,1], index: 7, kind: input, shape index: {}]   ;;  %s4300_s8 = inlined_call_operand.vmem [shape: bf16[64,16], index: 8, kind: input, shape index: {}]   ;;  %s4301_s9 = inlined_call_operand.vmem [shape: f32[64,1], index: 9, kind: input, shape index: {}]   ;;  %s4302_s10 = inlined_call_operand.hbm [shape: f32[64,1024], index: 10, kind: output, shape index: {}]  }
   0x1   :  { %4309 = sst [smem:[#allocation48_spill]] %s4297_s5 }
   0x2   :  { %15 = vsyncpa [#allocation7], 0 }
   0x3   :  { %17 = vsyncpa [#allocation7 + $0x1], 0 }
   0x4   :  { %18 = vsyncpa [#allocation9], 0 }
   0x5   :  { %19 = vsyncpa [#allocation8], 0 }
   0x6   :  { %21 = vsyncpa [#allocation8 + $0x1], 0  ;;  %s3238_s13 = smov 0   ;;  %s3240_s14 = smov 0  }
   0x7   :  { %s3242_s15 = smov 0   ;;  %s3244_s16 = smov 0  }
   0x8 LB: > { %4310 = sst [smem:[#allocation15_spill]] %s3155_s13  ;;  %s3259_s17 = sadd.s32 4294967295, %s3167_s16   ;;  %s3167_s16 = sphi %s3244_s16, %s4390_s16   ;;  %s3163_s15 = sphi %s3242_s15, %s4392_s15   ;;  %s3159_s14 = sphi %s3240_s14, %s4394_s14   ;;  %s3155_s13 = sphi %s3238_s13, %s4393_s13  }
   0x9   : > { %4311 = sst [smem:[#allocation16_spill]] %s3163_s15  ;;  %s2684_s18 = sadd.s32 4294967294, %s3167_s16  }
   0xa   : > { %4312 = sst [smem:[#allocation17_spill]] %s3167_s16  ;;  %s3263_s19 = sadd.s32 1, %s3167_s16  }
   0xb   : > { %4313 = sst [smem:[#allocation18_spill]] %s3263_s19  ;;  %s34_s20 = sadd.s32 1, %s3163_s15 }
   0xc   : > { %s31_s21 = ssub.s32 %s3167_s16, %s3263_s19  ;;  %p41_p0 = scmp.ne.s32.totalorder %s3163_s15, %s3159_s14 }
   0xd   : > { %p32_p1 = scmp.eq.s32.totalorder %s31_s21, 0  ;;  %p42_p2 = scmp.eq.s32.totalorder %s3167_s16, 0 }
   0xe   : > { %p47_p3 = scmp.ne.s32.totalorder %s3159_s14, %s3155_s13  ;;  %p48_p4 = scmp.eq.s32.totalorder %s3259_s17, 0 }
   0xf   : > { %s3275_s22 = scalar_select %p32_p1, %s3163_s15, %s34_s20  }
  0x10   : > { %p3277_p5 = por %p42_p2, %p41_p0  ;;  %p3283_p6 = por %p48_p4, %p47_p3 }
  0x11   : > { %4314 = sst [smem:[#allocation19_spill]] %s3275_s22  ;;  %p260_p7 = scmp.eq.s32.totalorder %s3259_s17, 1 }
  0x12   : > { %p266_p8 = scmp.eq.s32.totalorder %s2684_s18, 1  ;;  %p2685_p9 = scmp.ge.s32.totalorder %s3167_s16, 1 }
  0x13   : > { %p273_p10 = scmp.lt.s32.totalorder %s3167_s16, 3  ;;  %p3290_p11 = por %p260_p7, %p41_p0 }
  0x14   : > { %p3294_p12 = por %p266_p8, %p47_p3  ;;  %s4321_s5 = sld [smem:[#allocation48_spill]] }
  0x15   : > { %p3298_p13 = pnand %p2685_p9, %p273_p10  ;;  %p2980_p2 = scmp.lt.s32.totalorder %s3167_s16, 2 }
  0x16   : > { %s4318_s26 = scalar_select %p3294_p12, 1, 0 }
  0x17   : > { %p2967_p1 = pneg %p3298_p13  ;;  %s320_s11 = sand.u32 1, %s3163_s15  }
  0x18   : > { %4319 = sst [smem:[#allocation20_spill]] %s4318_s26  ;;  %p3314_p3 = pnand %p2980_p2, %p3277_p5 }
  0x19   : > { %p2968_p7 = pnand %p2967_p1, %p48_p4  ;;  %s2688_s18 = sshll.u32 %s320_s11, 7 }
  0x1a   : > { %s297_s30 = sshll.u32 %s4321_s5, 4  ;;  %s3169_s20 = smov [#allocation10]   ;;  %s298_s30 = int_to_ptr.vmem [resolvable:$true] %s297_s30 }
  0x1b   : > { %2970 = dma.vmem_to_smem (!%p2968_p7), %s298_s30, 16, %s3169_s20, [#allocation9]  }
  0x1c   : > { %s2913_s21 = sshll.u32 %s3167_s16, 4  ;;  %s324_s28 = scalar_lea.vmem [#allocation6], %s2688_s18 }
  0x1d   : > { %s332_s29 = sshll.u32 %s324_s28, 4  ;;  %s329_s19 = scalar_lea.hbm %s4292_s0, %s2913_s21  ;;  %s333_s29 = int_to_ptr.vmem [resolvable:$true] %s332_s29 }
  0x1e   : > { %s330_s26 = sshll.u32 %s329_s19, 4  ;;  %s321_s15 = scalar_lea.sflag [#allocation7], %s320_s11  ;;  %s331_s26 = int_to_ptr.hbm [resolvable:$true] %s330_s26 }
  0x1f   : > { %s3067_s23 = sshra.s32 %s331_s26, 4  ;;  %p3071_p8 = pneg %p3314_p3  ;;  %s3068_s23 = int_to_ptr.hbm [resolvable:$true] %s3067_s23 }
  0x20   : > { %s3069_s13 = scalar_lea.hbm %s3068_s23, 128  ;;  %s3074_s18 = scalar_lea.hbm %s4292_s0, 256 }
  0x21   : > { %p3070_p5 = scmp.ne.s32.totalorder %s3068_s23, %s3069_s13  ;;  %p3075_p1 = scmp.lt.s32.totalorder %s3068_s23, %s4292_s0 }
  0x22   : > { %p3076_p2 = scmp.lt.s32.totalorder %s3074_s18, %s3069_s13 }
  0x23   : > { %p3072_p9 = pnand %p3071_p8, %p3070_p5 }
  0x24   : > { %p3077_p7 = por %p3076_p2, %p3075_p1 }
  0x25   : > { %p3073_p10 = pneg %p3072_p9 }
  0x27   : > { %p3078_p0 = pnand %p3077_p7, %p3073_p10 }
  0x29   : > { %3081 = shalt.err (!%p3078_p0)
}
  0x2a   : > { %s3170_s5 = smov 512   ;;  %s3171_s19 = smov 256  }
  0x2b   : > { %s3172_s22 = smov 16   ;;  %344 = sbr.rel (%p3298_p13) target bundleno = 2267 (0x8db), region = 60 }
  0x2c   : > { %2974 = dma.hbm_to_vmem [thread:$0]  (!%p3314_p3), %s331_s26, 2048, %s333_s29, %s321_s15, %s3170_s5, %s3171_s19, %s3172_s22  }
  0x30   : > { %s3335_s11 = sand.u32 1, %s3159_s14  }
  0x31   : > { %s2692_s16 = sshll.u32 %s3335_s11, 7  ;;  %s347_s13 = scalar_lea.sflag [#allocation7], %s3335_s11 }
  0x32   : > { %s3339_s21 = scalar_lea.vmem [#allocation6], %s2692_s16 }
  0x33   : > { %3142 = dma.done.wait (%p3283_p6), %s347_s13, 2048  }
  0x34   : > { %3144 = vsyncadd (%p3283_p6), %s347_s13, 4294965248 }
  0x35   : > { %3146 = dma.done.wait (%p48_p4), [#allocation9], 16  }
  0x36   : > { %3148 = vsyncadd (%p48_p4), [#allocation9], 4294967280 }
  0x37   : > { %361 = sfence }
  0x38   : > { %v2754_v0 = vld [vmem:[%s3339_s21 + $0x60] sm:$0xf]  ;;  %v2928_v1 = vld [vmem:[%s3339_s21 + $0x6c] sm:$0xf0]  ;;  %v2926_v2 = vld [vmem:[%s3339_s21 + $0x64] sm:$0xf] }
  0x39   : > { %v3352_v3 = vor.u32 %v2928_v1, %v2754_v0  ;;  %v2756_v4 = vld [vmem:[%s3339_s21 + $0x70] sm:$0xf0]  ;;  %v2738_v5 = vld [vmem:[%s3339_s21 + $0x40] sm:$0xf]  ;;  %v2924_v6 = vld [vmem:[%s3339_s21 + $0x4c] sm:$0xf0] }
  0x3a   : > { %v3357_v7 = vor.u32 %v2926_v2, %v2756_v4  ;;  %v2922_v8 = vld [vmem:[%s3339_s21 + $0x44] sm:$0xf]  ;;  %v2740_v9 = vld [vmem:[%s3339_s21 + $0x50] sm:$0xf0]  ;;  %v3362_v10 = vor.u32 %v2924_v6, %v2738_v5  ;;  %v2722_v12 = vld [vmem:[%s3339_s21 + $0x20] sm:$0xf] }
  0x3b   : > { %544 = vmatpush.bf16.msra.mxu0 %v3352_v3  ;;  %v3365_v11 = vor.u32 %v2922_v8, %v2740_v9  ;;  %v2920_v13 = vld [vmem:[%s3339_s21 + $0x2c] sm:$0xf0]  ;;  %v2918_v14 = vld [vmem:[%s3339_s21 + $0x24] sm:$0xf]  ;;  %v2724_v15 = vld [vmem:[%s3339_s21 + $0x30] sm:$0xf0] }
  0x3c   : > { %563 = vmatpush.bf16.msra.mxu1 %v3357_v7  ;;  %v2762_v16 = vld [vmem:[%s3339_s21 + $0x68] sm:$0xf]  ;;  %v2929_v17 = vld [vmem:[%s3339_s21 + $0x74] sm:$0xf0]  ;;  %v3376_v20 = vor.u32 %v2920_v13, %v2722_v12  ;;  %v419_v22 = vld [vmem:[%s4294_s2] sm:$0xff]  ;;  %v2727_v23 = vor.u32 %v2918_v14, %v2724_v15  ;;  %v3173_v27 = vmov 0  }
  0x3d   : > { %v2746_v18 = vld [vmem:[%s3339_s21 + $0x48] sm:$0xf]  ;;  %v2925_v19 = vld [vmem:[%s3339_s21 + $0x54] sm:$0xf0]  ;;  %v2763_v21 = vor.u32 %v2929_v17, %v2762_v16  ;;  %v2706_v24 = vld [vmem:[%s3339_s21] sm:$0xf]  ;;  %3030 = vset.pattern.permute.xlu1 %v3173_v27  ;;  %3031 = vset.pattern.permute.xlu2 %v3173_v27 }
  0x3e   : > { %v2916_v25 = vld [vmem:[%s3339_s21 + $0xc] sm:$0xf0]  ;;  %v2914_v26 = vld [vmem:[%s3339_s21 + $0x4] sm:$0xf]  ;;  %v2708_v28 = vld [vmem:[%s3339_s21 + $0x10] sm:$0xf0]  ;;  %v2747_v29 = vor.u32 %v2925_v19, %v2746_v18  ;;  %425 = vperm.xlu1 %3030, %v419_v22   ;;  %3029 = vset.pattern.permute.xlu0 %v3173_v27 }
  0x3f   : > { %545 = vmatpush.bf16.msra.mxu0 %v3362_v10  ;;  %582 = vmatpush.bf16.msra.mxu2 %v2763_v21  ;;  %v2927_v30 = vld [vmem:[%s3339_s21 + $0x6c] sm:$0xf]  ;;  %v2764_v31 = vld [vmem:[%s3339_s21 + $0x78] sm:$0xf0]  ;;  %v2730_v32 = vld [vmem:[%s3339_s21 + $0x28] sm:$0xf]  ;;  %v2707_v35 = vor.u32 %v2916_v25, %v2706_v24  ;;  %v2711_v36 = vor.u32 %v2914_v26, %v2708_v28 }
  0x40   : > { %564 = vmatpush.bf16.msra.mxu1 %v3365_v11  ;;  %v2921_v33 = vld [vmem:[%s3339_s21 + $0x34] sm:$0xf0]  ;;  %v2767_v34 = vor.u32 %v2927_v30, %v2764_v31  ;;  %v2930_v37 = vld [vmem:[%s4293_s1] sm:$0xff]  ;;  %v2923_v39 = vld [vmem:[%s3339_s21 + $0x4c] sm:$0xf]  ;;  %vm533_vm0 = vcmask 523264  }
  0x41   : > { %v2731_v38 = vor.u32 %v2921_v33, %v2730_v32  ;;  %v2748_v40 = vld [vmem:[%s3339_s21 + $0x58] sm:$0xf0]  ;;  %v2714_v41 = vld [vmem:[%s3339_s21 + $0x8] sm:$0xf]  ;;  %v2917_v42 = vld [vmem:[%s3339_s21 + $0x14] sm:$0xf0] }
  0x42   : > { %700 = vmatpush.bf16.msra.mxu3 %v2767_v34  ;;  %v420_v43 = vld [vmem:[%s4294_s2 + $0x8] sm:$0xff]  ;;  %v2751_v44 = vor.u32 %v2923_v39, %v2748_v40  ;;  %v2715_v45 = vor.u32 %v2917_v42, %v2714_v41  ;;  %v2732_v47 = vld [vmem:[%s3339_s21 + $0x38] sm:$0xf0]  ;;  %v2932_v53 = vld [vmem:[%s4295_s3] sm:$0xff]  ;;  %vm796_vm1 = vcmask 130048   ;;  %s397_s26 = sld [smem:[#allocation10]] }
  0x43   : > { %546 = vmatpush.bf16.msra.mxu0 %v3376_v20  ;;  %583 = vmatpush.bf16.msra.mxu2 %v2747_v29  ;;  %v2919_v46 = vld [vmem:[%s3339_s21 + $0x2c] sm:$0xf]  ;;  %v2716_v50 = vld [vmem:[%s3339_s21 + $0x18] sm:$0xf0]  ;;  %v421_v54 = vld [vmem:[%s4294_s2 + $0x10] sm:$0xff]  ;;  %s2695_s27 = sld [smem:[#allocation10 + $0x1]] }
  0x44   : > { %565 = vmatpush.bf16.msra.mxu1 %v2727_v23  ;;  %v2735_v48 = vor.u32 %v2919_v46, %v2732_v47  ;;  %v2915_v49 = vld [vmem:[%s3339_s21 + $0xc] sm:$0xf]  ;;  %435 = vperm.xlu2 %3031, %v421_v54   ;;  %v422_v55 = vld [vmem:[%s4294_s2 + $0x18] sm:$0xff]  ;;  %v634_v56 = vld [vmem:[%s4296_s4] sm:$0xff]  ;;  %vm947_vm2 = vcmask 261120   ;;  %s3174_s22 = smov 16  }
  0x45   : > { %v2719_v51 = vor.u32 %v2915_v49, %v2716_v50  ;;  %v2931_v52 = vld [vmem:[%s4293_s1 + $0x8] sm:$0xff]  ;;  %638 = vperm.xlu0 %3029, %v634_v56   ;;  %s3175_s16 = smov 32   ;;  %s3176_s13 = smov 48   ;;  %vm1161_vm3 = vcmask 261248   ;;  %vm1188_vm4 = vcmask 392448   ;;  %vm1215_vm5 = vcmask 523648  }
  0x46   : > { %430 = vperm.xlu1 %3030, %v420_v43   ;;  %701 = vmatpush.bf16.msra.mxu3 %v2751_v44  ;;  %v635_v57 = vld [vmem:[%s4296_s4 + $0x8] sm:$0xff]  ;;  %s3177_s15 = smov 64   ;;  %s3178_s24 = smov 80   ;;  %vm1242_vm6 = vcmask 654848   ;;  %vm1269_vm7 = vcmask 786048   ;;  %vm1296_vm8 = vcmask 917248  }
  0x47   : > { %547 = vmatpush.bf16.msra.mxu0 %v2707_v35  ;;  %584 = vmatpush.bf16.msra.mxu2 %v2731_v38  ;;  %vm1323_vm9 = vcmask 1048448   ;;  %s3117_s28 = scalar_lea.hbm %s4302_s10, 512 }
  0x48   : > { %566 = vmatpush.bf16.msra.mxu1 %v2711_v36  ;;  %s856_s12 = sadd.f32 1.0, %s397_s26  ;;  %s3179_s26 = smov 96  }
  0x4a   : > { %2768 = vmatmul.msk.bf16.vlgmr.msra.gmra.mxu0 %vm533_vm0, %v2930_v37  ;;  %702 = vmatpush.bf16.msra.mxu3 %v2735_v48 }
  0x4b   : > { %601 = vmatpush.bf16.msrb.mxu0 %v2767_v34  ;;  %2770 = vmatmul.msk.bf16.vlgmr.msra.gmra.mxu1 %vm533_vm0, %v2930_v37 }
  0x4c   : > { %672 = vmatpush.bf16.msrb.mxu1 %v3357_v7  ;;  %585 = vmatpush.bf16.msra.mxu2 %v2715_v45 }
  0x4d   : > { %440 = vperm.xlu2 %3031, %v422_v55   ;;  %643 = vperm.xlu0 %3029, %v635_v57  }
  0x4e   : > { %703 = vmatpush.bf16.msra.mxu3 %v2719_v51 }
  0x4f   : > { %602 = vmatpush.bf16.msrb.mxu0 %v2751_v44  ;;  %2772 = vmatmul.msk.bf16.vlgmr.msra.gmra.mxu2 %vm533_vm0, %v2930_v37 }
  0x50   : > { %686 = vmatpush.bf16.msrb.mxu2 %v2763_v21  ;;  %673 = vmatpush.bf16.msrb.mxu1 %v3365_v11 }
  0x51   : > { %2783 = vmatmul.msk.bf16.vlgmr.msra.gmra.mxu3 %vm533_vm0, %v2932_v53 }
  0x53   : > { %603 = vmatpush.bf16.msrb.mxu0 %v2735_v48 }
  0x54   : > { %687 = vmatpush.bf16.msrb.mxu2 %v2747_v29  ;;  %674 = vmatpush.bf16.msrb.mxu1 %v2727_v23 }
  0x57   : > { %604 = vmatpush.bf16.msrb.mxu0 %v2719_v51 }
  0x58   : > { %688 = vmatpush.bf16.msrb.mxu2 %v2731_v38  ;;  %675 = vmatpush.bf16.msrb.mxu1 %v2711_v36 }
  0x5a   : > { %2769 = vmatmul.msk.bf16.gmra.mxu0 %vm533_vm0, %v2931_v52 }
  0x5b   : > { %658 = vmatpush.bf16.msra.mxu0 %v3352_v3  ;;  %2771 = vmatmul.msk.bf16.gmra.mxu1 %vm533_vm0, %v2931_v52 }
  0x5c   : > { %689 = vmatpush.bf16.msrb.mxu2 %v2715_v45 }
  0x5f   : > { %659 = vmatpush.bf16.msra.mxu0 %v3362_v10  ;;  %2773 = vmatmul.msk.bf16.gmra.mxu2 %vm533_vm0, %v2931_v52 }
  0x63   : > { %660 = vmatpush.bf16.msra.mxu0 %v3376_v20 }
  0x67   : > { %661 = vmatpush.bf16.msra.mxu0 %v2707_v35 }
  0x6a   : > { %2774 = vmatmul.msk.bf16.vlgmr.msrb.gmra.mxu0 %vm533_vm0, %v2930_v37 }
  0x6b   : > { %2781 = vmatmul.msk.bf16.vlgmr.msrb.gmra.mxu1 %vm533_vm0, %v2932_v53 }
  0x6f   : > { %2782 = vmatmul.msk.bf16.vlgmr.msrb.gmra.mxu2 %vm533_vm0, %v2932_v53 }
  0x7a   : > { %2775 = vmatmul.msk.bf16.gmra.mxu0 %vm533_vm0, %v2931_v52 }
  0x8a   : > { %2780 = vmatmul.msk.bf16.vlgmr.msra.gmra.mxu0 %vm533_vm0, %v2932_v53 }
  0x9e   : > { %v436_v6 = vpop.permute.xlu2 %435 }
  0xa7   : > { %v441_v14 = vpop.permute.xlu2 %440 }
  0xb0   : > { %v426_v58 = vpop.permute.xlu1 %425 }
  0xb7   : > { %v639_v26 = vpop.permute.xlu0 %638 }
  0xb8   : > { %v431_v0 = vpop.permute.xlu1 %430 }
  0xbf   : > { %v644_v37 = vpop.permute.xlu0 %643 }
  0xc7   : > { %v549_v59 = vpop.f32.mrf.mxu0 }
  0xc8   : > { %v550_v60 = vadd.f32 %v549_v59, %v426_v58  ;;  %v568_v61 = vpop.f32.mrf.mxu1 }
  0xc9   : > { %v569_v62 = vadd.f32 %v568_v61, %v426_v58 }
  0xcb   : > { %v616_v63 = vpack.c.bf16 %v569_v62, %v550_v60 }
  0xcd   : > { %624 = vst [vmem:[#allocation2] sm:$0xff] %v616_v63 }
  0xcf   : > { %v551_v1 = vpop.f32.mrf.mxu0 }
  0xd0   : > { %v552_v2 = vadd.f32 %v551_v1, %v431_v0  ;;  %v570_v3 = vpop.f32.mrf.mxu1 }
  0xd1   : > { %v571_v4 = vadd.f32 %v570_v3, %v431_v0 }
  0xd2   : > { %v587_v7 = vpop.f32.mrf.mxu2 }
  0xd3   : > { %v618_v5 = vpack.c.bf16 %v571_v4, %v552_v2  ;;  %v588_v21 = vadd.f32 %v587_v7, %v426_v58 }
  0xd4   : > { %v705_v27 = vpop.f32.mrf.mxu3  ;;  %v2786_v7 = vld [vmem:[#allocation2] sm:$0xf] }
  0xd5   : > { %626 = vst [vmem:[#allocation2 + $0x10] sm:$0xff] %v618_v5  ;;  %v706_v32 = vadd.f32 %v705_v27, %v639_v26 }
  0xd7   : > { %v554_v8 = vpop.f32.mrf.mxu0 }
  0xd8   : > { %v555_v9 = vadd.f32 %v554_v8, %v436_v6  ;;  %v573_v10 = vpop.f32.mrf.mxu1  ;;  %v2933_v8 = vld [vmem:[#allocation2 + $0x4] sm:$0xf] }
  0xd9   : > { %v574_v11 = vadd.f32 %v573_v10, %v436_v6 }
  0xda   : > { %v589_v13 = vpop.f32.mrf.mxu2 }
  0xdb   : > { %v620_v12 = vpack.c.bf16 %v574_v11, %v555_v9  ;;  %v590_v28 = vadd.f32 %v589_v13, %v431_v0 }
  0xdc   : > { %v707_v39 = vpop.f32.mrf.mxu3  ;;  %v2934_v5 = vld [vmem:[#allocation2 + $0xc] sm:$0xf0] }
  0xdd   : > { %628 = vst [vmem:[#allocation2 + $0x20] sm:$0xff] %v620_v12  ;;  %v708_v42 = vadd.f32 %v707_v39, %v644_v37  ;;  %v3440_v9 = vor.u32 %v2934_v5, %v2786_v7 }
  0xdf   : > { %v556_v15 = vpop.f32.mrf.mxu0 }
  0xe0   : > { %v557_v16 = vadd.f32 %v556_v15, %v441_v14  ;;  %v575_v17 = vpop.f32.mrf.mxu1 }
  0xe1   : > { %v576_v18 = vadd.f32 %v575_v17, %v441_v14 }
  0xe2   : > { %v592_v20 = vpop.f32.mrf.mxu2 }
  0xe3   : > { %v622_v19 = vpack.c.bf16 %v576_v18, %v557_v16  ;;  %v593_v35 = vadd.f32 %v592_v20, %v436_v6 }
  0xe4   : > { %v2794_v13 = vld [vmem:[#allocation2 + $0x20] sm:$0xf] }
  0xe5   : > { %630 = vst [vmem:[#allocation2 + $0x30] sm:$0xff] %v622_v19 }
  0xe7   : > { %v606_v22 = vpop.f32.mrf.mxu0 }
  0xe8   : > { %v607_v23 = vadd.f32 %v606_v22, %v426_v58  ;;  %v677_v50 = vpop.f32.mrf.mxu1 }
  0xe9   : > { %v678_v51 = vadd.f32 %v677_v50, %v639_v26 }
  0xea   : > { %v617_v24 = vpack.c.bf16 %v607_v23, %v588_v21  ;;  %v594_v25 = vpop.f32.mrf.mxu2 }
  0xeb   : > { %v595_v45 = vadd.f32 %v594_v25, %v441_v14 }
  0xec   : > { %625 = vst [vmem:[#allocation2 + $0x8] sm:$0xff] %v617_v24  ;;  %v2936_v11 = vld [vmem:[#allocation2 + $0x2c] sm:$0xf0]  ;;  %v2796_v12 = vld [vmem:[#allocation2 + $0x30] sm:$0xf0] }
  0xed   : > { %v3446_v15 = vor.u32 %v2936_v11, %v2794_v13 }
  0xef   : > { %v608_v29 = vpop.f32.mrf.mxu0 }
  0xf0   : > { %v609_v30 = vadd.f32 %v608_v29, %v431_v0  ;;  %v679_v55 = vpop.f32.mrf.mxu1 }
  0xf1   : > { %v680_v57 = vadd.f32 %v679_v55, %v644_v37 }
  0xf2   : > { %v619_v31 = vpack.c.bf16 %v609_v30, %v590_v28  ;;  %v691_v33 = vpop.f32.mrf.mxu2 }
  0xf3   : > { %v692_v34 = vadd.f32 %v691_v33, %v639_v26  ;;  %v2939_v18 = vld [vmem:[#allocation2 + $0xc] sm:$0xf] }
  0xf4   : > { %627 = vst [vmem:[#allocation2 + $0x18] sm:$0xff] %v619_v31 }
  0xf5   : > { %v711_v36 = vpack.c.bf16 %v706_v32, %v692_v34 }
  0xf7   : > { %v611_v38 = vpop.f32.mrf.mxu0  ;;  %715 = vst [vmem:[#allocation3 + $0x8] sm:$0xff] %v711_v36 }
  0xf8   : > { %v612_v40 = vadd.f32 %v611_v38, %v436_v6  ;;  %v2788_v6 = vld [vmem:[#allocation2 + $0x10] sm:$0xf0] }
  0xf9   : > { %v3442_v10 = vor.u32 %v2933_v8, %v2788_v6 }
  0xfa   : > { %v621_v41 = vpack.c.bf16 %v612_v40, %v593_v35  ;;  %v693_v43 = vpop.f32.mrf.mxu2 }
  0xfb   : > { %v694_v44 = vadd.f32 %v693_v43, %v644_v37  ;;  %v2834_v17 = vld [vmem:[#allocation2 + $0x18] sm:$0xf0] }
  0xfc   : > { %629 = vst [vmem:[#allocation2 + $0x28] sm:$0xff] %v621_v41  ;;  %v3452_v19 = vor.u32 %v2939_v18, %v2834_v17 }
  0xfd   : > { %v713_v46 = vpack.c.bf16 %v708_v42, %v694_v44 }
  0xfe   : > { %v2943_v61 = vld [vmem:[#allocation3 + $0xc] sm:$0xf] }
  0xff   : > { %v613_v47 = vpop.f32.mrf.mxu0  ;;  %717 = vst [vmem:[#allocation3 + $0x18] sm:$0xff] %v713_v46 }
 0x100   : > { %v614_v48 = vadd.f32 %v613_v47, %v441_v14  ;;  %v2935_v14 = vld [vmem:[#allocation2 + $0x24] sm:$0xf] }
 0x101   : > { %v3448_v16 = vor.u32 %v2935_v14, %v2796_v12 }
 0x102   : > { %v623_v49 = vpack.c.bf16 %v614_v48, %v595_v45 }
 0x103   : > { %v2941_v21 = vld [vmem:[#allocation2 + $0x2c] sm:$0xf] }
 0x104   : > { %631 = vst [vmem:[#allocation2 + $0x38] sm:$0xff] %v623_v49 }
 0x106   : > { %v2850_v62 = vld [vmem:[#allocation3 + $0x18] sm:$0xf0] }
 0x107   : > { %v663_v52 = vpop.f32.mrf.mxu0  ;;  %v2853_v4 = vor.u32 %v2943_v61, %v2850_v62 }
 0x108   : > { %v664_v53 = vadd.f32 %v663_v52, %v639_v26 }
 0x10a   : > { %v710_v54 = vpack.c.bf16 %v678_v51, %v664_v53 }
 0x10b   : > { %v2842_v20 = vld [vmem:[#allocation2 + $0x38] sm:$0xf0] }
 0x10c   : > { %714 = vst [vmem:[#allocation3] sm:$0xff] %v710_v54  ;;  %v3455_v22 = vor.u32 %v2941_v21, %v2842_v20 }
 0x10f   : > { %v665_v56 = vpop.f32.mrf.mxu0 }
 0x110   : > { %v666_v58 = vadd.f32 %v665_v56, %v644_v37 }
 0x112   : > { %v712_v59 = vpack.c.bf16 %v680_v57, %v666_v58 }
 0x113   : > { %v2802_v60 = vld [vmem:[#allocation3] sm:$0xf]  ;;  %v2937_v0 = vld [vmem:[#allocation3 + $0x4] sm:$0xf] }
 0x114   : > { %716 = vst [vmem:[#allocation3 + $0x10] sm:$0xff] %v712_v59 }
 0x11b   : > { %v2938_v63 = vld [vmem:[#allocation3 + $0xc] sm:$0xf0]  ;;  %v2804_v1 = vld [vmem:[#allocation3 + $0x10] sm:$0xf0] }
 0x11c   : > { %v2803_v2 = vor.u32 %v2938_v63, %v2802_v60  ;;  %v2807_v3 = vor.u32 %v2937_v0, %v2804_v1 }
 0x11e   : > { %765 = vmatpush.bf16.xpose.msrb.mxu0 %v2803_v2  ;;  %784 = vmatpush.bf16.xpose.msra.mxu1 %v2807_v3 }
 0x125   : > { %766 = vmatmul.bf16.vlgmr.msrb.gmra.mxu0 %v3440_v9  ;;  %785 = vmatmul.bf16.vlgmr.msra.gmra.mxu1 %v3442_v10 }
 0x126   : > { %1588 = vmatpush.bf16.xpose.msra.mxu0 %v2853_v4 }
 0x135   : > { %771 = vmatmul.bf16.gmra.mxu0 %v3446_v15  ;;  %790 = vmatmul.bf16.gmra.mxu1 %v3448_v16 }
 0x145   : > { %1589 = vmatmul.bf16.vlgmr.msra.gmra.mxu0 %v3452_v19 }
 0x155   : > { %1594 = vmatmul.bf16.gmra.mxu0 %v3455_v22 }
 0x1a2   : > { %v767_v23 = vpop.f32.mrf.mxu0  ;;  %v786_v24 = vpop.f32.mrf.mxu1 }
 0x1a3   : > { %v787_v25 = vadd.f32 %v786_v24, %v767_v23  ;;  %v3466_v24 = vstv %s856_s12 }
 0x1a5   : > { %v797_v26 = vsel %vm796_vm1, %v787_v25, -inf }
 0x1a6   : > { %798 = vmax.xlane.f32.xlu0 %v797_v26 }
 0x1aa   : > { %v769_v27 = vpop.f32.mrf.mxu0  ;;  %v788_v28 = vpop.f32.mrf.mxu1 }
 0x1ab   : > { %v789_v29 = vadd.f32 %v788_v28, %v769_v27  ;;  %v3468_v27 = vstv %s2695_s27  ;;  %s3180_s27 = smov 112  }
 0x1ad   : > { %v800_v30 = vsel %vm796_vm1, %v789_v29, -inf }
 0x1ae   : > { %801 = vmax.xlane.f32.xlu1 %v800_v30 }
 0x1b2   : > { %v772_v31 = vpop.f32.mrf.mxu0  ;;  %v791_v32 = vpop.f32.mrf.mxu1 }
 0x1b3   : > { %v792_v33 = vadd.f32 %v791_v32, %v772_v31 }
 0x1b5   : > { %v803_v34 = vsel %vm796_vm1, %v792_v33, -inf }
 0x1b6   : > { %804 = vmax.xlane.f32.xlu2 %v803_v34 }
 0x1ba   : > { %v774_v35 = vpop.f32.mrf.mxu0  ;;  %v793_v36 = vpop.f32.mrf.mxu1 }
 0x1bb   : > { %v794_v37 = vadd.f32 %v793_v36, %v774_v35 }
 0x1bd   : > { %v806_v38 = vsel %vm796_vm1, %v794_v37, -inf }
 0x1be   : > { %807 = vmax.xlane.f32.xlu2 %v806_v38 }
 0x219   : > { %v799_v41 = vpop.xlane.xlu0 %798 }
 0x221   : > { %v802_v40 = vpop.xlane.xlu1 %801 }
 0x222   : > { %v809_v43 = vmax.f32 %v799_v41, %v802_v40  ;;  %v2848_v41 = vld [vmem:[#allocation3 + $0x8] sm:$0xf] }
 0x229   : > { %v805_v39 = vpop.xlane.xlu2 %804 }
 0x231   : > { %v808_v42 = vpop.xlane.xlu2 %807 }
 0x232   : > { %v810_v44 = vmax.f32 %v805_v39, %v808_v42  ;;  %v2944_v42 = vld [vmem:[#allocation3 + $0x14] sm:$0xf0] }
 0x234   : > { %v811_v45 = vmax.f32 %v809_v43, %v810_v44  ;;  %v2849_v44 = vor.u32 %v2944_v42, %v2848_v41 }
 0x236   : > { %v812_v46 = vrot.slane %v811_v45, 4 }
 0x238   : > { %v813_v47 = vmax.f32 %v811_v45, %v812_v46  ;;  %v3489_v45 = vld [vmem:[%s4298_s6] sm:$0xff]  ;;  %v2940_v46 = vld [vmem:[#allocation2 + $0x14] sm:$0xf0] }
 0x23a   : > { %v814_v48 = vrot.slane %v813_v47, 2 }
 0x23c   : > { %v815_v49 = vmax.f32 %v813_v47, %v814_v48  ;;  %v2832_v47 = vld [vmem:[#allocation2 + $0x8] sm:$0xf] }
 0x23d   : > { %v3493_v48 = vor.u32 %v2940_v46, %v2832_v47 }
 0x23e   : > { %v816_v50 = vrot.slane %v815_v49, 1 }
 0x240   : > { %v817_v51 = vmax.f32 %v815_v49, %v816_v50  ;;  %v2942_v49 = vld [vmem:[#allocation2 + $0x34] sm:$0xf0]  ;;  %v2840_v50 = vld [vmem:[#allocation2 + $0x28] sm:$0xf] }
 0x242   : > { %v820_v52 = vsub.f32 %v792_v33, %v817_v51  ;;  %v819_v53 = vsub.f32 %v789_v29, %v817_v51  ;;  %v818_v54 = vsub.f32 %v787_v25, %v817_v51  ;;  %v821_v58 = vsub.f32 %v794_v37, %v817_v51 }
 0x243   : > { %v3496_v51 = vor.u32 %v2942_v49, %v2840_v50 }
 0x244   : > { %v826_v55 = vmul.f32 1.442695, %v820_v52  ;;  %v824_v56 = vmul.f32 1.442695, %v819_v53  ;;  %v822_v57 = vmul.f32 1.442695, %v818_v54  ;;  %v1590_v53 = vpop.f32.mrf.mxu0 }
 0x245   : > { %v828_v59 = vmul.f32 1.442695, %v821_v58 }
 0x246   : > { %3032 = vpow2.f32 %v826_v55 }
 0x247   : > { %3034 = vpow2.f32 %v824_v56 }
 0x248   : > { %3036 = vpow2.f32 %v822_v57 }
 0x249   : > { %3038 = vpow2.f32 %v828_v59 }
 0x24c   : > { %v3033_v60 = vpop.eup %3032  ;;  %v1592_v57 = vpop.f32.mrf.mxu0 }
 0x24d   : > { %v3035_v61 = vpop.eup %3034  ;;  %v836_v62 = vsel %vm796_vm1, %v3033_v60, 0.0 }
 0x24e   : > { %v3037_v63 = vpop.eup %3036  ;;  %837 = vadd.xlane.f32.xlu2 %v836_v62  ;;  %v833_v0 = vsel %vm796_vm1, %v3035_v61, 0.0 }
 0x24f   : > { %834 = vadd.xlane.f32.xlu1 %v833_v0  ;;  %v830_v1 = vsel %vm796_vm1, %v3037_v63, 0.0  ;;  %v3039_v2 = vpop.eup %3038 }
 0x250   : > { %831 = vadd.xlane.f32.xlu0 %v830_v1  ;;  %v839_v3 = vsel %vm796_vm1, %v3039_v2, 0.0 }
 0x258   : > { %840 = vadd.xlane.f32.xlu0 %v839_v3 }
 0x2c1   : > { %v838_v7 = vpop.xlane.xlu2 %837 }
 0x2c2   : > { %v835_v4 = vpop.xlane.xlu1 %834 }
 0x2c3   : > { %v832_v5 = vpop.xlane.xlu0 %831 }
 0x2c4   : > { %v842_v6 = vadd.f32 %v835_v4, %v832_v5 }
 0x2c6   : > { %v843_v8 = vadd.f32 %v842_v6, %v838_v7  ;;  %v3508_v7 = vld [vmem:[%s4298_s6 + $0x8] sm:$0xff] }
 0x2cb   : > { %v841_v11 = vpop.xlane.xlu0 %840 }
 0x2cc   : > { %v844_v12 = vadd.f32 %v843_v8, %v841_v11 }
 0x2ce   : > { %v845_v13 = vrot.slane %v844_v12, 4 }
 0x2d0   : > { %v846_v14 = vadd.f32 %v845_v13, %v844_v12 }
 0x2d2   : > { %v847_v17 = vrot.slane %v846_v14, 2 }
 0x2d4   : > { %v848_v18 = vadd.f32 %v847_v17, %v846_v14 }
 0x2d6   : > { %v849_v20 = vrot.slane %v848_v18, 1 }
 0x2d8   : > { %v850_v21 = vadd.f32 %v849_v20, %v848_v18 }
 0x2da   : > { %3040 = vrcp.f32 %v850_v21 }
 0x2e0   : > { %v3041_v23 = vpop.eup %3040 }
 0x2e1   : > { %v855_v25 = vmul.f32 %v3041_v23, %v3039_v2  ;;  %v854_v26 = vmul.f32 %v3041_v23, %v3033_v60  ;;  %v853_v30 = vmul.f32 %v3041_v23, %v3035_v61  ;;  %v852_v35 = vmul.f32 %v3041_v23, %v3037_v63  ;;  %v1595_v61 = vpop.f32.mrf.mxu0 }
 0x2e3   : > { %v861_v28 = vmul.f32 %v3466_v24, %v855_v25  ;;  %v860_v29 = vmul.f32 %v3466_v24, %v854_v26  ;;  %v859_v34 = vmul.f32 %v3466_v24, %v853_v30  ;;  %v858_v38 = vmul.f32 %v3466_v24, %v852_v35 }
 0x2e5   : > { %v866_v31 = vadd.f32 %v3468_v27, %v861_v28  ;;  %v865_v33 = vadd.f32 %v3468_v27, %v860_v29  ;;  %v864_v37 = vadd.f32 %v3468_v27, %v859_v34  ;;  %v863_v40 = vadd.f32 %v3468_v27, %v858_v38 }
 0x2e7   : > { %v870_v32 = vmax.f32 %v866_v31, 0.0  ;;  %v869_v36 = vmax.f32 %v865_v33, 0.0  ;;  %v868_v39 = vmax.f32 %v864_v37, 0.0  ;;  %v867_v43 = vmax.f32 %v863_v40, 0.0 }
 0x2e9   : > { %2808 = vmatpush.xpose.msk.msra.mxu2 %vm796_vm1, %v870_v32  ;;  %2950 = vmatpush.xpose.msk.msrb.mxu3 %vm796_vm1, %v870_v32  ;;  %v1597_v1 = vpop.f32.mrf.mxu0 }
 0x2ed   : > { %2809 = vmatpush.xpose.msk.msra.mxu2 %vm796_vm1, %v869_v36  ;;  %2951 = vmatpush.xpose.msk.msrb.mxu3 %vm796_vm1, %v869_v36 }
 0x2f1   : > { %2810 = vmatpush.xpose.msk.msra.mxu2 %vm796_vm1, %v868_v39  ;;  %2952 = vmatpush.xpose.msk.msrb.mxu3 %vm796_vm1, %v868_v39 }
 0x2f5   : > { %2811 = vmatpush.xpose.msk.msra.mxu2 %vm796_vm1, %v867_v43  ;;  %2953 = vmatpush.xpose.msk.msrb.mxu3 %vm796_vm1, %v867_v43  ;;  %v720_v43 = vld [vmem:[%s4299_s7] sm:$0xff] }
 0x2f8   : > { %2812 = vmatmul.msk.f32.vlgmr.msra.gmra.mxu2 %vm796_vm1, %v3489_v45  ;;  %2813 = vmatmul.msk.f32.vlgmr.msrb.gmra.mxu3 %vm796_vm1, %v3508_v7 }
 0x2f9   : > { %1569 = vmatpush.bf16.xpose.msrb.mxu2 %v2849_v44  ;;  %v721_v44 = vld [vmem:[%s4299_s7 + $0x8] sm:$0xff] }
 0x300   : > { %1570 = vmatmul.bf16.vlgmr.msrb.gmra.mxu2 %v3493_v48 }
 0x310   : > { %1575 = vmatmul.bf16.gmra.mxu2 %v3496_v51 }
 0x37b   : > { %v3499_v52 = vpop.f32.mrf.mxu2 }
 0x383   : > { %v1571_v54 = vpop.f32.mrf.mxu2 }
 0x384   : > { %v1591_v55 = vadd.f32 %v1590_v53, %v1571_v54 }
 0x386   : > { %v1600_v56 = vsel %vm796_vm1, %v1591_v55, -inf }
 0x387   : > { %1601 = vmax.xlane.f32.xlu1 %v1600_v56 }
 0x38b   : > { %v1573_v58 = vpop.f32.mrf.mxu2 }
 0x38c   : > { %v1593_v59 = vadd.f32 %v1592_v57, %v1573_v58 }
 0x38e   : > { %v1603_v60 = vsel %vm796_vm1, %v1593_v59, -inf }
 0x38f   : > { %1604 = vmax.xlane.f32.xlu2 %v1603_v60 }
 0x393   : > { %v1576_v62 = vpop.f32.mrf.mxu2 }
 0x394   : > { %v1596_v63 = vadd.f32 %v1595_v61, %v1576_v62 }
 0x396   : > { %v1606_v0 = vsel %vm796_vm1, %v1596_v63, -inf }
 0x397   : > { %1607 = vmax.xlane.f32.xlu0 %v1606_v0 }
 0x39b   : > { %v1578_v2 = vpop.f32.mrf.mxu2 }
 0x39c   : > { %v1598_v3 = vadd.f32 %v1597_v1, %v1578_v2 }
 0x39e   : > { %v1609_v4 = vsel %vm796_vm1, %v1598_v3, -inf }
 0x39f   : > { %1610 = vmax.xlane.f32.xlu1 %v1609_v4 }
 0x3fa   : > { %v1602_v5 = vpop.xlane.xlu1 %1601 }
 0x402   : > { %v1605_v6 = vpop.xlane.xlu2 %1604 }
 0x403   : > { %v1612_v12 = vmax.f32 %v1602_v5, %v1605_v6 }
 0x40a   : > { %v1608_v8 = vpop.xlane.xlu0 %1607 }
 0x412   : > { %v1611_v11 = vpop.xlane.xlu1 %1610 }
 0x413   : > { %v1613_v13 = vmax.f32 %v1608_v8, %v1611_v11 }
 0x415   : > { %v1614_v14 = vmax.f32 %v1612_v12, %v1613_v13 }
 0x417   : > { %v1615_v17 = vrot.slane %v1614_v14, 4 }
 0x419   : > { %v1616_v18 = vmax.f32 %v1614_v14, %v1615_v17 }
 0x41b   : > { %v1617_v20 = vrot.slane %v1616_v18, 2 }
 0x41d   : > { %v1618_v21 = vmax.f32 %v1616_v18, %v1617_v20 }
 0x41f   : > { %v1619_v23 = vrot.slane %v1618_v21, 1 }
 0x421   : > { %v1620_v25 = vmax.f32 %v1618_v21, %v1619_v23 }
 0x423   : > { %v1623_v26 = vsub.f32 %v1596_v63, %v1620_v25  ;;  %v1622_v28 = vsub.f32 %v1593_v59, %v1620_v25  ;;  %v1621_v29 = vsub.f32 %v1591_v55, %v1620_v25  ;;  %v1624_v33 = vsub.f32 %v1598_v3, %v1620_v25 }
 0x425   : > { %v1629_v30 = vmul.f32 1.442695, %v1623_v26  ;;  %v1627_v31 = vmul.f32 1.442695, %v1622_v28  ;;  %v1625_v32 = vmul.f32 1.442695, %v1621_v29 }
 0x426   : > { %v1631_v34 = vmul.f32 1.442695, %v1624_v33 }
 0x427   : > { %3042 = vpow2.f32 %v1629_v30 }
 0x428   : > { %3044 = vpow2.f32 %v1627_v31 }
 0x429   : > { %3046 = vpow2.f32 %v1625_v32 }
 0x42a   : > { %3048 = vpow2.f32 %v1631_v34 }
 0x42d   : > { %v3043_v35 = vpop.eup %3042 }
 0x42e   : > { %v3045_v36 = vpop.eup %3044  ;;  %v1639_v37 = vsel %vm796_vm1, %v3043_v35, 0.0 }
 0x42f   : > { %v3047_v38 = vpop.eup %3046  ;;  %1640 = vadd.xlane.f32.xlu1 %v1639_v37  ;;  %v1636_v39 = vsel %vm796_vm1, %v3045_v36, 0.0 }
 0x430   : > { %1637 = vadd.xlane.f32.xlu0 %v1636_v39  ;;  %v1633_v40 = vsel %vm796_vm1, %v3047_v38, 0.0  ;;  %v3049_v41 = vpop.eup %3048 }
 0x431   : > { %1634 = vadd.xlane.f32.xlu2 %v1633_v40  ;;  %v1642_v42 = vsel %vm796_vm1, %v3049_v41, 0.0 }
 0x439   : > { %1643 = vadd.xlane.f32.xlu2 %v1642_v42 }
 0x444   : > { %873 = vperm.xlu0 %3029, %v720_v43  }
 0x448   : > { %878 = vperm.xlu1 %3030, %v721_v44  }
 0x462   : > { %923 = vxpose.binary.xlu2.c.b16.start [1/4] (short) %v3442_v10, %v3440_v9, 128 }
 0x466   : > { %1707 = vxpose.binary.xlu0.c.b16.start [1/4] (short) %v3452_v19, %v3493_v48, 128  ;;  %v919_v19 = vpop.f32.mrf.mxu3 }
 0x472   : > { %924 = vxpose.binary.xlu2.c.b16.end [2/4] (short) %v3448_v16, %v3446_v15, 128 }
 0x476   : > { %1708 = vxpose.binary.xlu0.c.b16.end [2/4] (short) %v3455_v22, %v3496_v51, 128 }
 0x4a2   : > { %v1641_v50 = vpop.xlane.xlu1 %1640 }
 0x4a3   : > { %v1638_v46 = vpop.xlane.xlu0 %1637 }
 0x4a4   : > { %v1635_v47 = vpop.xlane.xlu2 %1634 }
 0x4a5   : > { %v1645_v49 = vadd.f32 %v1638_v46, %v1635_v47 }
 0x4a7   : > { %v1646_v53 = vadd.f32 %v1645_v49, %v1641_v50 }
 0x4ac   : > { %v1644_v54 = vpop.xlane.xlu2 %1643 }
 0x4ad   : > { %v1647_v55 = vadd.f32 %v1646_v53, %v1644_v54 }
 0x4af   : > { %v1648_v56 = vrot.slane %v1647_v55, 4 }
 0x4b1   : > { %v1649_v57 = vadd.f32 %v1648_v56, %v1647_v55 }
 0x4b3   : > { %v1650_v58 = vrot.slane %v1649_v57, 2 }
 0x4b5   : > { %v1651_v9 = vadd.f32 %v1650_v58, %v1649_v57 }
 0x4b6   : > { %v874_v59 = vpop.permute.xlu0 %873 }
 0x4b7   : > { %v1652_v10 = vrot.slane %v1651_v9, 1  ;;  %v917_v15 = vadd.f32 %v3499_v52, %v874_v59 }
 0x4b9   : > { %v1653_v48 = vadd.f32 %v1652_v10, %v1651_v9 }
 0x4ba   : > { %v879_v60 = vpop.permute.xlu1 %878 }
 0x4bb   : > { %3050 = vrcp.f32 %v1653_v48  ;;  %v920_v16 = vadd.f32 %v919_v19, %v879_v60 }
 0x4bd   : > { %v922_v22 = vpack.c.bf16 %v920_v16, %v917_v15 }
 0x4bf   : > { %v997_v51 = vsel %vm947_vm2, %v922_v22, 0 }
 0x4c0   : > { %1006 = vmatpush.bf16.xpose.msra.mxu3 %v997_v51 }
 0x4c1   : > { %v3051_v61 = vpop.eup %3050 }
 0x4c2   : > { %v1658_v62 = vmul.f32 %v3051_v61, %v3049_v41  ;;  %v1657_v63 = vmul.f32 %v3051_v61, %v3043_v35  ;;  %v1656_v2 = vmul.f32 %v3051_v61, %v3045_v36  ;;  %v1655_v6 = vmul.f32 %v3051_v61, %v3047_v38 }
 0x4c4   : > { %v1662_v0 = vmul.f32 %v1658_v62, %v3466_v24  ;;  %v1661_v1 = vmul.f32 %v1657_v63, %v3466_v24  ;;  %v1660_v52 = vmul.f32 %v1656_v2, %v3466_v24  ;;  %v1659_v12 = vmul.f32 %v1655_v6, %v3466_v24 }
 0x4c6   : > { %v1666_v3 = vadd.f32 %v1662_v0, %v3468_v27  ;;  %v1665_v5 = vadd.f32 %v1661_v1, %v3468_v27  ;;  %v1664_v11 = vadd.f32 %v1660_v52, %v3468_v27  ;;  %v1663_v14 = vadd.f32 %v1659_v12, %v3468_v27 }
 0x4c8   : > { %v1670_v4 = vmax.f32 %v1666_v3, 0.0  ;;  %v1669_v8 = vmax.f32 %v1665_v5, 0.0  ;;  %v1668_v13 = vmax.f32 %v1664_v11, 0.0  ;;  %v1667_v17 = vmax.f32 %v1663_v14, 0.0 }
 0x4ca   : > { %2854 = vmatpush.xpose.msk.msrb.mxu0 %vm796_vm1, %v1670_v4  ;;  %2954 = vmatpush.xpose.msk.msrb.mxu1 %vm796_vm1, %v1670_v4 }
 0x4ce   : > { %2855 = vmatpush.xpose.msk.msrb.mxu0 %vm796_vm1, %v1669_v8  ;;  %2955 = vmatpush.xpose.msk.msrb.mxu1 %vm796_vm1, %v1669_v8 }
 0x4d2   : > { %2856 = vmatpush.xpose.msk.msrb.mxu0 %vm796_vm1, %v1668_v13  ;;  %2956 = vmatpush.xpose.msk.msrb.mxu1 %vm796_vm1, %v1668_v13 }
 0x4d6   : > { %2857 = vmatpush.xpose.msk.msrb.mxu0 %vm796_vm1, %v1667_v17  ;;  %2957 = vmatpush.xpose.msk.msrb.mxu1 %vm796_vm1, %v1667_v17 }
 0x4d9   : > { %2858 = vmatmul.msk.f32.vlgmr.msrb.gmra.mxu0 %vm796_vm1, %v3489_v45  ;;  %2859 = vmatmul.msk.f32.vlgmr.msrb.gmra.mxu1 %vm796_vm1, %v3508_v7 }
 0x503   : > { %v931_v24 = vpop.trf.xlu2 }
 0x504   : > { %2814 = vmatmul.msk.bf16.vlgmr.msra.gmra.mxu3 %vm947_vm2, %v931_v24 }
 0x50b   : > { %v932_v18 = vpop.trf.xlu2 }
 0x512   : > { %v1715_v7 = vpop.trf.xlu0 }
 0x513   : > { %v933_v27 = vpop.trf.xlu2 }
 0x514   : > { %2815 = vmatmul.msk.bf16.gmra.mxu3 %vm947_vm2, %v933_v27 }
 0x51a   : > { %v3557_v29 = vpop.trf.xlu0 }
 0x51b   : > { %v934_v20 = vpop.trf.xlu2 }
 0x522   : > { %v1717_v31 = vpop.trf.xlu0 }
 0x523   : > { %v935_v21 = vpop.trf.xlu2 }
 0x524   : > { %2816 = vmatmul.msk.bf16.gmra.mxu3 %vm947_vm2, %v935_v21 }
 0x52a   : > { %v3561_v39 = vpop.trf.xlu0 }
 0x52b   : > { %v936_v23 = vpop.trf.xlu2 }
 0x532   : > { %v1719_v41 = vpop.trf.xlu0 }
 0x533   : > { %v937_v25 = vpop.trf.xlu2 }
 0x534   : > { %2817 = vmatmul.msk.bf16.gmra.mxu3 %vm947_vm2, %v937_v25 }
 0x53a   : > { %v3567_v43 = vpop.trf.xlu0 }
 0x53b   : > { %v938_v26 = vpop.trf.xlu2 }
 0x542   : > { %v1721_v46 = vpop.trf.xlu0 }
 0x543   : > { %v939_v45 = vpop.trf.xlu2 }
 0x544   : > { %2818 = vmatmul.msk.bf16.gmra.mxu3 %vm947_vm2, %v939_v45 }
 0x54a   : > { %v3571_v47 = vpop.trf.xlu0 }
 0x54b   : > { %v940_v28 = vpop.trf.xlu2 }
 0x552   : > { %v1723_v50 = vpop.trf.xlu0 }
 0x553   : > { %v941_v30 = vpop.trf.xlu2 }
 0x554   : > { %2819 = vmatmul.msk.bf16.gmra.mxu3 %vm947_vm2, %v941_v30 }
 0x556   : > { %v1700_v32 = vpop.f32.mrf.mxu0  ;;  %v1703_v33 = vpop.f32.mrf.mxu1 }
 0x557   : > { %v1701_v34 = vadd.f32 %v1700_v32, %v874_v59  ;;  %v1704_v35 = vadd.f32 %v1703_v33, %v879_v60 }
 0x559   : > { %v1706_v36 = vpack.c.bf16 %v1704_v35, %v1701_v34 }
 0x55a   : > { %v1724_v54 = vpop.trf.xlu0 }
 0x55b   : > { %v942_v37 = vpop.trf.xlu2  ;;  %v1780_v38 = vsel %vm947_vm2, %v1706_v36, 0 }
 0x55c   : > { %1789 = vmatpush.bf16.xpose.msra.mxu1 %v1780_v38  ;;  %2958 = vmatpush.bf16.xpose.msra.mxu2 %v1780_v38 }
 0x562   : > { %v1725_v56 = vpop.trf.xlu0 }
 0x563   : > { %v943_v40 = vpop.trf.xlu2  ;;  %2860 = vmatmul.msk.bf16.vlgmr.msra.gmra.mxu1 %vm947_vm2, %v1715_v7  ;;  %2872 = vmatmul.msk.bf16.vlgmr.msra.gmra.mxu2 %vm947_vm2, %v1724_v54 }
 0x564   : > { %2820 = vmatmul.msk.bf16.gmra.mxu3 %vm947_vm2, %v943_v40 }
 0x56a   : > { %v1726_v58 = vpop.trf.xlu0 }
 0x56b   : > { %v3565_v42 = vpop.trf.xlu2 }
 0x572   : > { %v1727_v10 = vpop.trf.xlu0 }
 0x573   : > { %v945_v44 = vpop.trf.xlu2  ;;  %2861 = vmatmul.msk.bf16.gmra.mxu1 %vm947_vm2, %v1717_v31  ;;  %2873 = vmatmul.msk.bf16.gmra.mxu2 %vm947_vm2, %v1726_v58 }
 0x574   : > { %2821 = vmatmul.msk.bf16.gmra.mxu3 %vm947_vm2, %v945_v44 }
 0x57a   : > { %v1728_v19 = vpop.trf.xlu0 }
 0x582   : > { %v1729_v22 = vpop.trf.xlu0 }
 0x583   : > { %2862 = vmatmul.msk.bf16.gmra.mxu1 %vm947_vm2, %v1719_v41  ;;  %2874 = vmatmul.msk.bf16.gmra.mxu2 %vm947_vm2, %v1728_v19 }
 0x584   : > { %2822 = vmatmul.msk.bf16.gmra.mxu3 %vm947_vm2, %v932_v18 }
 0x587   : > { %v1008_v49 = vpop.f32.mrf.mxu3 }
 0x588   : > { %1088 = vst.msk [vmem:[#allocation4] sm:$0xff] %vm796_vm1, %v1008_v49 }
 0x58a   : > { %v1730_v25 = vpop.trf.xlu0 }
 0x58f   : > { %v1010_v53 = vpop.f32.mrf.mxu3 }
 0x590   : > { %1089 = vst.msk [vmem:[#allocation4 + $0x8] sm:$0xff] %vm796_vm1, %v1010_v53 }
 0x593   : > { %2863 = vmatmul.msk.bf16.gmra.mxu1 %vm947_vm2, %v1721_v46  ;;  %2875 = vmatmul.msk.bf16.gmra.mxu2 %vm947_vm2, %v1730_v25 }
 0x594   : > { %2823 = vmatmul.msk.bf16.gmra.mxu3 %vm947_vm2, %v934_v20 }
 0x597   : > { %v1013_v55 = vpop.f32.mrf.mxu3 }
 0x598   : > { %1090 = vst.msk [vmem:[#allocation4 + $0x10] sm:$0xff] %vm796_vm1, %v1013_v55 }
 0x59f   : > { %v1015_v57 = vpop.f32.mrf.mxu3  ;;  %v3599_v62 = vld [vmem:[#allocation4 + $0x4] ss:$16 sm:$0x3]  ;;  %v3601_v63 = vld [vmem:[#allocation4 + $0x5] ss:$16 sm:$0x3] }
 0x5a0   : > { %1091 = vst.msk [vmem:[#allocation4 + $0x18] sm:$0xff] %vm796_vm1, %v1015_v57  ;;  %v3603_v0 = vld [vmem:[#allocation4 + $0x6] ss:$16 sm:$0x3] }
 0x5a1   : > { %v3605_v1 = vld [vmem:[#allocation4 + $0x7] ss:$16 sm:$0x3]  ;;  %v1138_v3 = vld [vmem:[#allocation4 + $0x1] ss:$16 sm:$0x3] }
 0x5a2   : > { %v3608_v4 = vld [vmem:[#allocation4 + $0x2] ss:$16 sm:$0x3]  ;;  %v3610_v5 = vld [vmem:[#allocation4 + $0x3] ss:$16 sm:$0x3] }
 0x5a3   : > { %2864 = vmatmul.msk.bf16.gmra.mxu1 %vm947_vm2, %v1723_v50  ;;  %v1120_v52 = vld [vmem:[#allocation4] ss:$16 sm:$0x3] }
 0x5a4   : > { %2824 = vmatmul.msk.bf16.gmra.mxu3 %vm947_vm2, %v936_v23  ;;  %v946_v23 = vpop.trf.xlu2 }
 0x5a7   : > { %v1018_v9 = vpop.f32.mrf.mxu3  ;;  %v1327_v11 = vld [vmem:[#allocation4 + $0x8] ss:$16 sm:$0x3]  ;;  %v3617_v12 = vld [vmem:[#allocation4 + $0x9] ss:$16 sm:$0x3] }
 0x5a8   : > { %1092 = vst.msk [vmem:[#allocation4 + $0x20] sm:$0xff] %vm796_vm1, %v1018_v9  ;;  %v3619_v13 = vld [vmem:[#allocation4 + $0xa] ss:$16 sm:$0x3] }
 0x5a9   : > { %4323 = vst [vmem:[#allocation21_spill] sm:$0xff] %v3619_v13  ;;  %v3621_v14 = vld [vmem:[#allocation4 + $0xb] ss:$16 sm:$0x3] }
 0x5aa   : > { %4324 = vst [vmem:[#allocation22_spill] sm:$0xff] %v3621_v14  ;;  %v3623_v17 = vld [vmem:[#allocation4 + $0xc] ss:$16 sm:$0x3] }
 0x5ab   : > { %4325 = vst [vmem:[#allocation23_spill] sm:$0xff] %v3623_v17  ;;  %v3625_v24 = vld [vmem:[#allocation4 + $0xd] ss:$16 sm:$0x3] }
 0x5ac   : > { %4326 = vst [vmem:[#allocation24_spill] sm:$0xff] %v3625_v24  ;;  %v3627_v18 = vld [vmem:[#allocation4 + $0xe] ss:$16 sm:$0x3] }
 0x5ad   : > { %4327 = vst [vmem:[#allocation25_spill] sm:$0xff] %v3627_v18  ;;  %v3629_v27 = vld [vmem:[#allocation4 + $0xf] ss:$16 sm:$0x3] }
 0x5ae   : > { %4328 = vst [vmem:[#allocation26_spill] sm:$0xff] %v3629_v27 }
 0x5af   : > { %v1020_v59 = vpop.f32.mrf.mxu3 }
 0x5b0   : > { %1093 = vst.msk [vmem:[#allocation4 + $0x28] sm:$0xff] %vm796_vm1, %v1020_v59 }
 0x5b3   : > { %2865 = vmatmul.msk.bf16.gmra.mxu1 %vm947_vm2, %v1725_v56 }
 0x5b4   : > { %2825 = vmatmul.msk.bf16.gmra.mxu3 %vm947_vm2, %v938_v26 }
 0x5b7   : > { %v1023_v48 = vpop.f32.mrf.mxu3 }
 0x5b8   : > { %1094 = vst.msk [vmem:[#allocation4 + $0x30] sm:$0xff] %vm796_vm1, %v1023_v48 }
 0x5bf   : > { %v1025_v60 = vpop.f32.mrf.mxu3  ;;  %v1139_v7 = vld [vmem:[#allocation4 + $0x1] ss:$16 sm:$0xc]  ;;  %v3641_v33 = vld [vmem:[#allocation4 + $0x4] ss:$16 sm:$0xc] }
 0x5c0   : > { %1095 = vst.msk [vmem:[#allocation4 + $0x38] sm:$0xff] %vm796_vm1, %v1025_v60  ;;  %v1140_v30 = vor.u32 %v1139_v7, %v1138_v3  ;;  %v3643_v34 = vld [vmem:[#allocation4 + $0x5] ss:$16 sm:$0xc] }
 0x5c1   : > { %v3645_v35 = vld [vmem:[#allocation4 + $0x6] ss:$16 sm:$0xc]  ;;  %v3647_v36 = vld [vmem:[#allocation4 + $0x7] ss:$16 sm:$0xc] }
 0x5c2   : > { %v1193_v46 = vld [vmem:[#allocation4 + $0x3] ss:$16 sm:$0xc] }
 0x5c3   : > { %2866 = vmatmul.msk.bf16.gmra.mxu1 %vm947_vm2, %v1727_v10 }
 0x5c4   : > { %2826 = vmatmul.msk.bf16.gmra.mxu3 %vm947_vm2, %v940_v28 }
 0x5c7   : > { %v1028_v15 = vpop.f32.mrf.mxu3  ;;  %v3656_v48 = vld [vmem:[#allocation4 + $0x9] ss:$16 sm:$0xc]  ;;  %v3658_v60 = vld [vmem:[#allocation4 + $0xa] ss:$16 sm:$0xc] }
 0x5c8   : > { %1096 = vst.msk [vmem:[#allocation4 + $0x40] sm:$0xff] %vm796_vm1, %v1028_v15  ;;  %v3660_v15 = vld [vmem:[#allocation4 + $0xb] ss:$16 sm:$0xc] }
 0x5c9   : > { %4329 = vst [vmem:[#allocation27_spill] sm:$0xff] %v3656_v48  ;;  %v3668_v3 = vld [vmem:[#allocation4 + $0xf] ss:$16 sm:$0xc] }
 0x5ca   : > { %4330 = vst [vmem:[#allocation28_spill] sm:$0xff] %v3658_v60 }
 0x5cb   : > { %4331 = vst [vmem:[#allocation29_spill] sm:$0xff] %v3660_v15 }
 0x5cc   : > { %4335 = vst [vmem:[#allocation33_spill] sm:$0xff] %v3668_v3 }
 0x5cf   : > { %v1030_v16 = vpop.f32.mrf.mxu3 }
 0x5d0   : > { %1097 = vst.msk [vmem:[#allocation4 + $0x48] sm:$0xff] %vm796_vm1, %v1030_v16  ;;  %v3662_v16 = vld [vmem:[#allocation4 + $0xc] ss:$16 sm:$0xc] }
 0x5d1   : > { %4332 = vst [vmem:[#allocation30_spill] sm:$0xff] %v3662_v16 }
 0x5d3   : > { %2867 = vmatmul.msk.bf16.gmra.mxu1 %vm947_vm2, %v1729_v22 }
 0x5d4   : > { %2827 = vmatmul.msk.bf16.gmra.mxu3 %vm947_vm2, %v942_v37 }
 0x5d7   : > { %v1033_v51 = vpop.f32.mrf.mxu3 }
 0x5d8   : > { %1098 = vst.msk [vmem:[#allocation4 + $0x50] sm:$0xff] %vm796_vm1, %v1033_v51 }
 0x5df   : > { %v1035_v61 = vpop.f32.mrf.mxu3  ;;  %v1141_v28 = vld [vmem:[#allocation4 + $0x1] ss:$16 sm:$0x30]  ;;  %v1123_v32 = vld [vmem:[#allocation4] ss:$16 sm:$0x30] }
 0x5e0   : > { %v1791_v2 = vpop.f32.mrf.mxu1  ;;  %1099 = vst.msk [vmem:[#allocation4 + $0x58] sm:$0xff] %vm796_vm1, %v1035_v61  ;;  %v1142_v37 = vor.u32 %v1141_v28, %v1140_v30  ;;  %v1168_v55 = vld [vmem:[#allocation4 + $0x2] ss:$16 sm:$0x30] }
 0x5e1   : > { %1871 = vst.msk [vmem:[#allocation4] sm:$0xff] %vm796_vm1, %v1791_v2  ;;  %v3664_v61 = vld [vmem:[#allocation4 + $0xd] ss:$16 sm:$0xc] }
 0x5e2   : > { %4333 = vst [vmem:[#allocation31_spill] sm:$0xff] %v3664_v61  ;;  %v3666_v2 = vld [vmem:[#allocation4 + $0xe] ss:$16 sm:$0xc] }
 0x5e3   : > { %2868 = vmatmul.msk.bf16.gmra.mxu1 %vm947_vm2, %v3557_v29  ;;  %v1121_v29 = vld [vmem:[#allocation4] ss:$16 sm:$0xc]  ;;  %4334 = vst [vmem:[#allocation32_spill] sm:$0xff] %v3666_v2 }
 0x5e4   : > { %2828 = vmatmul.msk.bf16.gmra.mxu3 %vm947_vm2, %v3565_v42  ;;  %v1122_v40 = vor.u32 %v1121_v29, %v1120_v52  ;;  %v1328_v42 = vld [vmem:[#allocation4 + $0x8] ss:$16 sm:$0xc]  ;;  %v1194_v52 = vor.u32 %v1193_v46, %v3610_v5  ;;  %v3682_v25 = vld [vmem:[#allocation4 + $0x4] ss:$16 sm:$0x30] }
 0x5e5   : > { %v1329_v57 = vor.u32 %v1328_v42, %v1327_v11  ;;  %v3686_v7 = vld [vmem:[#allocation4 + $0x6] ss:$16 sm:$0x30]  ;;  %v3688_v29 = vld [vmem:[#allocation4 + $0x7] ss:$16 sm:$0x30] }
 0x5e6   : > { %v1124_v49 = vor.u32 %v1123_v32, %v1122_v40 }
 0x5e7   : > { %v1038_v6 = vpop.f32.mrf.mxu3  ;;  %v1330_v54 = vld [vmem:[#allocation4 + $0x8] ss:$16 sm:$0x30]  ;;  %v3694_v32 = vld [vmem:[#allocation4 + $0xa] ss:$16 sm:$0x30] }
 0x5e8   : > { %v1793_v8 = vpop.f32.mrf.mxu1  ;;  %1100 = vst.msk [vmem:[#allocation4 + $0x60] sm:$0xff] %vm796_vm1, %v1038_v6  ;;  %v3702_v40 = vld [vmem:[#allocation4 + $0xe] ss:$16 sm:$0x30] }
 0x5e9   : > { %1872 = vst.msk [vmem:[#allocation4 + $0x8] sm:$0xff] %vm796_vm1, %v1793_v8 }
 0x5ea   : > { %4337 = vst [vmem:[#allocation35_spill] sm:$0xff] %v3694_v32 }
 0x5eb   : > { %4341 = vst [vmem:[#allocation39_spill] sm:$0xff] %v3702_v40 }
 0x5ef   : > { %v1040_v20 = vpop.f32.mrf.mxu3 }
 0x5f0   : > { %1101 = vst.msk [vmem:[#allocation4 + $0x68] sm:$0xff] %vm796_vm1, %v1040_v20  ;;  %v1796_v21 = vpop.f32.mrf.mxu1 }
 0x5f1   : > { %1873 = vst.msk [vmem:[#allocation4 + $0x10] sm:$0xff] %vm796_vm1, %v1796_v21 }
 0x5f3   : > { %2869 = vmatmul.msk.bf16.gmra.mxu1 %vm947_vm2, %v3561_v39  ;;  %v1166_v39 = vld [vmem:[#allocation4 + $0x2] ss:$16 sm:$0xc] }
 0x5f4   : > { %2829 = vmatmul.msk.bf16.gmra.mxu3 %vm947_vm2, %v946_v23  ;;  %v1167_v56 = vor.u32 %v1166_v39, %v3608_v4  ;;  %v1195_v4 = vld [vmem:[#allocation4 + $0x3] ss:$16 sm:$0x30]  ;;  %v3700_v39 = vld [vmem:[#allocation4 + $0xd] ss:$16 sm:$0x30] }
 0x5f5   : > { %v1196_v11 = vor.u32 %v1195_v4, %v1194_v52  ;;  %4340 = vst [vmem:[#allocation38_spill] sm:$0xff] %v3700_v39  ;;  %v1851_v4 = vpop.f32.mrf.mxu2 }
 0x5f6   : > { %v1169_v59 = vor.u32 %v1168_v55, %v1167_v56 }
 0x5f7   : > { %v1043_v26 = vpop.f32.mrf.mxu3 }
 0x5f8   : > { %1102 = vst.msk [vmem:[#allocation4 + $0x70] sm:$0xff] %vm796_vm1, %v1043_v26  ;;  %v1798_v45 = vpop.f32.mrf.mxu1 }
 0x5f9   : > { %1874 = vst.msk [vmem:[#allocation4 + $0x18] sm:$0xff] %vm796_vm1, %v1798_v45  ;;  %v3684_v45 = vld [vmem:[#allocation4 + $0x5] ss:$16 sm:$0x30] }
 0x5ff   : > { %v1045_v31 = vpop.f32.mrf.mxu3  ;;  %v1143_v41 = vld [vmem:[#allocation4 + $0x1] ss:$16 sm:$0xc0]  ;;  %v1125_v50 = vld [vmem:[#allocation4] ss:$16 sm:$0xc0] }
 0x600   : > { %v1801_v38 = vpop.f32.mrf.mxu1  ;;  %1103 = vst.msk [vmem:[#allocation4 + $0x78] sm:$0xff] %vm796_vm1, %v1045_v31  ;;  %v1144_v44 = vor.u32 %v1143_v41, %v1142_v37  ;;  %v1126_v53 = vor.u32 %v1125_v50, %v1124_v49  ;;  %v1170_v9 = vld [vmem:[#allocation4 + $0x2] ss:$16 sm:$0xc0] }
 0x601   : > { %1875 = vst.msk [vmem:[#allocation4 + $0x20] sm:$0xff] %vm796_vm1, %v1801_v38  ;;  %v1171_v22 = vor.u32 %v1170_v9, %v1169_v59  ;;  %v1197_v8 = vld [vmem:[#allocation4 + $0x3] ss:$16 sm:$0xc0] }
 0x602   : > { %1155 = vrot.lane.b32.xlu1 %v1144_v44, %s3174_s22  ;;  %1135 = vst.msk [vmem:[#allocation5] sm:$0xff] %vm796_vm1, %v1126_v53  ;;  %v1198_v21 = vor.u32 %v1197_v8, %v1196_v11  ;;  %v3692_v31 = vld [vmem:[#allocation4 + $0x9] ss:$16 sm:$0x30]  ;;  %v3740_v11 = vpop.f32.mrf.mxu2 }
 0x603   : > { %2870 = vmatmul.msk.bf16.gmra.mxu1 %vm947_vm2, %v3567_v43  ;;  %v1331_v43 = vor.u32 %v1330_v54, %v1329_v57  ;;  %4336 = vst [vmem:[#allocation34_spill] sm:$0xff] %v3692_v31  ;;  %v3696_v37 = vld [vmem:[#allocation4 + $0xb] ss:$16 sm:$0x30] }
 0x604   : > { %4338 = vst [vmem:[#allocation36_spill] sm:$0xff] %v3696_v37  ;;  %v3698_v38 = vld [vmem:[#allocation4 + $0xc] ss:$16 sm:$0x30] }
 0x605   : > { %4339 = vst [vmem:[#allocation37_spill] sm:$0xff] %v3698_v38  ;;  %v3704_v41 = vld [vmem:[#allocation4 + $0xf] ss:$16 sm:$0x30] }
 0x606   : > { %4342 = vst [vmem:[#allocation40_spill] sm:$0xff] %v3704_v41  ;;  %v3712_v50 = vld [vmem:[#allocation4 + $0x4] ss:$16 sm:$0xc0] }
 0x607   : > { %v1048_v58 = vpop.f32.mrf.mxu3  ;;  %v1332_v10 = vld [vmem:[#allocation4 + $0x8] ss:$16 sm:$0xc0]  ;;  %v3714_v54 = vld [vmem:[#allocation4 + $0x5] ss:$16 sm:$0xc0] }
 0x608   : > { %v1803_v19 = vpop.f32.mrf.mxu1  ;;  %v1333_v51 = vor.u32 %v1332_v10, %v1331_v43  ;;  %1104 = vst.msk [vmem:[#allocation4 + $0x80] sm:$0xff] %vm796_vm1, %v1048_v58  ;;  %v3716_v55 = vld [vmem:[#allocation4 + $0x6] ss:$16 sm:$0xc0] }
 0x609   : > { %1876 = vst.msk [vmem:[#allocation4 + $0x28] sm:$0xff] %vm796_vm1, %v1803_v19  ;;  %v3718_v57 = vld [vmem:[#allocation4 + $0x7] ss:$16 sm:$0xc0] }
 0x60a   : > { %1182 = vrot.lane.b32.xlu1 %v1171_v22, %s3175_s16  ;;  %1342 = vst.msk [vmem:[#allocation5 + $0x8] sm:$0xff] %vm796_vm1, %v1333_v51  ;;  %v3722_v10 = vld [vmem:[#allocation4 + $0x9] ss:$16 sm:$0xc0] }
 0x60b   : > { %4343 = vst [vmem:[#allocation41_spill] sm:$0xff] %v3722_v10  ;;  %v3724_v59 = vld [vmem:[#allocation4 + $0xa] ss:$16 sm:$0xc0] }
 0x60c   : > { %4344 = vst [vmem:[#allocation42_spill] sm:$0xff] %v3724_v59  ;;  %v3726_v19 = vld [vmem:[#allocation4 + $0xb] ss:$16 sm:$0xc0] }
 0x60d   : > { %4345 = vst [vmem:[#allocation43_spill] sm:$0xff] %v3726_v19  ;;  %v3728_v43 = vld [vmem:[#allocation4 + $0xc] ss:$16 sm:$0xc0] }
 0x60e   : > { %4346 = vst [vmem:[#allocation44_spill] sm:$0xff] %v3728_v43  ;;  %v3730_v22 = vld [vmem:[#allocation4 + $0xd] ss:$16 sm:$0xc0] }
 0x60f   : > { %v1050_v6 = vpop.f32.mrf.mxu3  ;;  %4347 = vst [vmem:[#allocation45_spill] sm:$0xff] %v3730_v22  ;;  %v3732_v51 = vld [vmem:[#allocation4 + $0xe] ss:$16 sm:$0xc0] }
 0x610   : > { %1105 = vst.msk [vmem:[#allocation4 + $0x88] sm:$0xff] %vm796_vm1, %v1050_v6  ;;  %v1806_v20 = vpop.f32.mrf.mxu1  ;;  %v3734_v52 = vld [vmem:[#allocation4 + $0xf] ss:$16 sm:$0xc0] }
 0x611   : > { %1877 = vst.msk [vmem:[#allocation4 + $0x30] sm:$0xff] %vm796_vm1, %v1806_v20 }
 0x612   : > { %1209 = vrot.lane.b32.xlu1 %v1198_v21, %s3176_s13  ;;  %4348 = vst [vmem:[#allocation46_spill] sm:$0xff] %v3732_v51 }
 0x613   : > { %2871 = vmatmul.msk.bf16.gmra.mxu1 %vm947_vm2, %v3571_v47  ;;  %4349 = vst [vmem:[#allocation47_spill] sm:$0xff] %v3734_v52 }
 0x617   : > { %v1053_v23 = vpop.f32.mrf.mxu3 }
 0x618   : > { %1106 = vst.msk [vmem:[#allocation4 + $0x90] sm:$0xff] %vm796_vm1, %v1053_v23  ;;  %v1808_v5 = vpop.f32.mrf.mxu1 }
 0x619   : > { %1878 = vst.msk [vmem:[#allocation4 + $0x38] sm:$0xff] %vm796_vm1, %v1808_v5  ;;  %v1856_v5 = vpop.f32.mrf.mxu2 }
 0x61f   : > { %v1055_v26 = vpop.f32.mrf.mxu3  ;;  %v3750_v52 = vld [vmem:[#allocation4 + $0x81] ss:$16 sm:$0x3]  ;;  %v3752_v41 = vld [vmem:[#allocation4 + $0x82] ss:$16 sm:$0x3] }
 0x620   : > { %v1811_v28 = vpop.f32.mrf.mxu1  ;;  %1107 = vst.msk [vmem:[#allocation4 + $0x98] sm:$0xff] %vm796_vm1, %v1055_v26 }
 0x621   : > { %1879 = vst.msk [vmem:[#allocation4 + $0x40] sm:$0xff] %vm796_vm1, %v1811_v28  ;;  %v1858_v40 = vpop.f32.mrf.mxu2 }
 0x627   : > { %v1058_v47 = vpop.f32.mrf.mxu3  ;;  %v1405_v2 = vld [vmem:[#allocation4 + $0x8b] ss:$16 sm:$0x3]  ;;  %v1483_v22 = vld [vmem:[#allocation4 + $0x8e] ss:$16 sm:$0x3] }
 0x628   : > { %v1813_v30 = vpop.f32.mrf.mxu1  ;;  %1108 = vst.msk [vmem:[#allocation4 + $0xa0] sm:$0xff] %vm796_vm1, %v1058_v47  ;;  %v1254_v47 = vld [vmem:[#allocation4 + $0x85] ss:$16 sm:$0x3] }
 0x629   : > { %1880 = vst.msk [vmem:[#allocation4 + $0x48] sm:$0xff] %vm796_vm1, %v1813_v30  ;;  %v1281_v30 = vld [vmem:[#allocation4 + $0x86] ss:$16 sm:$0x3] }
 0x62f   : > { %v1060_v42 = vpop.f32.mrf.mxu3 }
 0x630   : > { %1109 = vst.msk [vmem:[#allocation4 + $0xa8] sm:$0xff] %vm796_vm1, %v1060_v42  ;;  %v1816_v44 = vpop.f32.mrf.mxu1  ;;  %v1308_v42 = vld [vmem:[#allocation4 + $0x87] ss:$16 sm:$0x3] }
 0x631   : > { %1881 = vst.msk [vmem:[#allocation4 + $0x50] sm:$0xff] %vm796_vm1, %v1816_v44 }
 0x637   : > { %v1063_v46 = vpop.f32.mrf.mxu3 }
 0x638   : > { %1110 = vst.msk [vmem:[#allocation4 + $0xb0] sm:$0xff] %vm796_vm1, %v1063_v46  ;;  %v1818_v49 = vpop.f32.mrf.mxu1 }
 0x639   : > { %1882 = vst.msk [vmem:[#allocation4 + $0x58] sm:$0xff] %vm796_vm1, %v1818_v49 }
 0x63f   : > { %v1065_v53 = vpop.f32.mrf.mxu3  ;;  %v1255_v23 = vld [vmem:[#allocation4 + $0x85] ss:$16 sm:$0xc]  ;;  %v1282_v26 = vld [vmem:[#allocation4 + $0x86] ss:$16 sm:$0xc] }
 0x640   : > { %v1821_v56 = vpop.f32.mrf.mxu1  ;;  %1111 = vst.msk [vmem:[#allocation4 + $0xb8] sm:$0xff] %vm796_vm1, %v1065_v53  ;;  %v1309_v28 = vld [vmem:[#allocation4 + $0x87] ss:$16 sm:$0xc]  ;;  %v1256_v44 = vor.u32 %v1255_v23, %v1254_v47  ;;  %v1283_v53 = vor.u32 %v1282_v26, %v1281_v30 }
 0x641   : > { %1883 = vst.msk [vmem:[#allocation4 + $0x60] sm:$0xff] %vm796_vm1, %v1821_v56  ;;  %v1310_v56 = vor.u32 %v1309_v28, %v1308_v42 }
 0x647   : > { %v1068_v58 = vpop.f32.mrf.mxu3  ;;  %v1354_v30 = vld [vmem:[#allocation4 + $0x89] ss:$16 sm:$0xc]  ;;  %v1458_v18 = vld [vmem:[#allocation4 + $0x8d] ss:$16 sm:$0xc] }
 0x648   : > { %v1823_v9 = vpop.f32.mrf.mxu1  ;;  %1112 = vst.msk [vmem:[#allocation4 + $0xc0] sm:$0xff] %vm796_vm1, %v1068_v58  ;;  %v3744_v58 = vld [vmem:[#allocation4 + $0x80] ss:$16 sm:$0x3] }
 0x649   : > { %1884 = vst.msk [vmem:[#allocation4 + $0x68] sm:$0xff] %vm796_vm1, %v1823_v9  ;;  %v1484_v39 = vld [vmem:[#allocation4 + $0x8e] ss:$16 sm:$0xc] }
 0x64a   : > { %v1510_v61 = vld [vmem:[#allocation4 + $0x8f] ss:$16 sm:$0xc]  ;;  %v1485_v10 = vor.u32 %v1484_v39, %v1483_v22  ;;  %v1228_v39 = vld [vmem:[#allocation4 + $0x84] ss:$16 sm:$0xc] }
 0x64f   : > { %v1070_v6 = vpop.f32.mrf.mxu3 }
 0x650   : > { %1113 = vst.msk [vmem:[#allocation4 + $0xc8] sm:$0xff] %vm796_vm1, %v1070_v6  ;;  %v1826_v8 = vpop.f32.mrf.mxu1 }
 0x651   : > { %1885 = vst.msk [vmem:[#allocation4 + $0x70] sm:$0xff] %vm796_vm1, %v1826_v8 }
 0x657   : > { %v1073_v20 = vpop.f32.mrf.mxu3 }
 0x658   : > { %1114 = vst.msk [vmem:[#allocation4 + $0xd0] sm:$0xff] %vm796_vm1, %v1073_v20  ;;  %v1828_v21 = vpop.f32.mrf.mxu1  ;;  %v3746_v20 = vld [vmem:[#allocation4 + $0x84] ss:$16 sm:$0x3] }
 0x659   : > { %1886 = vst.msk [vmem:[#allocation4 + $0x78] sm:$0xff] %vm796_vm1, %v1828_v21  ;;  %v3748_v21 = vld [vmem:[#allocation4 + $0x83] ss:$16 sm:$0x3]  ;;  %v1229_v22 = vor.u32 %v1228_v39, %v3746_v20 }
 0x65a   : > { %v1174_v39 = vld [vmem:[#allocation4 + $0x82] ss:$16 sm:$0xc] }
 0x65f   : > { %v1257_v46 = vld [vmem:[#allocation4 + $0x85] ss:$16 sm:$0x30]  ;;  %v1075_v49 = vpop.f32.mrf.mxu3  ;;  %v1284_v9 = vld [vmem:[#allocation4 + $0x86] ss:$16 sm:$0x30] }
 0x660   : > { %v1311_v6 = vld [vmem:[#allocation4 + $0x87] ss:$16 sm:$0x30]  ;;  %v1831_v8 = vpop.f32.mrf.mxu1  ;;  %v3754_v3 = vor.u32 %v1257_v46, %v1256_v44  ;;  %v3756_v23 = vld [vmem:[#allocation4 + $0x80] ss:$16 sm:$0x30]  ;;  %v3761_v28 = vor.u32 %v1284_v9, %v1283_v53 }
 0x661   : > { %1115 = vst.msk [vmem:[#allocation4 + $0xd8] sm:$0xff] %vm796_vm1, %v1075_v49  ;;  %v3759_v26 = vld [vmem:[#allocation4 + $0x84] ss:$16 sm:$0x30]  ;;  %v3763_v47 = vor.u32 %v1311_v6, %v1310_v56 }
 0x662   : > { %v3765_v42 = vld [vmem:[#allocation4 + $0x83] ss:$16 sm:$0x30]  ;;  %v3767_v27 = vld [vmem:[#allocation4 + $0x81] ss:$16 sm:$0x30] }
 0x663   : > { %v3769_v51 = vld [vmem:[#allocation4 + $0x82] ss:$16 sm:$0x30]  ;;  %1887 = vst.msk [vmem:[#allocation4 + $0x80] sm:$0xff] %vm796_vm1, %v1831_v8 }
 0x664   : > { %v1353_v44 = vld [vmem:[#allocation4 + $0x89] ss:$16 sm:$0x3]  ;;  %v1380_v46 = vld [vmem:[#allocation4 + $0x8a] ss:$16 sm:$0xc] }
 0x665   : > { %1895 = vst.msk [vmem:[#allocation4 + $0xc0] sm:$0xff] %vm796_vm1, %v1851_v4  ;;  %v1379_v49 = vld [vmem:[#allocation4 + $0x8a] ss:$16 sm:$0x3]  ;;  %v1355_v43 = vor.u32 %v1354_v30, %v1353_v44 }
 0x666   : > { %v1406_v53 = vld [vmem:[#allocation4 + $0x8b] ss:$16 sm:$0xc]  ;;  %1897 = vst.msk [vmem:[#allocation4 + $0xd0] sm:$0xff] %vm796_vm1, %v1856_v5  ;;  %v1381_v17 = vor.u32 %v1380_v46, %v1379_v49 }
 0x667   : > { %v1431_v56 = vld [vmem:[#allocation4 + $0x8c] ss:$16 sm:$0x3]  ;;  %v1457_v9 = vld [vmem:[#allocation4 + $0x8d] ss:$16 sm:$0x3]  ;;  %v1078_v24 = vpop.f32.mrf.mxu3  ;;  %v1407_v19 = vor.u32 %v1406_v53, %v1405_v2 }
 0x668   : > { %v1432_v6 = vld [vmem:[#allocation4 + $0x8c] ss:$16 sm:$0xc]  ;;  %v1509_v8 = vld [vmem:[#allocation4 + $0x8f] ss:$16 sm:$0x3]  ;;  %v1833_v16 = vpop.f32.mrf.mxu1  ;;  %v1459_v5 = vor.u32 %v1458_v18, %v1457_v9 }
 0x669   : > { %v1356_v38 = vld [vmem:[#allocation4 + $0x89] ss:$16 sm:$0x30]  ;;  %v1382_v4 = vld [vmem:[#allocation4 + $0x8a] ss:$16 sm:$0x30]  ;;  %v1433_v14 = vor.u32 %v1432_v6, %v1431_v56  ;;  %v1511_v31 = vor.u32 %v1510_v61, %v1509_v8  ;;  %v3796_v61 = vpop.f32.mrf.mxu2 }
 0x66a   : > { %v1408_v37 = vld [vmem:[#allocation4 + $0x8b] ss:$16 sm:$0x30]  ;;  %v3774_v15 = vor.u32 %v1356_v38, %v1355_v43  ;;  %v1434_v59 = vld [vmem:[#allocation4 + $0x8c] ss:$16 sm:$0x30]  ;;  %v3776_v60 = vor.u32 %v1382_v4, %v1381_v17 }
 0x66b   : > { %v1460_v32 = vld [vmem:[#allocation4 + $0x8d] ss:$16 sm:$0x30]  ;;  %v3778_v13 = vor.u32 %v1408_v37, %v1407_v19  ;;  %v1486_v30 = vld [vmem:[#allocation4 + $0x8e] ss:$16 sm:$0x30]  ;;  %v3780_v48 = vor.u32 %v1434_v59, %v1433_v14 }
 0x66c   : > { %v1512_v44 = vld [vmem:[#allocation4 + $0x8f] ss:$16 sm:$0x30]  ;;  %v3782_v46 = vor.u32 %v1460_v32, %v1459_v5  ;;  %v3784_v2 = vld [vmem:[#allocation4 + $0x88] ss:$16 sm:$0x3]  ;;  %v3787_v38 = vor.u32 %v1486_v30, %v1485_v10  ;;  %v1231_v5 = vor.u32 %v3759_v26, %v1229_v22 }
 0x66d   : > { %1116 = vst.msk [vmem:[#allocation4 + $0xe0] sm:$0xff] %vm796_vm1, %v1078_v24  ;;  %v3789_v18 = vor.u32 %v1512_v44, %v1511_v31  ;;  %v3791_v17 = vld [vmem:[#allocation4 + $0x88] ss:$16 sm:$0x30] }
 0x66e   : > { %1888 = vst.msk [vmem:[#allocation4 + $0x88] sm:$0xff] %vm796_vm1, %v1833_v16  ;;  %v1201_v10 = vld [vmem:[#allocation4 + $0x83] ss:$16 sm:$0xc] }
 0x66f   : > { %1896 = vst.msk [vmem:[#allocation4 + $0xc8] sm:$0xff] %vm796_vm1, %v3740_v11  ;;  %v1080_v14 = vpop.f32.mrf.mxu3  ;;  %v2015_v59 = vld [vmem:[#allocation4 + $0x5] ss:$16 sm:$0x3]  ;;  %v1202_v9 = vor.u32 %v1201_v10, %v3748_v21 }
 0x670   : > { %1898 = vst.msk [vmem:[#allocation4 + $0xd8] sm:$0xff] %vm796_vm1, %v1858_v40  ;;  %v1836_v32 = vpop.f32.mrf.mxu1  ;;  %v1147_v40 = vld [vmem:[#allocation4 + $0x81] ss:$16 sm:$0xc] }
 0x671   : > { %1117 = vst.msk [vmem:[#allocation4 + $0xe8] sm:$0xff] %vm796_vm1, %v1080_v14  ;;  %v3803_v37 = vpop.f32.mrf.mxu2  ;;  %v2016_v19 = vld [vmem:[#allocation4 + $0x5] ss:$16 sm:$0xc]  ;;  %v1148_v30 = vor.u32 %v1147_v40, %v3750_v52  ;;  %v1204_v21 = vor.u32 %v3765_v42, %v1202_v9 }
 0x672   : > { %1889 = vst.msk [vmem:[#allocation4 + $0x90] sm:$0xff] %vm796_vm1, %v1836_v32  ;;  %v2039_v11 = vld [vmem:[#allocation4 + $0x6] ss:$16 sm:$0x3]  ;;  %v2017_v14 = vor.u32 %v2016_v19, %v2015_v59 }
 0x673   : > { %v2040_v49 = vld [vmem:[#allocation4 + $0x6] ss:$16 sm:$0xc]  ;;  %v2018_v6 = vld [vmem:[#allocation4 + $0x5] ss:$16 sm:$0x30]  ;;  %v1150_v59 = vor.u32 %v3767_v27, %v1148_v30 }
 0x674   : > { %v1156_v24 = vpop.permute.xlu1 %1155  ;;  %v2042_v32 = vld [vmem:[#allocation4 + $0x6] ss:$16 sm:$0x30]  ;;  %v2020_v42 = vld [vmem:[#allocation4 + $0x5] ss:$16 sm:$0xc0]  ;;  %v2019_v52 = vor.u32 %v2018_v6, %v2017_v14 }
 0x675   : > { %1162 = vst.msk [vmem:[#allocation5] sm:$0xff] %vm1161_vm3, %v1156_v24  ;;  %v1129_v24 = vld [vmem:[#allocation4 + $0x80] ss:$16 sm:$0xc] }
 0x676   : > { %v2044_v10 = vld [vmem:[#allocation4 + $0x6] ss:$16 sm:$0xc0]  ;;  %v1336_v6 = vld [vmem:[#allocation4 + $0x88] ss:$16 sm:$0xc]  ;;  %v2021_v14 = vor.u32 %v2020_v42, %v2019_v52 }
 0x677   : > { %v1083_v31 = vpop.f32.mrf.mxu3  ;;  %v2108_v42 = vld [vmem:[#allocation4 + $0x9] ss:$16 sm:$0xc0]  ;;  %v2199_v52 = vld [vmem:[#allocation4 + $0xd] ss:$16 sm:$0x3] }
 0x678   : > { %1118 = vst.msk [vmem:[#allocation4 + $0xf0] sm:$0xff] %vm796_vm1, %v1083_v31  ;;  %v1838_v16 = vpop.f32.mrf.mxu1 }
 0x679   : > { %1890 = vst.msk [vmem:[#allocation4 + $0x98] sm:$0xff] %vm796_vm1, %v1838_v16  ;;  %v2041_v16 = vor.u32 %v2040_v49, %v2039_v11  ;;  %v1866_v19 = vpop.f32.mrf.mxu2  ;;  %v2103_v11 = vld [vmem:[#allocation4 + $0x9] ss:$16 sm:$0x3] }
 0x67a   : > { %v2104_v49 = vld [vmem:[#allocation4 + $0x9] ss:$16 sm:$0xc] }
 0x67b   : > { %v2043_v27 = vor.u32 %v2042_v32, %v2041_v16 }
 0x67c   : > { %v1183_v43 = vpop.permute.xlu1 %1182 }
 0x67d   : > { %1189 = vst.msk [vmem:[#allocation5] sm:$0xff] %vm1188_vm4, %v1183_v43  ;;  %v2045_v16 = vor.u32 %v2044_v10, %v2043_v27  ;;  %v2176_v10 = vld [vmem:[#allocation4 + $0xc] ss:$16 sm:$0xc] }
 0x67f   : > { %v3807_v53 = vld [vmem:[#allocation4 + $0x85] ss:$16 sm:$0xc0]  ;;  %v1085_v56 = vpop.f32.mrf.mxu3  ;;  %v3810_v8 = vld [vmem:[#allocation4 + $0x86] ss:$16 sm:$0xc0] }
 0x680   : > { %v3812_v4 = vld [vmem:[#allocation4 + $0x87] ss:$16 sm:$0xc0]  ;;  %v1841_v44 = vpop.f32.mrf.mxu1  ;;  %v1232_v31 = vld [vmem:[#allocation4 + $0x84] ss:$16 sm:$0xc0] }
 0x681   : > { %1119 = vst.msk [vmem:[#allocation4 + $0xf8] sm:$0xff] %vm796_vm1, %v1085_v56  ;;  %v1233_v26 = vor.u32 %v1232_v31, %v1231_v5  ;;  %v1205_v40 = vld [vmem:[#allocation4 + $0x83] ss:$16 sm:$0xc0] }
 0x682   : > { %v3826_v22 = vld [vmem:[#allocation4 + $0x80] ss:$16 sm:$0xc0]  ;;  %v1206_v43 = vor.u32 %v1205_v40, %v1204_v21  ;;  %v1151_v20 = vld [vmem:[#allocation4 + $0x81] ss:$16 sm:$0xc0]  ;;  %v2105_v21 = vor.u32 %v2104_v49, %v2103_v11 }
 0x683   : > { %1238 = vrot.lane.b32.xlu0 %v1233_v26, %s3177_s15  ;;  %v1152_v9 = vor.u32 %v1151_v20, %v1150_v59  ;;  %v1178_v56 = vld [vmem:[#allocation4 + $0x82] ss:$16 sm:$0xc0]  ;;  %1891 = vst.msk [vmem:[#allocation4 + $0xa0] sm:$0xff] %vm796_vm1, %v1841_v44  ;;  %v1175_v20 = vor.u32 %v1174_v39, %v3752_v41  ;;  %v1130_v59 = vor.u32 %v1129_v24, %v3744_v58 }
 0x684   : > { %1211 = vrot.lane.b32.xlu2 %v1206_v43, %s3176_s13  ;;  %1899 = vst.msk [vmem:[#allocation4 + $0xe0] sm:$0xff] %vm796_vm1, %v3796_v61  ;;  %v2127_v5 = vld [vmem:[#allocation4 + $0xa] ss:$16 sm:$0x3]  ;;  %v1210_v30 = vpop.permute.xlu1 %1209 }
 0x685   : > { %1157 = vrot.lane.b32.xlu1 %v1152_v9, %s3174_s22  ;;  %v2128_v31 = vld [vmem:[#allocation4 + $0xa] ss:$16 sm:$0xc]  ;;  %1901 = vst.msk [vmem:[#allocation4 + $0xf0] sm:$0xff] %vm796_vm1, %v1866_v19  ;;  %v1177_v19 = vor.u32 %v3769_v51, %v1175_v20  ;;  %v1132_v49 = vor.u32 %v3756_v23, %v1130_v59  ;;  %v1337_v51 = vor.u32 %v1336_v6, %v3784_v2  ;;  %v1868_v23 = vpop.f32.mrf.mxu2 }
 0x686   : > { %1216 = vst.msk [vmem:[#allocation5] sm:$0xff] %vm1215_vm5, %v1210_v30  ;;  %v2106_v26 = vld [vmem:[#allocation4 + $0x9] ss:$16 sm:$0x30]  ;;  %v2129_v61 = vor.u32 %v2128_v31, %v2127_v5 }
 0x687   : > { %v2130_v40 = vld [vmem:[#allocation4 + $0xa] ss:$16 sm:$0x30]  ;;  %v2175_v11 = vld [vmem:[#allocation4 + $0xc] ss:$16 sm:$0x3]  ;;  %v1179_v30 = vor.u32 %v1178_v56, %v1177_v19  ;;  %v2107_v31 = vor.u32 %v2106_v26, %v2105_v21  ;;  %v1339_v21 = vor.u32 %v3791_v17, %v1337_v51  ;;  %v1134_v26 = vor.u32 %v3826_v22, %v1132_v49 }
 0x688   : > { %v1843_v44 = vpop.f32.mrf.mxu1  ;;  %v3837_v32 = vld [vmem:[#allocation4 + $0x89] ss:$16 sm:$0xc0]  ;;  %v3840_v43 = vld [vmem:[#allocation4 + $0x8a] ss:$16 sm:$0xc0]  ;;  %v2131_v2 = vor.u32 %v2130_v40, %v2129_v61  ;;  %v2177_v40 = vor.u32 %v2176_v10, %v2175_v11  ;;  %v1248_v10 = vor.u32 %v3643_v34, %v3601_v63 }
 0x689   : > { %v3842_v9 = vld [vmem:[#allocation4 + $0x8b] ss:$16 sm:$0xc0]  ;;  %v3847_v41 = vld [vmem:[#allocation4 + $0x8c] ss:$16 sm:$0xc0] }
 0x68a   : > { %v3849_v39 = vld [vmem:[#allocation4 + $0x8d] ss:$16 sm:$0xc0]  ;;  %v3857_v27 = vld [vmem:[#allocation4 + $0x8e] ss:$16 sm:$0xc0]  ;;  %v1437_v59 = vor.u32 %v3847_v41, %v3780_v48 }
 0x68b   : > { %v3859_v5 = vld [vmem:[#allocation4 + $0x8f] ss:$16 sm:$0xc0]  ;;  %2031 = vrot.lane.b32.xlu0 %v2021_v14, %s3178_s24  ;;  %v2132_v20 = vld [vmem:[#allocation4 + $0xa] ss:$16 sm:$0xc0] }
 0x68c   : > { %v1340_v58 = vld [vmem:[#allocation4 + $0x88] ss:$16 sm:$0xc0]  ;;  %2055 = vrot.lane.b32.xlu2 %v2045_v16, %s3179_s26  ;;  %1892 = vst.msk [vmem:[#allocation4 + $0xa8] sm:$0xff] %vm796_vm1, %v1843_v44  ;;  %v2109_v44 = vor.u32 %v2108_v42, %v2107_v31  ;;  %v1221_v16 = vor.u32 %v3641_v33, %v3599_v62  ;;  %v2133_v6 = vor.u32 %v2132_v20, %v2131_v2 }
 0x68d   : > { %1184 = vrot.lane.b32.xlu1 %v1179_v30, %s3175_s16  ;;  %1900 = vst.msk [vmem:[#allocation4 + $0xe8] sm:$0xff] %vm796_vm1, %v3803_v37  ;;  %v2200_v14 = vld [vmem:[#allocation4 + $0xd] ss:$16 sm:$0xc]  ;;  %v1341_v19 = vor.u32 %v1340_v58, %v1339_v21 }
 0x68e   : > { %1902 = vst.msk [vmem:[#allocation4 + $0xf8] sm:$0xff] %vm796_vm1, %v1868_v23  ;;  %v2178_v30 = vld [vmem:[#allocation4 + $0xc] ss:$16 sm:$0x30]  ;;  %v2201_v56 = vor.u32 %v2200_v14, %v2199_v52  ;;  %v1223_v37 = vor.u32 %v3682_v25, %v1221_v16  ;;  %v1275_v16 = vor.u32 %v3645_v35, %v3603_v0 }
 0x68f   : > { %v2202_v24 = vld [vmem:[#allocation4 + $0xd] ss:$16 sm:$0x30]  ;;  %1136 = vst.msk [vmem:[#allocation5 + $0x20] sm:$0xff] %vm796_vm1, %v1134_v26  ;;  %v2179_v22 = vor.u32 %v2178_v30, %v2177_v40 }
 0x690   : > { %v1846_v61 = vpop.f32.mrf.mxu1  ;;  %v1225_v17 = vor.u32 %v3712_v50, %v1223_v37  ;;  %1343 = vst.msk [vmem:[#allocation5 + $0x28] sm:$0xff] %vm796_vm1, %v1341_v19  ;;  %v2180_v62 = vld [vmem:[#allocation4 + $0xc] ss:$16 sm:$0xc0]  ;;  %v2203_v33 = vor.u32 %v2202_v24, %v2201_v56  ;;  %v1250_v24 = vor.u32 %v3684_v45, %v1248_v10  ;;  %v1277_v37 = vor.u32 %v3686_v7, %v1275_v16 }
 0x691   : > { %1893 = vst.msk [vmem:[#allocation4 + $0xb0] sm:$0xff] %vm796_vm1, %v1846_v61  ;;  %v2204_v42 = vld [vmem:[#allocation4 + $0xd] ss:$16 sm:$0xc0]  ;;  %v2181_v25 = vor.u32 %v2180_v62, %v2179_v22  ;;  %v1302_v7 = vor.u32 %v3647_v36, %v3605_v1 }
 0x692   : > { %v2046_v52 = vld [vmem:[#allocation4 + $0x86] ss:$16 sm:$0x3]  ;;  %v1974_v11 = vld [vmem:[#allocation4 + $0x83] ss:$16 sm:$0x3]  ;;  %v2205_v50 = vor.u32 %v2204_v42, %v2203_v33  ;;  %v1252_v56 = vor.u32 %v3714_v54, %v1250_v24  ;;  %v1279_v22 = vor.u32 %v3716_v55, %v1277_v37 }
 0x693   : > { %2119 = vrot.lane.b32.xlu0 %v2109_v44, %s3174_s22  ;;  %v2049_v20 = vld [vmem:[#allocation4 + $0x86] ss:$16 sm:$0x30]  ;;  %v1977_v2 = vld [vmem:[#allocation4 + $0x83] ss:$16 sm:$0x30] }
 0x694   : > { %2143 = vrot.lane.b32.xlu2 %v2133_v6, %s3175_s16  ;;  %v1998_v14 = vld [vmem:[#allocation4 + $0x84] ss:$16 sm:$0x3]  ;;  %v2051_v63 = vld [vmem:[#allocation4 + $0x86] ss:$16 sm:$0xc0] }
 0x695   : > { %1236 = vrot.lane.b32.xlu1 %v1225_v17, %s3177_s15  ;;  %v2134_v21 = vld [vmem:[#allocation4 + $0x8a] ss:$16 sm:$0x3]  ;;  %v1979_v26 = vld [vmem:[#allocation4 + $0x83] ss:$16 sm:$0xc0] }
 0x696   : > { %v2137_v54 = vld [vmem:[#allocation4 + $0x8a] ss:$16 sm:$0x30]  ;;  %v2001_v17 = vld [vmem:[#allocation4 + $0x84] ss:$16 sm:$0x30] }
 0x697   : > { %v2003_v62 = vld [vmem:[#allocation4 + $0x84] ss:$16 sm:$0xc0]  ;;  %v2206_v42 = vld [vmem:[#allocation4 + $0x8d] ss:$16 sm:$0x3] }
 0x698   : > { %v1848_v49 = vpop.f32.mrf.mxu1  ;;  %v2047_v58 = vld [vmem:[#allocation4 + $0x86] ss:$16 sm:$0xc]  ;;  %v1975_v51 = vld [vmem:[#allocation4 + $0x83] ss:$16 sm:$0xc] }
 0x699   : > { %1894 = vst.msk [vmem:[#allocation4 + $0xb8] sm:$0xff] %vm796_vm1, %v1848_v49  ;;  %v2048_v31 = vor.u32 %v2047_v58, %v2046_v52  ;;  %v1976_v23 = vor.u32 %v1975_v51, %v1974_v11  ;;  %v1999_v44 = vld [vmem:[#allocation4 + $0x84] ss:$16 sm:$0xc]  ;;  %v4351_v37 = vld [vmem:[#allocation34_spill] sm:$0xff] }
 0x69a   : > { %v2000_v19 = vor.u32 %v1999_v44, %v1998_v14  ;;  %v2139_v0 = vld [vmem:[#allocation4 + $0x8a] ss:$16 sm:$0xc0]  ;;  %v2070_v11 = vld [vmem:[#allocation4 + $0x87] ss:$16 sm:$0x3] }
 0x69b   : > { %2191 = vrot.lane.b32.xlu0 %v2181_v25, %s3177_s15  ;;  %v2050_v6 = vor.u32 %v2049_v20, %v2048_v31  ;;  %v1978_v34 = vor.u32 %v1977_v2, %v1976_v23  ;;  %v2071_v25 = vld [vmem:[#allocation4 + $0x87] ss:$16 sm:$0xc]  ;;  %v2209_v51 = vld [vmem:[#allocation4 + $0x8d] ss:$16 sm:$0x30] }
 0x69c   : > { %2215 = vrot.lane.b32.xlu2 %v2205_v50, %s3178_s24  ;;  %v2002_v52 = vor.u32 %v2001_v17, %v2000_v19  ;;  %v2072_v58 = vor.u32 %v2071_v25, %v2070_v11  ;;  %v1304_v50 = vor.u32 %v3688_v29, %v1302_v7  ;;  %v2073_v31 = vld [vmem:[#allocation4 + $0x87] ss:$16 sm:$0x30]  ;;  %v2211_v20 = vld [vmem:[#allocation4 + $0x8d] ss:$16 sm:$0xc0] }
 0x69d   : > { %1263 = vrot.lane.b32.xlu1 %v1252_v56, %s3178_s24  ;;  %v2052_v45 = vor.u32 %v2051_v63, %v2050_v6  ;;  %v1980_v40 = vor.u32 %v1979_v26, %v1978_v34  ;;  %v2075_v24 = vld [vmem:[#allocation4 + $0x87] ss:$16 sm:$0xc0]  ;;  %v2158_v56 = vld [vmem:[#allocation4 + $0x8b] ss:$16 sm:$0x3] }
 0x69e   : > { %v2004_v55 = vor.u32 %v2003_v62, %v2002_v52  ;;  %v1306_v23 = vor.u32 %v3718_v57, %v1304_v50  ;;  %v2087_v6 = vld [vmem:[#allocation4 + $0x8] ss:$16 sm:$0x3]  ;;  %v2074_v1 = vor.u32 %v2073_v31, %v2072_v58  ;;  %v2247_v36 = vld [vmem:[#allocation4 + $0xf] ss:$16 sm:$0x3] }
 0x69f   : > { %v2088_v14 = vld [vmem:[#allocation4 + $0x8] ss:$16 sm:$0xc]  ;;  %v2248_v63 = vld [vmem:[#allocation4 + $0xf] ss:$16 sm:$0xc] }
 0x6a0   : > { %v2135_v61 = vld [vmem:[#allocation4 + $0x8a] ss:$16 sm:$0xc]  ;;  %v2207_v35 = vld [vmem:[#allocation4 + $0x8d] ss:$16 sm:$0xc]  ;;  %v2089_v34 = vor.u32 %v2088_v14, %v2087_v6 }
 0x6a1   : > { %v2136_v30 = vor.u32 %v2135_v61, %v2134_v21  ;;  %v2208_v49 = vor.u32 %v2207_v35, %v2206_v42  ;;  %v2159_v29 = vld [vmem:[#allocation4 + $0x8b] ss:$16 sm:$0xc]  ;;  %v2090_v21 = vld [vmem:[#allocation4 + $0x8] ss:$16 sm:$0x30] }
 0x6a2   : > { %v2091_v26 = vor.u32 %v2090_v21, %v2089_v34  ;;  %v4350_v57 = vld [vmem:[#allocation27_spill] sm:$0xff]  ;;  %v2092_v61 = vld [vmem:[#allocation4 + $0x8] ss:$16 sm:$0xc0]  ;;  %v2160_v19 = vor.u32 %v2159_v29, %v2158_v56  ;;  %v4352_v62 = vld [vmem:[#allocation41_spill] sm:$0xff] }
 0x6a3   : > { %2057 = vrot.lane.b32.xlu0 %v2052_v45, %s3179_s26  ;;  %v2138_v33 = vor.u32 %v2137_v54, %v2136_v30  ;;  %v2210_v2 = vor.u32 %v2209_v51, %v2208_v49  ;;  %v1347_v44 = vor.u32 %v4350_v57, %v3617_v12  ;;  %v2249_v45 = vor.u32 %v2248_v63, %v2247_v36  ;;  %v2250_v30 = vld [vmem:[#allocation4 + $0xf] ss:$16 sm:$0x30]  ;;  %v2163_v52 = vld [vmem:[#allocation4 + $0x8b] ss:$16 sm:$0xc0] }
 0x6a4   : > { %1985 = vrot.lane.b32.xlu2 %v1980_v40, %s3176_s13  ;;  %v2076_v40 = vor.u32 %v2075_v24, %v2074_v1  ;;  %v2093_v54 = vor.u32 %v2092_v61, %v2091_v26  ;;  %v2230_v35 = vld [vmem:[#allocation4 + $0x8e] ss:$16 sm:$0x3]  ;;  %v4353_v25 = vld [vmem:[#allocation21_spill] sm:$0xff]  ;;  %v4355_v51 = vld [vmem:[#allocation35_spill] sm:$0xff] }
 0x6a5   : > { %1290 = vrot.lane.b32.xlu1 %v1279_v22, %s3179_s26  ;;  %v2140_v10 = vor.u32 %v2139_v0, %v2138_v33  ;;  %v2212_v16 = vor.u32 %v2211_v20, %v2210_v2  ;;  %v1349_v17 = vor.u32 %v4351_v37, %v1347_v44  ;;  %v2161_v22 = vld [vmem:[#allocation4 + $0x8b] ss:$16 sm:$0x30]  ;;  %v2251_v42 = vor.u32 %v2250_v30, %v2249_v45  ;;  %v2252_v0 = vld [vmem:[#allocation4 + $0xf] ss:$16 sm:$0xc0] }
 0x6a6   : > { %2101 = vst.msk [vmem:[#allocation5 + $0x18] sm:$0xff] %vm796_vm1, %v2093_v54  ;;  %v2162_v12 = vor.u32 %v2161_v22, %v2160_v19  ;;  %v2231_v11 = vld [vmem:[#allocation4 + $0x8e] ss:$16 sm:$0xc]  ;;  %v4358_v6 = vld [vmem:[#allocation29_spill] sm:$0xff]  ;;  %v4360_v29 = vld [vmem:[#allocation43_spill] sm:$0xff] }
 0x6a7   : > { %v1351_v33 = vor.u32 %v4352_v62, %v1349_v17  ;;  %v4354_v7 = vld [vmem:[#allocation28_spill] sm:$0xff]  ;;  %v2253_v49 = vor.u32 %v2252_v0, %v2251_v42  ;;  %v2232_v58 = vor.u32 %v2231_v11, %v2230_v35  ;;  %v4356_v20 = vld [vmem:[#allocation42_spill] sm:$0xff]  ;;  %v4361_v26 = vld [vmem:[#allocation23_spill] sm:$0xff] }
 0x6a8   : > { %v2233_v31 = vld [vmem:[#allocation4 + $0x8e] ss:$16 sm:$0x30]  ;;  %v2295_v45 = vld [vmem:[%s4301_s9 + $0x20] sm:$0xff] }
 0x6a9   : > { %v2234_v24 = vor.u32 %v2233_v31, %v2232_v58  ;;  %v2235_v2 = vld [vmem:[#allocation4 + $0x8e] ss:$16 sm:$0xc0]  ;;  %v4363_v61 = vld [vmem:[#allocation37_spill] sm:$0xff] }
 0x6aa   : > { %v4357_v56 = vld [vmem:[#allocation22_spill] sm:$0xff]  ;;  %v4359_v63 = vld [vmem:[#allocation36_spill] sm:$0xff]  ;;  %v1903_v19 = vld [vmem:[#allocation4] ss:$16 sm:$0x3] }
 0x6ab   : > { %2145 = vrot.lane.b32.xlu0 %v2140_v10, %s3175_s16  ;;  %v1373_v10 = vor.u32 %v4354_v7, %v4353_v25  ;;  %v1399_v14 = vor.u32 %v4358_v6, %v4357_v56  ;;  %v2236_v1 = vor.u32 %v2235_v2, %v2234_v24  ;;  %v2292_v36 = vld [vmem:[%s4301_s9 + $0x8] sm:$0xff]  ;;  %v1904_v30 = vld [vmem:[#allocation4] ss:$16 sm:$0xc]  ;;  %v4364_v22 = vld [vmem:[#allocation44_spill] sm:$0xff] }
 0x6ac   : > { %2009 = vrot.lane.b32.xlu2 %v2004_v55, %s3177_s15  ;;  %v2164_v55 = vor.u32 %v2163_v52, %v2162_v12  ;;  %v4362_v57 = vld [vmem:[#allocation30_spill] sm:$0xff]  ;;  %v1905_v54 = vor.u32 %v1904_v30, %v1903_v19  ;;  %v1906_v37 = vld [vmem:[#allocation4] ss:$16 sm:$0x30]  ;;  %v4365_v58 = vld [vmem:[#allocation24_spill] sm:$0xff] }
 0x6ad   : > { %1317 = vrot.lane.b32.xlu1 %v1306_v23, %s3180_s27  ;;  %v1375_v50 = vor.u32 %v4355_v51, %v1373_v10  ;;  %v1401_v34 = vor.u32 %v4359_v63, %v1399_v14  ;;  %v1425_v44 = vor.u32 %v4362_v57, %v4361_v26  ;;  %v1908_v17 = vld [vmem:[#allocation4] ss:$16 sm:$0xc0]  ;;  %v2094_v11 = vld [vmem:[#allocation4 + $0x88] ss:$16 sm:$0x3] }
 0x6ae   : > { %v1911_v42 = vld [vmem:[#allocation4 + $0x80] ss:$16 sm:$0xc]  ;;  %v1907_v12 = vor.u32 %v1906_v37, %v1905_v54  ;;  %v2095_v25 = vld [vmem:[#allocation4 + $0x88] ss:$16 sm:$0xc] }
 0x6af   : > { %v1377_v23 = vor.u32 %v4356_v20, %v1375_v50  ;;  %v1403_v21 = vor.u32 %v4360_v29, %v1401_v34  ;;  %v1913_v0 = vld [vmem:[#allocation4 + $0x80] ss:$16 sm:$0x30]  ;;  %v2099_v31 = vld [vmem:[#allocation4 + $0x88] ss:$16 sm:$0xc0] }
 0x6b0   : > { %v1915_v35 = vld [vmem:[#allocation4 + $0x80] ss:$16 sm:$0xc0]  ;;  %v1909_v7 = vor.u32 %v1908_v17, %v1907_v12  ;;  %v2298_v20 = vld [vmem:[%s4301_s9 + $0x38] sm:$0xff]  ;;  %v4367_v2 = vld [vmem:[#allocation38_spill] sm:$0xff]  ;;  %v4377_v17 = vor.u32 %v3807_v53, %v3754_v3 }
 0x6b1   : > { %v4366_v51 = vld [vmem:[#allocation31_spill] sm:$0xff]  ;;  %v2294_v6 = vld [vmem:[%s4301_s9 + $0x18] sm:$0xff]  ;;  %v4369_v63 = vld [vmem:[#allocation25_spill] sm:$0xff] }
 0x6b2   : > { %v1451_v50 = vor.u32 %v4366_v51, %v4365_v58  ;;  %1917 = vst.msk [vmem:[#allocation5 + $0x10] sm:$0xff] %vm796_vm1, %v1909_v7  ;;  %v4370_v34 = vld [vmem:[#allocation32_spill] sm:$0xff]  ;;  %v2297_v57 = vld [vmem:[%s4301_s9 + $0x30] sm:$0xff] }
 0x6b3   : > { %2217 = vrot.lane.b32.xlu0 %v2212_v16, %s3178_s24  ;;  %v2291_v16 = vld [vmem:[%s4301_s9] sm:$0xff]  ;;  %v1477_v29 = vor.u32 %v4370_v34, %v4369_v63  ;;  %v4375_v19 = vld [vmem:[#allocation40_spill] sm:$0xff]  ;;  %v4376_v54 = vld [vmem:[#allocation47_spill] sm:$0xff] }
 0x6b4   : > { %2081 = vrot.lane.b32.xlu2 %v2076_v40, %s3180_s27  ;;  %v1427_v40 = vor.u32 %v4363_v61, %v1425_v44  ;;  %v1453_v56 = vor.u32 %v4367_v2, %v1451_v50  ;;  %v4372_v44 = vld [vmem:[#allocation46_spill] sm:$0xff]  ;;  %v4374_v61 = vld [vmem:[#allocation33_spill] sm:$0xff] }
 0x6b5   : > { %1362 = vrot.lane.b32.xlu1 %v1351_v33, %s3174_s22  ;;  %v1910_v33 = vld [vmem:[#allocation4 + $0x80] ss:$16 sm:$0x3]  ;;  %v1919_v48 = vld [vmem:[#allocation4 + $0x1] ss:$16 sm:$0x3] }
 0x6b6   : > { %v1429_v62 = vor.u32 %v4364_v22, %v1427_v40  ;;  %v1912_v52 = vor.u32 %v1911_v42, %v1910_v33  ;;  %v1920_v41 = vld [vmem:[#allocation4 + $0x1] ss:$16 sm:$0xc]  ;;  %v1946_v58 = vld [vmem:[#allocation4 + $0x2] ss:$16 sm:$0x30] }
 0x6b7   : > { %v1994_v34 = vld [vmem:[#allocation4 + $0x4] ss:$16 sm:$0x30] }
 0x6b8   : > { %v1914_v10 = vor.u32 %v1913_v0, %v1912_v52  ;;  %v4379_v52 = vor.u32 %v3812_v4, %v3763_v47  ;;  %v4381_v4 = vor.u32 %v3840_v43, %v3776_v60  ;;  %v4383_v43 = vor.u32 %v3849_v39, %v3782_v46 }
 0x6b9   : > { %v4385_v46 = vor.u32 %v3859_v5, %v3789_v18  ;;  %v1968_v18 = vld [vmem:[#allocation4 + $0x3] ss:$16 sm:$0xc] }
 0x6bb   : > { %2263 = vrot.lane.b32.xlu0 %v2253_v49, %s3180_s27  ;;  %v2096_v49 = vor.u32 %v2095_v25, %v2094_v11  ;;  %v1922_v25 = vld [vmem:[#allocation4 + $0x1] ss:$16 sm:$0x30] }
 0x6bc   : > { %2169 = vrot.lane.b32.xlu2 %v2164_v55, %s3176_s13  ;;  %v2097_v55 = vld [vmem:[#allocation4 + $0x88] ss:$16 sm:$0x30] }
 0x6bd   : > { %1388 = vrot.lane.b32.xlu1 %v1377_v23, %s3175_s16  ;;  %v1916_v23 = vor.u32 %v1915_v35, %v1914_v10  ;;  %v2098_v24 = vor.u32 %v2097_v55, %v2096_v49  ;;  %v1924_v10 = vld [vmem:[#allocation4 + $0x1] ss:$16 sm:$0xc0]  ;;  %v1943_v49 = vld [vmem:[#allocation4 + $0x2] ss:$16 sm:$0x3] }
 0x6bf   : > { %1918 = vst.msk [vmem:[#allocation5 + $0x30] sm:$0xff] %vm796_vm1, %v1916_v23  ;;  %v2100_v14 = vor.u32 %v2099_v31, %v2098_v24  ;;  %v1948_v31 = vld [vmem:[#allocation4 + $0x2] ss:$16 sm:$0xc0] }
 0x6c0   : > { %v1970_v24 = vld [vmem:[#allocation4 + $0x3] ss:$16 sm:$0x30] }
 0x6c1   : > { %2102 = vst.msk [vmem:[#allocation5 + $0x38] sm:$0xff] %vm796_vm1, %v2100_v14  ;;  %v1991_v14 = vld [vmem:[#allocation4 + $0x4] ss:$16 sm:$0x3] }
 0x6c3   : > { %2306 = vperm.xlu0 %3029, %v2292_v36  }
 0x6c4   : > { %2241 = vrot.lane.b32.xlu2 %v2236_v1, %s3179_s26  ;;  %v4368_v1 = vld [vmem:[#allocation45_spill] sm:$0xff] }
 0x6c5   : > { %1414 = vrot.lane.b32.xlu1 %v1403_v21, %s3176_s13  ;;  %v1455_v36 = vor.u32 %v4368_v1, %v1453_v56  ;;  %v4371_v21 = vld [vmem:[#allocation39_spill] sm:$0xff] }
 0x6c6   : > { %v1479_v26 = vor.u32 %v4371_v21, %v1477_v29  ;;  %v1992_v1 = vld [vmem:[#allocation4 + $0x4] ss:$16 sm:$0xc] }
 0x6c7   : > { %v1993_v63 = vor.u32 %v1992_v1, %v1991_v14 }
 0x6c9   : > { %v1995_v21 = vor.u32 %v1994_v34, %v1993_v63 }
 0x6cb   : > { %2321 = vperm.xlu0 %3029, %v2295_v45   ;;  %v4373_v45 = vld [vmem:[#allocation26_spill] sm:$0xff] }
 0x6cc   : > { %2301 = vperm.xlu2 %3031, %v2291_v16   ;;  %v1481_v16 = vor.u32 %v4372_v44, %v1479_v26  ;;  %v1503_v40 = vor.u32 %v4374_v61, %v4373_v45  ;;  %v1996_v26 = vld [vmem:[#allocation4 + $0x4] ss:$16 sm:$0xc0]  ;;  %v2064_v44 = vld [vmem:[#allocation4 + $0x7] ss:$16 sm:$0xc] }
 0x6cd   : > { %1440 = vrot.lane.b32.xlu1 %v1429_v62, %s3177_s15  ;;  %v4378_v62 = vor.u32 %v3810_v8, %v3761_v28  ;;  %v4380_v28 = vor.u32 %v3837_v32, %v3774_v15  ;;  %v4382_v15 = vor.u32 %v3842_v9, %v3778_v13  ;;  %v4384_v9 = vor.u32 %v3857_v27, %v3787_v38  ;;  %v1944_v38 = vld [vmem:[#allocation4 + $0x2] ss:$16 sm:$0xc]  ;;  %v2066_v61 = vld [vmem:[#allocation4 + $0x7] ss:$16 sm:$0x30] }
 0x6ce   : > { %v1505_v30 = vor.u32 %v4375_v19, %v1503_v40  ;;  %v1945_v55 = vor.u32 %v1944_v38, %v1943_v49 }
 0x6d0   : > { %v1507_v37 = vor.u32 %v4376_v54, %v1505_v30  ;;  %v1947_v50 = vor.u32 %v1946_v58, %v1945_v55  ;;  %v2068_v30 = vld [vmem:[#allocation4 + $0x7] ss:$16 sm:$0xc0]  ;;  %v2151_v54 = vld [vmem:[#allocation4 + $0xb] ss:$16 sm:$0x3] }
 0x6d1   : > { %v2022_v58 = vld [vmem:[#allocation4 + $0x85] ss:$16 sm:$0x3] }
 0x6d2   : > { %v1949_v5 = vor.u32 %v1948_v31, %v1947_v50  ;;  %v2023_v50 = vld [vmem:[#allocation4 + $0x85] ss:$16 sm:$0xc] }
 0x6d3   : > { %2336 = vperm.xlu0 %3029, %v2298_v20   ;;  %v1967_v20 = vld [vmem:[#allocation4 + $0x3] ss:$16 sm:$0x3] }
 0x6d4   : > { %2316 = vperm.xlu2 %3031, %v2294_v6   ;;  %v1969_v23 = vor.u32 %v1968_v18, %v1967_v20  ;;  %v1972_v6 = vld [vmem:[#allocation4 + $0x3] ss:$16 sm:$0xc0]  ;;  %v2024_v18 = vor.u32 %v2023_v50, %v2022_v58 }
 0x6d5   : > { %1466 = vrot.lane.b32.xlu1 %v1455_v36, %s3178_s24  ;;  %v4048_v31 = vld [vmem:[%s4300_s8] sm:$0xff] }
 0x6d6   : > { %v1971_v56 = vor.u32 %v1970_v24, %v1969_v23  ;;  %v4120_v50 = vld [vmem:[%s3339_s21] sm:$0xff] }
 0x6d8   : > { %v1973_v36 = vor.u32 %v1972_v6, %v1971_v56  ;;  %v2110_v56 = vld [vmem:[#allocation4 + $0x89] ss:$16 sm:$0x3] }
 0x6d9   : > { %v2111_v6 = vld [vmem:[#allocation4 + $0x89] ss:$16 sm:$0xc] }
 0x6da   : > { %v2112_v1 = vor.u32 %v2111_v6, %v2110_v56 }
 0x6dc   : > { %2331 = vperm.xlu2 %3031, %v2297_v57   ;;  %v2063_v57 = vld [vmem:[#allocation4 + $0x7] ss:$16 sm:$0x3] }
 0x6dd   : > { %1492 = vrot.lane.b32.xlu1 %v1481_v16, %s3179_s26  ;;  %v1997_v16 = vor.u32 %v1996_v26, %v1995_v21  ;;  %v2065_v45 = vor.u32 %v2064_v44, %v2063_v57  ;;  %v2182_v21 = vld [vmem:[#allocation4 + $0x8c] ss:$16 sm:$0x3] }
 0x6de   : > { %v1212_v22 = vpop.permute.xlu2 %1211  ;;  %v2183_v26 = vld [vmem:[#allocation4 + $0x8c] ss:$16 sm:$0xc] }
 0x6df   : > { %v2067_v19 = vor.u32 %v2066_v61, %v2065_v45  ;;  %v4059_v57 = vld [vmem:[%s4300_s8 + $0x8] sm:$0xff] }
 0x6e0   : > { %v2185_v45 = vld [vmem:[#allocation4 + $0x8c] ss:$16 sm:$0x30] }
 0x6e5   : > { %1518 = vrot.lane.b32.xlu1 %v1507_v37, %s3180_s27  ;;  %v2152_v37 = vld [vmem:[#allocation4 + $0xb] ss:$16 sm:$0xc] }
 0x6e6   : > { %v3981_v12 = vpop.permute.xlu2 %2055 }
 0x6ed   : > { %1265 = vrot.lane.b32.xlu1 %v4377_v17, %s3178_s24  ;;  %v2069_v17 = vor.u32 %v2068_v30, %v2067_v19  ;;  %v2187_v19 = vld [vmem:[#allocation4 + $0x8c] ss:$16 sm:$0xc0]  ;;  %v2254_v30 = vld [vmem:[#allocation4 + $0x8f] ss:$16 sm:$0x3] }
 0x6ee   : > { %v2144_v8 = vpop.permute.xlu2 %2143 }
 0x6f5   : > { %1292 = vrot.lane.b32.xlu1 %v4378_v62, %s3179_s26  ;;  %v1239_v33 = vpop.permute.xlu0 %1238  ;;  %v2154_v62 = vld [vmem:[#allocation4 + $0xb] ss:$16 sm:$0x30] }
 0x6f7   : > { %v1158_v42 = vpop.permute.xlu1 %1157 }
 0x6f8   : > { %1163 = vst.msk [vmem:[#allocation5 + $0x20] sm:$0xff] %vm1161_vm3, %v1158_v42 }
 0x6fd   : > { %1319 = vrot.lane.b32.xlu1 %v4379_v52, %s3180_s27  ;;  %v3987_v0 = vpop.permute.xlu0 %2031  ;;  %v2156_v52 = vld [vmem:[#allocation4 + $0xb] ss:$16 sm:$0xc0] }
 0x6ff   : > { %v1185_v3 = vpop.permute.xlu1 %1184 }
 0x700   : > { %1190 = vst.msk [vmem:[#allocation5 + $0x20] sm:$0xff] %vm1188_vm4, %v1185_v3  ;;  %v2223_v3 = vld [vmem:[#allocation4 + $0xe] ss:$16 sm:$0x3] }
 0x701   : > { %1217 = vst.msk [vmem:[#allocation5 + $0x20] sm:$0xff] %vm1215_vm5, %v1212_v22  ;;  %v2153_v22 = vor.u32 %v2152_v37, %v2151_v54  ;;  %v2255_v54 = vld [vmem:[#allocation4 + $0x8f] ss:$16 sm:$0xc] }
 0x702   : > { %1244 = vst.msk [vmem:[#allocation5 + $0x20] sm:$0xff] %vm1242_vm6, %v1239_v33 }
 0x703   : > { %v2155_v42 = vor.u32 %v2154_v62, %v2153_v22  ;;  %v2257_v22 = vld [vmem:[#allocation4 + $0x8f] ss:$16 sm:$0x30] }
 0x705   : > { %1364 = vrot.lane.b32.xlu1 %v4380_v28, %s3174_s22  ;;  %v2120_v53 = vpop.permute.xlu0 %2119  ;;  %v2224_v28 = vld [vmem:[#allocation4 + $0xe] ss:$16 sm:$0xc] }
 0x706   : > { %2125 = vst.msk [vmem:[#allocation5 + $0x18] sm:$0xff] %vm1161_vm3, %v2120_v53  ;;  %v2157_v53 = vor.u32 %v2156_v52, %v2155_v42  ;;  %v2259_v42 = vld [vmem:[#allocation4 + $0x8f] ss:$16 sm:$0xc0]  ;;  %v4070_v52 = vld [vmem:[%s4300_s8 + $0x10] sm:$0xff] }
 0x707   : > { %2149 = vst.msk [vmem:[#allocation5 + $0x18] sm:$0xff] %vm1188_vm4, %v2144_v8  ;;  %v1237_v47 = vpop.permute.xlu1 %1236  ;;  %v2225_v8 = vor.u32 %v2224_v28, %v2223_v3 }
 0x708   : > { %1243 = vst.msk [vmem:[#allocation5] sm:$0xff] %vm1242_vm6, %v1237_v47  ;;  %v2226_v47 = vld [vmem:[#allocation4 + $0xe] ss:$16 sm:$0x30] }
 0x70d   : > { %1390 = vrot.lane.b32.xlu1 %v4381_v4, %s3175_s16 }
 0x70f   : > { %v1264_v35 = vpop.permute.xlu1 %1263 }
 0x710   : > { %1270 = vst.msk [vmem:[#allocation5] sm:$0xff] %vm1269_vm7, %v1264_v35  ;;  %v2227_v35 = vor.u32 %v2226_v47, %v2225_v8  ;;  %v4083_v47 = vld [vmem:[%s4300_s8 + $0x18] sm:$0xff] }
 0x715   : > { %1416 = vrot.lane.b32.xlu1 %v4382_v15, %s3176_s13  ;;  %v2228_v15 = vld [vmem:[#allocation4 + $0xe] ss:$16 sm:$0xc0] }
 0x717   : > { %v1291_v32 = vpop.permute.xlu1 %1290 }
 0x718   : > { %1297 = vst.msk [vmem:[#allocation5] sm:$0xff] %vm1296_vm8, %v1291_v32  ;;  %v1926_v32 = vld [vmem:[#allocation4 + $0x81] ss:$16 sm:$0x3] }
 0x71d   : > { %1442 = vrot.lane.b32.xlu1 %v1437_v59, %s3177_s15  ;;  %v1921_v59 = vor.u32 %v1920_v41, %v1919_v48  ;;  %v1931_v41 = vld [vmem:[#allocation4 + $0x81] ss:$16 sm:$0xc0] }
 0x71f   : > { %v1318_v60 = vpop.permute.xlu1 %1317  ;;  %v1923_v7 = vor.u32 %v1922_v25, %v1921_v59  ;;  %v1950_v59 = vld [vmem:[#allocation4 + $0x82] ss:$16 sm:$0x3] }
 0x720   : > { %1324 = vst.msk [vmem:[#allocation5] sm:$0xff] %vm1323_vm9, %v1318_v60  ;;  %v1927_v60 = vld [vmem:[#allocation4 + $0x81] ss:$16 sm:$0xc] }
 0x721   : > { %v1925_v27 = vor.u32 %v1924_v10, %v1923_v7  ;;  %v1951_v25 = vld [vmem:[#allocation4 + $0x82] ss:$16 sm:$0xc] }
 0x722   : > { %v1953_v7 = vld [vmem:[#allocation4 + $0x82] ss:$16 sm:$0x30] }
 0x723   : > { %v1955_v10 = vld [vmem:[#allocation4 + $0x82] ss:$16 sm:$0xc0] }
 0x725   : > { %1468 = vrot.lane.b32.xlu1 %v4383_v43, %s3178_s24  ;;  %v2229_v43 = vor.u32 %v2228_v15, %v2227_v35 }
 0x727   : > { %v1363_v13 = vpop.permute.xlu1 %1362  ;;  %v2279_v38 = vld [vmem:[#allocation5] sm:$0xff] }
 0x728   : > { %1368 = vst.msk [vmem:[#allocation5 + $0x8] sm:$0xff] %vm1161_vm3, %v1363_v13  ;;  %v1928_v13 = vor.u32 %v1927_v60, %v1926_v32 }
 0x72d   : > { %1494 = vrot.lane.b32.xlu1 %v4384_v9, %s3179_s26  ;;  %v1929_v9 = vld [vmem:[#allocation4 + $0x81] ss:$16 sm:$0x30] }
 0x72e   : > { %v1930_v48 = vor.u32 %v1929_v9, %v1928_v13  ;;  %v2192_v13 = vpop.permute.xlu0 %2191 }
 0x72f   : > { %v1389_v11 = vpop.permute.xlu1 %1388 }
 0x730   : > { %1394 = vst.msk [vmem:[#allocation5 + $0x8] sm:$0xff] %vm1188_vm4, %v1389_v11 }
 0x735   : > { %1520 = vrot.lane.b32.xlu1 %v4385_v46, %s3180_s27  ;;  %v1932_v46 = vor.u32 %v1931_v41, %v1930_v48  ;;  %v2216_v48 = vpop.permute.xlu2 %2215 }
 0x737   : > { %v1415_v39 = vpop.permute.xlu1 %1414 }
 0x738   : > { %1420 = vst.msk [vmem:[#allocation5 + $0x8] sm:$0xff] %vm1215_vm5, %v1415_v39  ;;  %v1952_v39 = vor.u32 %v1951_v25, %v1950_v59 }
 0x73a   : > { %v1954_v55 = vor.u32 %v1953_v7, %v1952_v39 }
 0x73c   : > { %v1956_v20 = vor.u32 %v1955_v10, %v1954_v55 }
 0x73d   : > { %1935 = vrot.lane.b32.xlu1 %v1925_v27, %s3174_s22  ;;  %v1986_v25 = vpop.permute.xlu2 %1985 }
 0x73f   : > { %v1441_v51 = vpop.permute.xlu1 %1440 }
 0x740   : > { %1446 = vst.msk [vmem:[#allocation5 + $0x8] sm:$0xff] %vm1242_vm6, %v1441_v51 }
 0x745   : > { %1959 = vrot.lane.b32.xlu1 %v1949_v5, %s3175_s16  ;;  %v2025_v5 = vld [vmem:[#allocation4 + $0x85] ss:$16 sm:$0x30]  ;;  %v2010_v10 = vpop.permute.xlu2 %2009 }
 0x746   : > { %v2026_v24 = vor.u32 %v2025_v5, %v2024_v18  ;;  %v2487_v18 = vunpack.c.l.bf16 %v4120_v50 }
 0x747   : > { %v1467_v2 = vpop.permute.xlu1 %1466 }
 0x748   : > { %1472 = vst.msk [vmem:[#allocation5 + $0x8] sm:$0xff] %vm1269_vm7, %v1467_v2  ;;  %v2027_v2 = vld [vmem:[#allocation4 + $0x85] ss:$16 sm:$0xc0] }
 0x749   : > { %v2028_v14 = vor.u32 %v2027_v2, %v2026_v24 }
 0x74d   : > { %1983 = vrot.lane.b32.xlu1 %v1973_v36, %s3176_s13  ;;  %v2113_v36 = vld [vmem:[#allocation4 + $0x89] ss:$16 sm:$0x30] }
 0x74e   : > { %v2114_v34 = vor.u32 %v2113_v36, %v2112_v1  ;;  %v4131_v1 = vld [vmem:[%s3339_s21 + $0x10] sm:$0xff] }
 0x74f   : > { %v1493_v29 = vpop.permute.xlu1 %1492 }
 0x750   : > { %1498 = vst.msk [vmem:[#allocation5 + $0x8] sm:$0xff] %vm1296_vm8, %v1493_v29  ;;  %v2115_v29 = vld [vmem:[#allocation4 + $0x89] ss:$16 sm:$0xc0] }
 0x751   : > { %v2116_v44 = vor.u32 %v2115_v29, %v2114_v34 }
 0x755   : > { %2007 = vrot.lane.b32.xlu1 %v1997_v16, %s3177_s15  ;;  %v2184_v16 = vor.u32 %v2183_v26, %v2182_v21 }
 0x757   : > { %v1519_v40 = vpop.permute.xlu1 %1518 }
 0x758   : > { %1524 = vst.msk [vmem:[#allocation5 + $0x8] sm:$0xff] %vm1323_vm9, %v1519_v40  ;;  %v2186_v40 = vor.u32 %v2185_v45, %v2184_v16  ;;  %v4148_v45 = vld [vmem:[%s3339_s21 + $0x20] sm:$0xff] }
 0x75a   : > { %v2188_v37 = vor.u32 %v2187_v19, %v2186_v40  ;;  %v2495_v40 = vunpack.c.l.bf16 %v4148_v45 }
 0x75d   : > { %2079 = vrot.lane.b32.xlu1 %v2069_v17, %s3180_s27  ;;  %v2256_v17 = vor.u32 %v2255_v54, %v2254_v30 }
 0x75f   : > { %v1266_v33 = vpop.permute.xlu1 %1265  ;;  %v2280_v15 = vld [vmem:[#allocation5 + $0x8] sm:$0xff] }
 0x760   : > { %1271 = vst.msk [vmem:[#allocation5 + $0x20] sm:$0xff] %vm1269_vm7, %v1266_v33  ;;  %v2258_v33 = vor.u32 %v2257_v22, %v2256_v17 }
 0x762   : > { %v2260_v3 = vor.u32 %v2259_v42, %v2258_v33 }
 0x765   : > { %2167 = vrot.lane.b32.xlu1 %v2157_v53, %s3176_s13  ;;  %v2293_v53 = vld [vmem:[%s4301_s9 + $0x10] sm:$0xff] }
 0x767   : > { %v1293_v4 = vpop.permute.xlu1 %1292 }
 0x768   : > { %1298 = vst.msk [vmem:[#allocation5 + $0x20] sm:$0xff] %vm1296_vm8, %v1293_v4  ;;  %v2296_v4 = vld [vmem:[%s4301_s9 + $0x28] sm:$0xff] }
 0x76d   : > { %2239 = vrot.lane.b32.xlu1 %v2229_v43, %s3179_s26 }
 0x76f   : > { %v1320_v11 = vpop.permute.xlu1 %1319 }
 0x770   : > { %1325 = vst.msk [vmem:[#allocation5 + $0x20] sm:$0xff] %vm1323_vm9, %v1320_v11  ;;  %v2058_v11 = vpop.permute.xlu0 %2057 }
 0x775   : > { %1937 = vrot.lane.b32.xlu1 %v1932_v46, %s3174_s22 }
 0x777   : > { %v1365_v49 = vpop.permute.xlu1 %1364  ;;  %v2283_v27 = vld [vmem:[#allocation5 + $0x20] sm:$0xff] }
 0x778   : > { %1369 = vst.msk [vmem:[#allocation5 + $0x28] sm:$0xff] %vm1161_vm3, %v1365_v49  ;;  %v2287_v51 = vpack.c.bf16 %v2283_v27, %v2279_v38  ;;  %v2146_v59 = vpop.permute.xlu0 %2145 }
 0x77a   : > { %2378 = vmatpush.bf16.msrb.mxu2 %v2287_v51 }
 0x77d   : > { %2892 = vmatmul.msk.bf16.vlgmr.msrb.gmra.mxu2 %vm796_vm1, %v4048_v31  ;;  %1961 = vrot.lane.b32.xlu1 %v1956_v20, %s3175_s16 }
 0x77f   : > { %v1391_v23 = vpop.permute.xlu1 %1390 }
 0x780   : > { %1395 = vst.msk [vmem:[#allocation5 + $0x28] sm:$0xff] %vm1188_vm4, %v1391_v23  ;;  %v2218_v39 = vpop.permute.xlu0 %2217 }
 0x785   : > { %2033 = vrot.lane.b32.xlu1 %v2028_v14, %s3178_s24  ;;  %s2584_s24 = scalar_lea.sflag [#allocation8], %s3335_s11 }
 0x787   : > { %v1417_v63 = vpop.permute.xlu1 %1416 }
 0x788   : > { %1421 = vst.msk [vmem:[#allocation5 + $0x28] sm:$0xff] %vm1215_vm5, %v1417_v63  ;;  %v2264_v49 = vpop.permute.xlu0 %2263  ;;  %v2491_v63 = vunpack.c.l.bf16 %v4131_v1 }
 0x78d   : > { %2893 = vmatmul.msk.bf16.gmra.mxu2 %vm796_vm1, %v4059_v57  ;;  %2121 = vrot.lane.b32.xlu1 %v2116_v44, %s3174_s22 }
 0x78f   : > { %v1443_v61 = vpop.permute.xlu1 %1442 }
 0x790   : > { %1447 = vst.msk [vmem:[#allocation5 + $0x28] sm:$0xff] %vm1242_vm6, %v1443_v61  ;;  %v4139_v34 = vpop.permute.xlu0 %2306  ;;  %v4151_v61 = vld [vmem:[%s3339_s21 + $0x30] sm:$0xff] }
 0x791   : > { %v2499_v30 = vunpack.c.l.bf16 %v4151_v61 }
 0x795   : > { %2193 = vrot.lane.b32.xlu1 %v2188_v37, %s3177_s15 }
 0x797   : > { %v1469_v62 = vpop.permute.xlu1 %1468 }
 0x798   : > { %1473 = vst.msk [vmem:[#allocation5 + $0x28] sm:$0xff] %vm1269_vm7, %v1469_v62 }
 0x79d   : > { %2894 = vmatmul.msk.bf16.gmra.mxu2 %vm796_vm1, %v4070_v52  ;;  %2265 = vrot.lane.b32.xlu1 %v2260_v3, %s3180_s27  ;;  %s2694_s27 = sshll.u32 %s3335_s11, 8 }
 0x79e   : > { %s4133_s29 = scalar_lea.vmem [#allocation11], %s2694_s27 }
 0x79f   : > { %v1495_v28 = vpop.permute.xlu1 %1494  ;;  %s2596_s30 = sshll.u32 %s4133_s29, 4  ;;  %s2597_s30 = int_to_ptr.vmem [resolvable:$true] %s2596_s30 }
 0x7a0   : > { %1499 = vst.msk [vmem:[#allocation5 + $0x28] sm:$0xff] %vm1296_vm8, %v1495_v28 }
 0x7a5   : > { %2311 = vperm.xlu1 %3030, %v2293_v53   ;;  %v407_v53 = vld [vmem:[%s3339_s21 + $0x40] sm:$0xff] }
 0x7a7   : > { %v1521_v8 = vpop.permute.xlu1 %1520 }
 0x7a8   : > { %1525 = vst.msk [vmem:[#allocation5 + $0x28] sm:$0xff] %vm1323_vm9, %v1521_v8  ;;  %v2503_v8 = vunpack.c.l.bf16 %v407_v53 }
 0x7ad   : > { %2895 = vmatmul.msk.bf16.gmra.mxu2 %vm796_vm1, %v4083_v47  ;;  %2326 = vperm.xlu1 %3030, %v2296_v4   ;;  %v4168_v4 = vpop.permute.xlu0 %2321 }
 0x7af   : > { %v1936_v35 = vpop.permute.xlu1 %1935  ;;  %v2284_v32 = vld [vmem:[#allocation5 + $0x28] sm:$0xff] }
 0x7b0   : > { %1941 = vst.msk [vmem:[#allocation5 + $0x10] sm:$0xff] %vm1161_vm3, %v1936_v35  ;;  %v2288_v60 = vpack.c.bf16 %v2284_v32, %v2280_v15 }
 0x7b2   : > { %2407 = vmatpush.bf16.msra.mxu0 %v2288_v60  ;;  %v409_v60 = vld [vmem:[%s3339_s21 + $0x50] sm:$0xff] }
 0x7b5   : > { %2896 = vmatmul.msk.bf16.vlgmr.msra.gmra.mxu0 %vm796_vm1, %v4048_v31 }
 0x7b7   : > { %v1960_v43 = vpop.permute.xlu1 %1959 }
 0x7b8   : > { %1965 = vst.msk [vmem:[#allocation5 + $0x10] sm:$0xff] %vm1188_vm4, %v1960_v43  ;;  %v2507_v43 = vunpack.c.l.bf16 %v409_v60 }
 0x7bf   : > { %v1984_v9 = vpop.permute.xlu1 %1983 }
 0x7c0   : > { %1989 = vst.msk [vmem:[#allocation5 + $0x10] sm:$0xff] %vm1215_vm5, %v1984_v9 }
 0x7c5   : > { %2897 = vmatmul.msk.bf16.gmra.mxu0 %vm796_vm1, %v4059_v57 }
 0x7c7   : > { %v2008_v41 = vpop.permute.xlu1 %2007 }
 0x7c8   : > { %2013 = vst.msk [vmem:[#allocation5 + $0x10] sm:$0xff] %vm1242_vm6, %v2008_v41 }
 0x7c9   : > { %2037 = vst.msk [vmem:[#allocation5 + $0x10] sm:$0xff] %vm1269_vm7, %v3987_v0 }
 0x7ca   : > { %2061 = vst.msk [vmem:[#allocation5 + $0x10] sm:$0xff] %vm1296_vm8, %v3981_v12  ;;  %v2082_v12 = vpop.permute.xlu2 %2081 }
 0x7cf   : > { %v2080_v46 = vpop.permute.xlu1 %2079 }
 0x7d0   : > { %2085 = vst.msk [vmem:[#allocation5 + $0x10] sm:$0xff] %vm1323_vm9, %v2080_v46 }
 0x7d2   : > { %v2170_v27 = vpop.permute.xlu2 %2169 }
 0x7d5   : > { %2898 = vmatmul.msk.bf16.gmra.mxu0 %vm796_vm1, %v4070_v52 }
 0x7d7   : > { %v2168_v7 = vpop.permute.xlu1 %2167  ;;  %v2281_v2 = vld [vmem:[#allocation5 + $0x10] sm:$0xff] }
 0x7d8   : > { %2173 = vst.msk [vmem:[#allocation5 + $0x18] sm:$0xff] %vm1215_vm5, %v2168_v7 }
 0x7d9   : > { %2197 = vst.msk [vmem:[#allocation5 + $0x18] sm:$0xff] %vm1242_vm6, %v2192_v13 }
 0x7da   : > { %2221 = vst.msk [vmem:[#allocation5 + $0x18] sm:$0xff] %vm1269_vm7, %v2216_v48  ;;  %v2242_v58 = vpop.permute.xlu2 %2241  ;;  %v411_v48 = vld [vmem:[%s3339_s21 + $0x60] sm:$0xff] }
 0x7db   : > { %v2511_v41 = vunpack.c.l.bf16 %v411_v48 }
 0x7df   : > { %v2240_v0 = vpop.permute.xlu1 %2239 }
 0x7e0   : > { %2245 = vst.msk [vmem:[#allocation5 + $0x18] sm:$0xff] %vm1296_vm8, %v2240_v0 }
 0x7e1   : > { %2269 = vst.msk [vmem:[#allocation5 + $0x18] sm:$0xff] %vm1323_vm9, %v2264_v49  ;;  %v413_v49 = vld [vmem:[%s3339_s21 + $0x70] sm:$0xff] }
 0x7e2   : > { %v4124_v5 = vpop.permute.xlu2 %2301 }
 0x7e5   : > { %2899 = vmatmul.msk.bf16.gmra.mxu0 %vm796_vm1, %v4083_v47 }
 0x7e7   : > { %v1938_v38 = vpop.permute.xlu1 %1937 }
 0x7e8   : > { %1942 = vst.msk [vmem:[#allocation5 + $0x30] sm:$0xff] %vm1161_vm3, %v1938_v38  ;;  %v2282_v54 = vld [vmem:[#allocation5 + $0x18] sm:$0xff]  ;;  %v4192_v38 = vpop.permute.xlu0 %2336 }
 0x7ea   : > { %v4159_v17 = vpop.permute.xlu2 %2316 }
 0x7ef   : > { %v1962_v55 = vpop.permute.xlu1 %1961 }
 0x7f0   : > { %1966 = vst.msk [vmem:[#allocation5 + $0x30] sm:$0xff] %vm1188_vm4, %v1962_v55 }
 0x7f1   : > { %1990 = vst.msk [vmem:[#allocation5 + $0x30] sm:$0xff] %vm1215_vm5, %v1986_v25 }
 0x7f2   : > { %2014 = vst.msk [vmem:[#allocation5 + $0x30] sm:$0xff] %vm1242_vm6, %v2010_v10 }
 0x7f7   : > { %v2034_v51 = vpop.permute.xlu1 %2033 }
 0x7f8   : > { %2038 = vst.msk [vmem:[#allocation5 + $0x30] sm:$0xff] %vm1269_vm7, %v2034_v51 }
 0x7f9   : > { %2062 = vst.msk [vmem:[#allocation5 + $0x30] sm:$0xff] %vm1296_vm8, %v2058_v11 }
 0x7fa   : > { %2086 = vst.msk [vmem:[#allocation5 + $0x30] sm:$0xff] %vm1323_vm9, %v2082_v12 }
 0x7ff   : > { %v2122_v20 = vpop.permute.xlu1 %2121 }
 0x800   : > { %2126 = vst.msk [vmem:[#allocation5 + $0x38] sm:$0xff] %vm1161_vm3, %v2122_v20  ;;  %v2380_v23 = vpop.f32.mrf.mxu2 }
 0x801   : > { %2150 = vst.msk [vmem:[#allocation5 + $0x38] sm:$0xff] %vm1188_vm4, %v2146_v59  ;;  %v2381_v24 = vadd.f32 %v2380_v23, %v4124_v5  ;;  %v2285_v56 = vld [vmem:[#allocation5 + $0x30] sm:$0xff]  ;;  %v4182_v59 = vpop.permute.xlu2 %2331  ;;  %v2496_v23 = vunpack.c.h.bf16 %v4148_v45 }
 0x802   : > { %2174 = vst.msk [vmem:[#allocation5 + $0x38] sm:$0xff] %vm1215_vm5, %v2170_v27  ;;  %v2289_v6 = vpack.c.bf16 %v2285_v56, %v2281_v2 }
 0x803   : > { %v2519_v14 = vadd.f32 %v2487_v18, %v2381_v24 }
 0x804   : > { %2436 = vmatpush.bf16.msra.mxu2 %v2289_v6  ;;  %v2500_v6 = vunpack.c.h.bf16 %v4151_v61  ;;  %v2512_v61 = vunpack.c.h.bf16 %v411_v48 }
 0x805   : > { %2551 = vst [vmem:[%s4133_s29] sm:$0xff] %v2519_v14 }
 0x807   : > { %2900 = vmatmul.msk.bf16.vlgmr.msra.gmra.mxu2 %vm796_vm1, %v4048_v31  ;;  %v2194_v36 = vpop.permute.xlu1 %2193 }
 0x808   : > { %2198 = vst.msk [vmem:[#allocation5 + $0x38] sm:$0xff] %vm1242_vm6, %v2194_v36  ;;  %v2382_v29 = vpop.f32.mrf.mxu2 }
 0x809   : > { %2222 = vst.msk [vmem:[#allocation5 + $0x38] sm:$0xff] %vm1269_vm7, %v2218_v39  ;;  %v2383_v21 = vadd.f32 %v2382_v29, %v4139_v34  ;;  %v2488_v39 = vunpack.c.h.bf16 %v4120_v50 }
 0x80a   : > { %2246 = vst.msk [vmem:[#allocation5 + $0x38] sm:$0xff] %vm1296_vm8, %v2242_v58  ;;  %v2492_v58 = vunpack.c.h.bf16 %v4131_v1 }
 0x80b   : > { %v2523_v26 = vadd.f32 %v2491_v63, %v2383_v21 }
 0x80d   : > { %2555 = vst [vmem:[%s4133_s29 + $0x20] sm:$0xff] %v2523_v26  ;;  %v2508_v26 = vunpack.c.h.bf16 %v409_v60 }
 0x80f   : > { %v2266_v44 = vpop.permute.xlu1 %2265 }
 0x810   : > { %2270 = vst.msk [vmem:[#allocation5 + $0x38] sm:$0xff] %vm1323_vm9, %v2266_v44  ;;  %v2385_v16 = vpop.f32.mrf.mxu2 }
 0x817   : > { %2901 = vmatmul.msk.bf16.gmra.mxu2 %vm796_vm1, %v4059_v57  ;;  %v4156_v19 = vpop.permute.xlu1 %2311  ;;  %v2286_v37 = vld [vmem:[#allocation5 + $0x38] sm:$0xff] }
 0x818   : > { %v2386_v22 = vadd.f32 %v2385_v16, %v4156_v19  ;;  %v2387_v62 = vpop.f32.mrf.mxu2  ;;  %v2290_v33 = vpack.c.bf16 %v2286_v37, %v2282_v54  ;;  %v2516_v54 = vunpack.c.h.bf16 %v413_v49 }
 0x819   : > { %v2388_v42 = vadd.f32 %v2387_v62, %v4159_v17 }
 0x81a   : > { %2465 = vmatpush.bf16.msrb.mxu0 %v2290_v33  ;;  %v2527_v3 = vadd.f32 %v2495_v40, %v2386_v22  ;;  %v400_v33 = vld [vmem:[%s3339_s21 + $0x8] sm:$0xff] }
 0x81b   : > { %v2531_v28 = vadd.f32 %v2499_v30, %v2388_v42  ;;  %v2489_v42 = vunpack.c.l.bf16 %v400_v33 }
 0x81c   : > { %2559 = vst [vmem:[%s4133_s29 + $0x40] sm:$0xff] %v2527_v3 }
 0x81d   : > { %2563 = vst [vmem:[%s4133_s29 + $0x60] sm:$0xff] %v2531_v28  ;;  %2904 = vmatmul.msk.bf16.vlgmr.msrb.gmra.mxu0 %vm796_vm1, %v4048_v31 }
 0x81f   : > { %v4175_v13 = vpop.permute.xlu1 %2326 }
 0x820   : > { %v2390_v35 = vpop.f32.mrf.mxu2 }
 0x821   : > { %v2391_v15 = vadd.f32 %v2390_v35, %v4168_v4 }
 0x823   : > { %v2535_v32 = vadd.f32 %v2503_v8, %v2391_v15  ;;  %v402_v8 = vld [vmem:[%s3339_s21 + $0x18] sm:$0xff] }
 0x824   : > { %v2493_v35 = vunpack.c.l.bf16 %v402_v8 }
 0x825   : > { %2567 = vst [vmem:[%s4133_s29 + $0x80] sm:$0xff] %v2535_v32 }
 0x827   : > { %2902 = vmatmul.msk.bf16.gmra.mxu2 %vm796_vm1, %v4070_v52 }
 0x828   : > { %v2392_v9 = vpop.f32.mrf.mxu2 }
 0x829   : > { %v2393_v31 = vadd.f32 %v2392_v9, %v4175_v13 }
 0x82b   : > { %v2539_v11 = vadd.f32 %v2507_v43, %v2393_v31  ;;  %v404_v43 = vld [vmem:[%s3339_s21 + $0x28] sm:$0xff]  ;;  %v2490_v31 = vunpack.c.h.bf16 %v400_v33 }
 0x82c   : > { %v2497_v9 = vunpack.c.l.bf16 %v404_v43 }
 0x82d   : > { %2571 = vst [vmem:[%s4133_s29 + $0xa0] sm:$0xff] %v2539_v11  ;;  %2905 = vmatmul.msk.bf16.gmra.mxu0 %vm796_vm1, %v4059_v57  ;;  %v2515_v57 = vunpack.c.l.bf16 %v413_v49 }
 0x830   : > { %v2395_v25 = vpop.f32.mrf.mxu2 }
 0x831   : > { %v2396_v46 = vadd.f32 %v2395_v25, %v4182_v59 }
 0x832   : > { %v2409_v7 = vpop.f32.mrf.mxu0 }
 0x833   : > { %v2543_v10 = vadd.f32 %v2511_v41, %v2396_v46  ;;  %v2410_v0 = vadd.f32 %v2409_v7, %v4124_v5  ;;  %v406_v7 = vld [vmem:[%s3339_s21 + $0x38] sm:$0xff] }
 0x835   : > { %2575 = vst [vmem:[%s4133_s29 + $0xc0] sm:$0xff] %v2543_v10  ;;  %v2520_v12 = vadd.f32 %v2488_v39, %v2410_v0  ;;  %v2501_v10 = vunpack.c.l.bf16 %v406_v7  ;;  %v2494_v0 = vunpack.c.h.bf16 %v402_v8 }
 0x837   : > { %2552 = vst [vmem:[%s4133_s29 + $0x8] sm:$0xff] %v2520_v12  ;;  %2903 = vmatmul.msk.bf16.gmra.mxu2 %vm796_vm1, %v4083_v47 }
 0x838   : > { %v2397_v27 = vpop.f32.mrf.mxu2 }
 0x839   : > { %v2398_v55 = vadd.f32 %v2397_v27, %v4192_v38 }
 0x83a   : > { %v2411_v51 = vpop.f32.mrf.mxu0 }
 0x83b   : > { %v2547_v50 = vadd.f32 %v2515_v57, %v2398_v55  ;;  %v2412_v20 = vadd.f32 %v2411_v51, %v4139_v34 }
 0x83d   : > { %2579 = vst [vmem:[%s4133_s29 + $0xe0] sm:$0xff] %v2547_v50  ;;  %v2524_v18 = vadd.f32 %v2492_v58, %v2412_v20  ;;  %2906 = vmatmul.msk.bf16.gmra.mxu0 %vm796_vm1, %v4070_v52  ;;  %v2504_v52 = vunpack.c.h.bf16 %v407_v53  ;;  %v2498_v50 = vunpack.c.h.bf16 %v404_v43 }
 0x83f   : > { %2556 = vst [vmem:[%s4133_s29 + $0x28] sm:$0xff] %v2524_v18 }
 0x842   : > { %v2414_v24 = vpop.f32.mrf.mxu0 }
 0x843   : > { %v2415_v2 = vadd.f32 %v2414_v24, %v4156_v19 }
 0x845   : > { %v2528_v56 = vadd.f32 %v2496_v23, %v2415_v2 }
 0x847   : > { %2560 = vst [vmem:[%s4133_s29 + $0x48] sm:$0xff] %v2528_v56 }
 0x84a   : > { %v2416_v14 = vpop.f32.mrf.mxu0 }
 0x84b   : > { %v2417_v1 = vadd.f32 %v2416_v14, %v4159_v17  ;;  %v2502_v14 = vunpack.c.h.bf16 %v406_v7 }
 0x84d   : > { %v2532_v36 = vadd.f32 %v2500_v6, %v2417_v1  ;;  %2907 = vmatmul.msk.bf16.gmra.mxu0 %vm796_vm1, %v4083_v47 }
 0x84f   : > { %2564 = vst [vmem:[%s4133_s29 + $0x68] sm:$0xff] %v2532_v36 }
 0x852   : > { %v2419_v63 = vpop.f32.mrf.mxu0 }
 0x853   : > { %v2420_v29 = vadd.f32 %v2419_v63, %v4168_v4 }
 0x855   : > { %v2536_v21 = vadd.f32 %v2504_v52, %v2420_v29 }
 0x857   : > { %2568 = vst [vmem:[%s4133_s29 + $0x88] sm:$0xff] %v2536_v21 }
 0x85a   : > { %v2421_v44 = vpop.f32.mrf.mxu0 }
 0x85b   : > { %v2422_v16 = vadd.f32 %v2421_v44, %v4175_v13 }
 0x85d   : > { %v2540_v45 = vadd.f32 %v2508_v26, %v2422_v16 }
 0x85f   : > { %2572 = vst [vmem:[%s4133_s29 + $0xa8] sm:$0xff] %v2540_v45 }
 0x862   : > { %v2424_v47 = vpop.f32.mrf.mxu0 }
 0x863   : > { %v2425_v40 = vadd.f32 %v2424_v47, %v4182_v59 }
 0x865   : > { %v2544_v30 = vadd.f32 %v2512_v61, %v2425_v40 }
 0x867   : > { %2576 = vst [vmem:[%s4133_s29 + $0xc8] sm:$0xff] %v2544_v30 }
 0x86a   : > { %v2426_v37 = vpop.f32.mrf.mxu0 }
 0x86b   : > { %v2427_v22 = vadd.f32 %v2426_v37, %v4192_v38 }
 0x86d   : > { %v2548_v62 = vadd.f32 %v2516_v54, %v2427_v22  ;;  %v414_v54 = vld [vmem:[%s3339_s21 + $0x78] sm:$0xff] }
 0x86f   : > { %2580 = vst [vmem:[%s4133_s29 + $0xe8] sm:$0xff] %v2548_v62 }
 0x88a   : > { %v2438_v3 = vpop.f32.mrf.mxu2 }
 0x88b   : > { %v2439_v28 = vadd.f32 %v2438_v3, %v4124_v5 }
 0x88d   : > { %v2521_v53 = vadd.f32 %v2489_v42, %v2439_v28 }
 0x88f   : > { %2553 = vst [vmem:[%s4133_s29 + $0x10] sm:$0xff] %v2521_v53 }
 0x892   : > { %v2440_v15 = vpop.f32.mrf.mxu2 }
 0x893   : > { %v2441_v32 = vadd.f32 %v2440_v15, %v4139_v34  ;;  %v2518_v15 = vunpack.c.h.bf16 %v414_v54 }
 0x895   : > { %v2525_v60 = vadd.f32 %v2493_v35, %v2441_v32 }
 0x897   : > { %2557 = vst [vmem:[%s4133_s29 + $0x30] sm:$0xff] %v2525_v60 }
 0x89a   : > { %v2443_v11 = vpop.f32.mrf.mxu2  ;;  %v2467_v48 = vpop.f32.mrf.mxu0 }
 0x89b   : > { %v2444_v41 = vadd.f32 %v2443_v11, %v4156_v19  ;;  %v2468_v25 = vadd.f32 %v2467_v48, %v4124_v5  ;;  %v408_v5 = vld [vmem:[%s3339_s21 + $0x48] sm:$0xff] }
 0x89c   : > { %v2505_v51 = vunpack.c.l.bf16 %v408_v5  ;;  %v2506_v44 = vunpack.c.h.bf16 %v408_v5 }
 0x89d   : > { %v2529_v46 = vadd.f32 %v2497_v9, %v2444_v41  ;;  %v2522_v39 = vadd.f32 %v2490_v31, %v2468_v25 }
 0x89f   : > { %2561 = vst [vmem:[%s4133_s29 + $0x50] sm:$0xff] %v2529_v46 }
 0x8a0   : > { %2554 = vst [vmem:[%s4133_s29 + $0x18] sm:$0xff] %v2522_v39 }
 0x8a2   : > { %v2445_v49 = vpop.f32.mrf.mxu2  ;;  %v2469_v12 = vpop.f32.mrf.mxu0 }
 0x8a3   : > { %v2446_v57 = vadd.f32 %v2445_v49, %v4159_v17  ;;  %v2470_v27 = vadd.f32 %v2469_v12, %v4139_v34  ;;  %v410_v34 = vld [vmem:[%s3339_s21 + $0x58] sm:$0xff] }
 0x8a4   : > { %v2509_v6 = vunpack.c.l.bf16 %v410_v34  ;;  %v2510_v37 = vunpack.c.h.bf16 %v410_v34 }
 0x8a5   : > { %v2533_v55 = vadd.f32 %v2501_v10, %v2446_v57  ;;  %v2526_v58 = vadd.f32 %v2494_v0, %v2470_v27 }
 0x8a7   : > { %2565 = vst [vmem:[%s4133_s29 + $0x70] sm:$0xff] %v2533_v55 }
 0x8a8   : > { %2558 = vst [vmem:[%s4133_s29 + $0x38] sm:$0xff] %v2526_v58 }
 0x8aa   : > { %v2448_v20 = vpop.f32.mrf.mxu2  ;;  %v2472_v18 = vpop.f32.mrf.mxu0 }
 0x8ab   : > { %v2449_v23 = vadd.f32 %v2448_v20, %v4168_v4  ;;  %v2473_v24 = vadd.f32 %v2472_v18, %v4156_v19  ;;  %v412_v19 = vld [vmem:[%s3339_s21 + $0x68] sm:$0xff]  ;;  %s2949_s21 = sshll.u32 %s3259_s17, 5 }
 0x8ac   : > { %v2513_v26 = vunpack.c.l.bf16 %v412_v19  ;;  %s2595_s26 = scalar_lea.hbm %s4302_s10, %s2949_s21 }
 0x8ad   : > { %v2537_v2 = vadd.f32 %v2505_v51, %v2449_v23  ;;  %v2530_v56 = vadd.f32 %v2498_v50, %v2473_v24  ;;  %s2598_s20 = sshll.u32 %s2595_s26, 4  ;;  %s2599_s20 = int_to_ptr.hbm [resolvable:$true] %s2598_s20 }
 0x8ae   : > { %s3111_s18 = sshra.s32 %s2599_s20, 4  ;;  %s3112_s18 = int_to_ptr.hbm [resolvable:$true] %s3111_s18 }
 0x8af   : > { %2569 = vst [vmem:[%s4133_s29 + $0x90] sm:$0xff] %v2537_v2  ;;  %s3113_s17 = scalar_lea.hbm %s3112_s18, 256  ;;  %p3118_p0 = scmp.lt.s32.totalorder %s3112_s18, %s4302_s10 }
 0x8b0   : > { %2562 = vst [vmem:[%s4133_s29 + $0x58] sm:$0xff] %v2530_v56  ;;  %p3114_p4 = scmp.ne.s32.totalorder %s3112_s18, %s3113_s17  ;;  %p3119_p3 = scmp.lt.s32.totalorder %s3117_s28, %s3113_s17 }
 0x8b2   : > { %v2450_v1 = vpop.f32.mrf.mxu2  ;;  %v2474_v36 = vpop.f32.mrf.mxu0  ;;  %p3115_p6 = pnand %p3114_p4, %p3290_p11  ;;  %p3120_p5 = por %p3119_p3, %p3118_p0 }
 0x8b3   : > { %v2451_v52 = vadd.f32 %v2450_v1, %v4175_v13  ;;  %v2475_v63 = vadd.f32 %v2474_v36, %v4159_v17  ;;  %v2517_v17 = vunpack.c.l.bf16 %v414_v54 }
 0x8b4   : > { %p3116_p13 = pneg %p3115_p6 }
 0x8b5   : > { %v2541_v29 = vadd.f32 %v2509_v6, %v2451_v52  ;;  %v2534_v21 = vadd.f32 %v2502_v14, %v2475_v63 }
 0x8b6   : > { %p3121_p8 = pnand %p3120_p5, %p3116_p13 }
 0x8b7   : > { %2573 = vst [vmem:[%s4133_s29 + $0xb0] sm:$0xff] %v2541_v29 }
 0x8b8   : > { %2566 = vst [vmem:[%s4133_s29 + $0x78] sm:$0xff] %v2534_v21 }
 0x8ba   : > { %v2453_v16 = vpop.f32.mrf.mxu2  ;;  %v2477_v45 = vpop.f32.mrf.mxu0 }
 0x8bb   : > { %v2454_v61 = vadd.f32 %v2453_v16, %v4182_v59  ;;  %v2478_v47 = vadd.f32 %v2477_v45, %v4168_v4  ;;  %v2514_v4 = vunpack.c.h.bf16 %v412_v19 }
 0x8bd   : > { %v2545_v40 = vadd.f32 %v2513_v26, %v2454_v61  ;;  %v2538_v30 = vadd.f32 %v2506_v44, %v2478_v47 }
 0x8bf   : > { %2577 = vst [vmem:[%s4133_s29 + $0xd0] sm:$0xff] %v2545_v40 }
 0x8c0   : > { %2570 = vst [vmem:[%s4133_s29 + $0x98] sm:$0xff] %v2538_v30 }
 0x8c2   : > { %v2455_v22 = vpop.f32.mrf.mxu2  ;;  %v2479_v62 = vpop.f32.mrf.mxu0 }
 0x8c3   : > { %v2456_v33 = vadd.f32 %v2455_v22, %v4192_v38  ;;  %v2480_v42 = vadd.f32 %v2479_v62, %v4175_v13 }
 0x8c5   : > { %v2549_v3 = vadd.f32 %v2517_v17, %v2456_v33  ;;  %v2542_v28 = vadd.f32 %v2510_v37, %v2480_v42 }
 0x8c7   : > { %2581 = vst [vmem:[%s4133_s29 + $0xf0] sm:$0xff] %v2549_v3 }
 0x8c8   : > { %2574 = vst [vmem:[%s4133_s29 + $0xb8] sm:$0xff] %v2542_v28 }
 0x8ca   : > { %v2482_v53 = vpop.f32.mrf.mxu0 }
 0x8cb   : > { %v2483_v8 = vadd.f32 %v2482_v53, %v4182_v59 }
 0x8cd   : > { %v2546_v35 = vadd.f32 %v2514_v4, %v2483_v8 }
 0x8cf   : > { %2578 = vst [vmem:[%s4133_s29 + $0xd8] sm:$0xff] %v2546_v35 }
 0x8d2   : > { %v2484_v13 = vpop.f32.mrf.mxu0 }
 0x8d3   : > { %v2485_v32 = vadd.f32 %v2484_v13, %v4192_v38 }
 0x8d5   : > { %v2550_v60 = vadd.f32 %v2518_v15, %v2485_v32 }
 0x8d7   : > { %2582 = vst [vmem:[%s4133_s29 + $0xf8] sm:$0xff] %v2550_v60 }
 0x8d8   : > { %3124 = shalt.err (!%p3121_p8)
}
 0x8d9   : > { %s3181_s11 = smov 512   ;;  %s3182_s12 = smov 1024  }
 0x8da   : > { %2965 = dma.vmem_to_hbm [thread:$0]  (%p3290_p11), %s2597_s30, 4096, %s2599_s20, %s2584_s24, %s3181_s11, %s3182_s12, %s3175_s16  }
 0x8db PF: > { %s4386_s27 = sld [smem:[#allocation15_spill]] }
 0x8dc   : > { %s4388_s21 = sld [smem:[#allocation17_spill]] }
 0x8e1   : > { %s2613_s23 = sand.u32 1, %s4386_s27  }
 0x8e2   : > { %p4389_p9 = scmp.ge.s32.totalorder %s4388_s21, 2  ;;  %s2614_s13 = scalar_lea.sflag [#allocation8], %s2613_s23 }
 0x8e4   : > { %p2976_p10 = pnand %p4389_p9, %p3294_p12 }
 0x8e6   : > { %p2977_p1 = pneg %p2976_p10 }
 0x8e8   : > { %3150 = dma.done.wait (%p2977_p1), %s2614_s13, 4096  }
 0x8e9   : > { %3152 = vsyncadd (%p2977_p1), %s2614_s13, 4294963200  ;;  %s4390_s16 = sld [smem:[#allocation18_spill]]  ;;  %s4393_s13 = smov %s3159_s14 }
 0x8ea   : > { %s4391_s26 = sld [smem:[#allocation16_spill]] }
 0x8eb   : > { %s4392_s15 = sld [smem:[#allocation19_spill]] }
 0x8ef   : > { %p24_p2 = scmp.ge.s32.totalorder %s4390_s16, 4  }
 0x8f0   : > { %s4394_s14 = smov %s4391_s26 }
 0x8f1   :  { %26 = sbr.rel (!%p24_p2) target bundleno = 8 (0x8), region = 141 }
 0x8f6   :  { %2620 = vsyncpa [#allocation7], 1 }
 0x8f7   :  { %2622 = vsyncpa [#allocation7 + $0x1], 1 }
 0x8f8   :  { %2623 = vsyncpa [#allocation8], 1 }
 0x8f9   :  { %2625 = vsyncpa [#allocation8 + $0x1], 1 }
 0x8fa   :  { %2626 = vsyncpa [#allocation9], 1 }
 0x8fb   :  { %2628 = vsyncpa [#allocation9 + $0x1], 1 }

</bundles_post_ra>
